<compile_context>
chip_gen: v7x
topology: tpu7x:2x2x1
jax: 0.10.0
libtpu: 0.0.40
codegen_flags: <defaults>
</compile_context>

<pallas_src>
import jax
import jax.numpy as jnp
from jax import lax
from jax.experimental import pallas as pl
from jax.experimental.pallas import tpu as pltpu


LANE = 128
# Safe on every generation (v5e/v6e: 128 MiB physical, v7x: 64 MiB physical);
# tile sizes below are chosen to stay far under this.
_VMEM_LIMIT = 32 * 1024 * 1024


def _round_up(x, m):
    return ((x + m - 1) // m) * m


def _pick_row_tile(H, W, C, budget_bytes=2 * 1024 * 1024):
    """Largest divisor th of H so a (th, W, C) f32 tile stays under budget."""
    th = H
    while th > 1 and th * W * C * 4 > budget_bytes:
        th -= 1
        while H % th:
            th -= 1
    return th


# ----------------------------- Pallas kernels ------------------------------

def _conv3x3_bn_relu_kernel(x_ref, w_ref, shift_ref, o_ref):
    """3x3 / stride-1 conv + folded-BN shift + ReLU for one row tile.

    x_ref:     (1, H+2, W+2, Cin)  spatially padded image; block index is
               constant along the row-tile grid axis, so it stays resident in
               VMEM for the whole image (one HBM fetch per batch element).
    w_ref:     (3, 3, Cin, Cout)   bf16, BN scale folded into the columns.
    shift_ref: (1, Cout)           f32 BN shift.
    o_ref:     (1, th, W, Cout)
    """
    i = pl.program_id(1)
    th = o_ref.shape[1]
    W = o_ref.shape[2]
    cin = x_ref.shape[3]
    cout = o_ref.shape[3]

    row0 = i * th
    acc = jnp.zeros((th * W, cout), jnp.float32)
    for kh in range(3):
        for kw in range(3):
            patch = x_ref[0, pl.ds(row0 + kh, th), pl.ds(kw, W), :]   # (th,W,Cin)
            acc += jnp.dot(patch.reshape(th * W, cin), w_ref[kh, kw],
                           preferred_element_type=jnp.float32)
    y = jnp.maximum(acc + shift_ref[...], 0.0)
    o_ref[...] = y.reshape(1, th, W, cout).astype(o_ref.dtype)


def _make_concat_kernel(num_src, with_identity):
    """1x1 concat conv: sum of per-source dots (concat never materialized)."""
    def kernel(*refs):
        xs = refs[:num_src]
        ws = refs[num_src:2 * num_src]
        shift_ref = refs[2 * num_src]
        id_ref = refs[2 * num_src + 1] if with_identity else None
        o_ref = refs[-1]

        th = o_ref.shape[1]
        W = o_ref.shape[2]
        cout = o_ref.shape[3]

        acc = jnp.zeros((th * W, cout), jnp.float32)
        for x_ref, w_ref in zip(xs, ws):
            cin = x_ref.shape[3]
            acc += jnp.dot(x_ref[...].reshape(th * W, cin), w_ref[...],
                           preferred_element_type=jnp.float32)
        y = jnp.maximum(acc + shift_ref[...], 0.0)
        if with_identity:
            y = y + id_ref[...].reshape(th * W, -1).astype(jnp.float32)
        o_ref[...] = y.reshape(1, th, W, cout).astype(o_ref.dtype)
    return kernel


# ------------------------------ kernel wrappers -----------------------------

def conv3x3_bn_relu(x_nhwc, w_folded, shift, out_dtype=jnp.bfloat16):
    """x_nhwc (N,H,W,Cin) bf16; w_folded (3,3,Cin,Cout) bf16; shift (Cout,) f32."""
    N, H, W, Cin = x_nhwc.shape
    Cout = w_folded.shape[-1]
    th = _pick_row_tile(H, W, Cout)

    # Single spatial halo-pad copy (replaces the former 9x HBM im2col).
    xp = jnp.pad(x_nhwc, ((0, 0), (1, 1), (1, 1), (0, 0)))
    shift2d = shift.reshape(1, Cout).astype(jnp.float32)

    return pl.pallas_call(
        _conv3x3_bn_relu_kernel,
        out_shape=jax.ShapeDtypeStruct((N, H, W, Cout), out_dtype),
        grid_spec=pltpu.PrefetchScalarGridSpec(
            num_scalar_prefetch=0,
            grid=(N, H // th),
            in_specs=[
                pl.BlockSpec((1, H + 2, W + 2, Cin), lambda n, i: (n, 0, 0, 0)),
                pl.BlockSpec((3, 3, Cin, Cout), lambda n, i: (0, 0, 0, 0)),
                pl.BlockSpec((1, Cout), lambda n, i: (0, 0)),
            ],
            out_specs=pl.BlockSpec((1, th, W, Cout), lambda n, i: (n, i, 0, 0)),
        ),
        compiler_params=pltpu.CompilerParams(
            dimension_semantics=("parallel", "arbitrary"),
            vmem_limit_bytes=_VMEM_LIMIT,
        ),
    )(xp, w_folded, shift2d)


def concat_conv1x1_bn_relu(xs, ws, shift, identity=None, out_dtype=jnp.float32):
    """1x1 conv over the (virtual) channel-concat of `xs` with per-source
    K-slices `ws`; + BN shift + ReLU (+ identity add). No concat in HBM."""
    N, H, W, _ = xs[0].shape
    Cout = ws[0].shape[-1]
    th = _pick_row_tile(H, W, Cout)
    shift2d = shift.reshape(1, Cout).astype(jnp.float32)
    with_id = identity is not None

    in_specs, args = [], []
    for x in xs:
        in_specs.append(pl.BlockSpec((1, th, W, x.shape[-1]),
                                     lambda n, i: (n, i, 0, 0)))
        args.append(x)
    for w in ws:
        in_specs.append(pl.BlockSpec(w.shape, lambda n, i: (0, 0)))
        args.append(w)
    in_specs.append(pl.BlockSpec((1, Cout), lambda n, i: (0, 0)))
    args.append(shift2d)
    if with_id:
        in_specs.append(pl.BlockSpec((1, th, W, identity.shape[-1]),
                                     lambda n, i: (n, i, 0, 0)))
        args.append(identity)

    return pl.pallas_call(
        _make_concat_kernel(len(xs), with_id),
        out_shape=jax.ShapeDtypeStruct((N, H, W, Cout), out_dtype),
        grid_spec=pltpu.PrefetchScalarGridSpec(
            num_scalar_prefetch=0,
            grid=(N, H // th),
            in_specs=in_specs,
            out_specs=pl.BlockSpec((1, th, W, Cout), lambda n, i: (n, i, 0, 0)),
        ),
        compiler_params=pltpu.CompilerParams(
            dimension_semantics=("parallel", "parallel"),
            vmem_limit_bytes=_VMEM_LIMIT,
        ),
    )(*args)


# ------------------------- parameters & preparation -------------------------

def init_osa_params(key, in_ch, stage_ch, concat_ch, layer_per_block, eps=1e-5):
    """Random params analogous to fresh nn.Conv2d / nn.BatchNorm2d (eval mode)."""
    params = {"layers": [], "dims": (in_ch, stage_ch, concat_ch, layer_per_block)}
    ch = in_ch
    for _ in range(layer_per_block):
        key, k1, k2, k3 = jax.random.split(key, 4)
        w = jax.random.normal(k1, (3, 3, ch, stage_ch), jnp.float32) / jnp.sqrt(9.0 * ch)
        gamma = 1.0 + 0.1 * jax.random.normal(k2, (stage_ch,), jnp.float32)
        beta = 0.1 * jax.random.normal(k3, (stage_ch,), jnp.float32)
        # eval-mode BN (running_mean=0, running_var=1) folded into scale/shift
        params["layers"].append((w, gamma / jnp.sqrt(1.0 + eps), beta))
        ch = stage_ch
    ch_cat = in_ch + layer_per_block * stage_ch
    key, k1, k2, k3 = jax.random.split(key, 4)
    wc = jax.random.normal(k1, (ch_cat, concat_ch), jnp.float32) / jnp.sqrt(float(ch_cat))
    gamma = 1.0 + 0.1 * jax.random.normal(k2, (concat_ch,), jnp.float32)
    beta = 0.1 * jax.random.normal(k3, (concat_ch,), jnp.float32)
    params["concat"] = (wc, gamma / jnp.sqrt(1.0 + eps), beta)
    return params


def prepare_osa_params(params, compute_dtype=jnp.bfloat16):
    """Fold BN scale into weights, pad channel dims to 128, cast to bf16,
    split the concat weight along K per source feature map."""
    in_ch, stage_ch, concat_ch, L = params["dims"]
    cin_p = _round_up(in_ch, LANE)
    cst_p = _round_up(stage_ch, LANE)
    cct_p = _round_up(concat_ch, LANE)

    prepped = {"dims": params["dims"], "padded_dims": (cin_p, cst_p, cct_p)}

    layers = []
    ch, ch_p = in_ch, cin_p
    for (w, scale, shift) in params["layers"]:
        wf = w * scale[None, None, None, :]
        wf = jnp.pad(wf, ((0, 0), (0, 0), (0, ch_p - ch), (0, cst_p - stage_ch)))
        sh = jnp.pad(shift, (0, cst_p - stage_ch))
        layers.append((wf.astype(compute_dtype), sh.astype(jnp.float32)))
        ch, ch_p = stage_ch, cst_p
    prepped["layers"] = layers

    wc, scale, shift = params["concat"]
    wcf = wc * scale[None, :]
    srcs_c = [in_ch] + [stage_ch] * L
    srcs_cp = [cin_p] + [cst_p] * L
    ws, off = [], 0
    for c, cp in zip(srcs_c, srcs_cp):
        wk = jnp.pad(wcf[off:off + c], ((0, cp - c), (0, cct_p - concat_ch)))
        ws.append(wk.astype(compute_dtype))
        off += c
    prepped["concat"] = (ws, jnp.pad(shift, (0, cct_p - concat_ch)).astype(jnp.float32))
    return prepped


# --------------------------------- forward ----------------------------------

def osa_forward(prepped, x_nchw, identity=False, compute_dtype=jnp.bfloat16):
    in_ch, stage_ch, concat_ch, L = prepped["dims"]
    cin_p, cst_p, cct_p = prepped["padded_dims"]
    if identity:
        assert in_ch == concat_ch, "identity add requires in_ch == concat_ch"
    N, C, H, W = x_nchw.shape
    assert C == in_ch

    x = jnp.transpose(x_nchw, (0, 2, 3, 1))                    # NCHW -> NHWC
    x = jnp.pad(x, ((0, 0), (0, 0), (0, 0), (0, cin_p - in_ch))).astype(compute_dtype)

    outputs = [x]
    cur = x
    for (wf, sh) in prepped["layers"]:
        cur = conv3x3_bn_relu(cur, wf, sh, out_dtype=compute_dtype)
        outputs.append(cur)

    ws, sh_c = prepped["concat"]
    y = concat_conv1x1_bn_relu(outputs, ws, sh_c,
                               identity=x if identity else None,
                               out_dtype=jnp.float32)
    y = y[..., :concat_ch]
    return jnp.transpose(y, (0, 3, 1, 2))                      # back to NCHW


# --------------------------- pure-JAX references -----------------------------

def osa_forward_matched_ref(params, x_nchw, identity=False, compute_dtype=jnp.bfloat16):
    """Reference with the SAME numerical recipe as the kernels (folded scale,
    bf16 operands, f32 accumulation, bf16 inter-layer activations)."""
    x = jnp.transpose(x_nchw, (0, 2, 3, 1)).astype(compute_dtype)
    identity_feat = x
    outputs = [x]
    cur = x
    for (w, scale, shift) in params["layers"]:
        wf = (w * scale[None, None, None, :]).astype(compute_dtype)
        y = lax.conv_general_dilated(cur, wf, (1, 1), [(1, 1), (1, 1)],
                                     dimension_numbers=("NHWC", "HWIO", "NHWC"),
                                     preferred_element_type=jnp.float32)
        cur = jnp.maximum(y + shift, 0.0).astype(compute_dtype)
        outputs.append(cur)
    xcat = jnp.concatenate(outputs, axis=-1)
    wc, scale, shift = params["concat"]
    wcf = (wc * scale[None, :]).astype(compute_dtype)
    y = lax.conv_general_dilated(xcat, wcf.reshape(1, 1, *wc.shape), (1, 1),
                                 [(0, 0), (0, 0)],
                                 dimension_numbers=("NHWC", "HWIO", "NHWC"),
                                 preferred_element_type=jnp.float32)
    y = jnp.maximum(y + shift, 0.0)
    if identity:
        y = y + identity_feat.astype(jnp.float32)
    return jnp.transpose(y, (0, 3, 1, 2))


def osa_forward_f32_ref(params, x_nchw, identity=False):
    """Full-precision reference of the original module semantics."""
    x = jnp.transpose(x_nchw, (0, 2, 3, 1))
    identity_feat = x
    outputs = [x]
    cur = x
    for (w, scale, shift) in params["layers"]:
        y = lax.conv_general_dilated(cur, w, (1, 1), [(1, 1), (1, 1)],
                                     dimension_numbers=("NHWC", "HWIO", "NHWC"))
        cur = jnp.maximum(y * scale + shift, 0.0)
        outputs.append(cur)
    xcat = jnp.concatenate(outputs, axis=-1)
    wc, scale, shift = params["concat"]
    y = lax.conv_general_dilated(xcat, wc.reshape(1, 1, *wc.shape), (1, 1),
                                 [(0, 0), (0, 0)],
                                 dimension_numbers=("NHWC", "HWIO", "NHWC"))
    y = jnp.maximum(y * scale + shift, 0.0)
    if identity:
        y = y + identity_feat
    return jnp.transpose(y, (0, 3, 1, 2))


# ----------------------------------- main ------------------------------------

if __name__ == "__main__":
    key = jax.random.PRNGKey(0)
    in_ch, stage_ch, concat_ch, layer_per_block = 8, 8, 8, 3
    N, H, W = 2, 16, 16

    kp, kx = jax.random.split(key)
    params = init_osa_params(kp, in_ch, stage_ch, concat_ch, layer_per_block)
    prepped = prepare_osa_params(params)
    x = jax.random.normal(kx, (N, in_ch, H, W), jnp.float32)

    fwd = jax.jit(lambda inp: osa_forward(prepped, inp, identity=True))
    out = jax.block_until_ready(fwd(x))
    assert out.shape == (N, concat_ch, H, W), out.shape

    ref_m = osa_forward_matched_ref(params, x, identity=True)   # same bf16 recipe
    ref_f = osa_forward_f32_ref(params, x, identity=True)       # original f32 math
    err_m = float(jnp.max(jnp.abs(out - ref_m)))
    err_f = float(jnp.max(jnp.abs(out - ref_f)))
    assert jnp.allclose(out, ref_m, rtol=1e-2, atol=1e-2), f"matched-ref max_err={err_m}"
    assert jnp.allclose(out, ref_f, rtol=5e-2, atol=5e-2), f"f32-ref max_err={err_f}"
    print("KERNEL_OK")
</pallas_src>

<mosaic_0001>
module attributes {stable_mosaic.version = 11 : i64} {
  func.func @kernel(%arg0: i32, %arg1: i32, %arg2: memref<1x16x16x128xbf16, #tpu.memory_space<vmem>>, %arg3: memref<1x16x16x128xbf16, #tpu.memory_space<vmem>>, %arg4: memref<1x16x16x128xbf16, #tpu.memory_space<vmem>>, %arg5: memref<1x16x16x128xbf16, #tpu.memory_space<vmem>>, %arg6: memref<128x128xbf16, #tpu.memory_space<vmem>>, %arg7: memref<128x128xbf16, #tpu.memory_space<vmem>>, %arg8: memref<128x128xbf16, #tpu.memory_space<vmem>>, %arg9: memref<128x128xbf16, #tpu.memory_space<vmem>>, %arg10: memref<1x128xf32, #tpu.memory_space<vmem>>, %arg11: memref<1x16x16x128xbf16, #tpu.memory_space<vmem>>, %arg12: memref<1x16x16x128xf32, #tpu.memory_space<vmem>>) attributes {dimension_semantics = [#tpu.dimension_semantics<parallel>, #tpu.dimension_semantics<parallel>], iteration_bounds = array<i64: 2, 1>, scalar_prefetch = 0 : i64, scratch_operands = 0 : i64, tpu.core_type = #tpu.core_type<tc>, window_params = [{transform_indices = @transform_0, window_bounds = array<i64: 1, 16, 16, 128>}, {transform_indices = @transform_1, window_bounds = array<i64: 1, 16, 16, 128>}, {transform_indices = @transform_2, window_bounds = array<i64: 1, 16, 16, 128>}, {transform_indices = @transform_3, window_bounds = array<i64: 1, 16, 16, 128>}, {pipeline_mode = #tpu.pipeline_mode<synchronous>, transform_indices = @transform_4, window_bounds = array<i64: 128, 128>}, {pipeline_mode = #tpu.pipeline_mode<synchronous>, transform_indices = @transform_5, window_bounds = array<i64: 128, 128>}, {pipeline_mode = #tpu.pipeline_mode<synchronous>, transform_indices = @transform_6, window_bounds = array<i64: 128, 128>}, {pipeline_mode = #tpu.pipeline_mode<synchronous>, transform_indices = @transform_7, window_bounds = array<i64: 128, 128>}, {pipeline_mode = #tpu.pipeline_mode<synchronous>, transform_indices = @transform_8, window_bounds = array<i64: 1, 128>}, {transform_indices = @transform_9, window_bounds = array<i64: 1, 16, 16, 128>}, {transform_indices = @transform_10, window_bounds = array<i64: 1, 16, 16, 128>}]} {
    %cst = arith.constant 0.000000e+00 : f32
    %0 = vector.broadcast %cst : f32 to vector<256x128xf32>
    %c0 = arith.constant 0 : index
    %c0_0 = arith.constant 0 : index
    %c0_1 = arith.constant 0 : index
    %c0_2 = arith.constant 0 : index
    %1 = vector.load %arg2[%c0, %c0_0, %c0_1, %c0_2] : memref<1x16x16x128xbf16, #tpu.memory_space<vmem>>, vector<1x16x16x128xbf16>
    %2 = vector.shape_cast %1 : vector<1x16x16x128xbf16> to vector<256x128xbf16>
    %c0_3 = arith.constant 0 : index
    %c0_4 = arith.constant 0 : index
    %3 = vector.load %arg6[%c0_3, %c0_4] : memref<128x128xbf16, #tpu.memory_space<vmem>>, vector<128x128xbf16>
    %cst_5 = arith.constant dense<0.000000e+00> : vector<256x128xf32>
    %4 = tpu.matmul %2, %3, %cst_5 {dimension_numbers = #tpu.dot_dimension_numbers<[1], [0], [0], [1], [0, 0, 1, 1], [], []>} : vector<256x128xbf16>, vector<128x128xbf16>, vector<256x128xf32> -> vector<256x128xf32>
    %5 = arith.addf %0, %4 : vector<256x128xf32>
    %c0_6 = arith.constant 0 : index
    %c0_7 = arith.constant 0 : index
    %c0_8 = arith.constant 0 : index
    %c0_9 = arith.constant 0 : index
    %6 = vector.load %arg3[%c0_6, %c0_7, %c0_8, %c0_9] : memref<1x16x16x128xbf16, #tpu.memory_space<vmem>>, vector<1x16x16x128xbf16>
    %7 = vector.shape_cast %6 : vector<1x16x16x128xbf16> to vector<256x128xbf16>
    %c0_10 = arith.constant 0 : index
    %c0_11 = arith.constant 0 : index
    %8 = vector.load %arg7[%c0_10, %c0_11] : memref<128x128xbf16, #tpu.memory_space<vmem>>, vector<128x128xbf16>
    %cst_12 = arith.constant dense<0.000000e+00> : vector<256x128xf32>
    %9 = tpu.matmul %7, %8, %cst_12 {dimension_numbers = #tpu.dot_dimension_numbers<[1], [0], [0], [1], [0, 0, 1, 1], [], []>} : vector<256x128xbf16>, vector<128x128xbf16>, vector<256x128xf32> -> vector<256x128xf32>
    %10 = arith.addf %5, %9 : vector<256x128xf32>
    %c0_13 = arith.constant 0 : index
    %c0_14 = arith.constant 0 : index
    %c0_15 = arith.constant 0 : index
    %c0_16 = arith.constant 0 : index
    %11 = vector.load %arg4[%c0_13, %c0_14, %c0_15, %c0_16] : memref<1x16x16x128xbf16, #tpu.memory_space<vmem>>, vector<1x16x16x128xbf16>
    %12 = vector.shape_cast %11 : vector<1x16x16x128xbf16> to vector<256x128xbf16>
    %c0_17 = arith.constant 0 : index
    %c0_18 = arith.constant 0 : index
    %13 = vector.load %arg8[%c0_17, %c0_18] : memref<128x128xbf16, #tpu.memory_space<vmem>>, vector<128x128xbf16>
    %cst_19 = arith.constant dense<0.000000e+00> : vector<256x128xf32>
    %14 = tpu.matmul %12, %13, %cst_19 {dimension_numbers = #tpu.dot_dimension_numbers<[1], [0], [0], [1], [0, 0, 1, 1], [], []>} : vector<256x128xbf16>, vector<128x128xbf16>, vector<256x128xf32> -> vector<256x128xf32>
    %15 = arith.addf %10, %14 : vector<256x128xf32>
    %c0_20 = arith.constant 0 : index
    %c0_21 = arith.constant 0 : index
    %c0_22 = arith.constant 0 : index
    %c0_23 = arith.constant 0 : index
    %16 = vector.load %arg5[%c0_20, %c0_21, %c0_22, %c0_23] : memref<1x16x16x128xbf16, #tpu.memory_space<vmem>>, vector<1x16x16x128xbf16>
    %17 = vector.shape_cast %16 : vector<1x16x16x128xbf16> to vector<256x128xbf16>
    %c0_24 = arith.constant 0 : index
    %c0_25 = arith.constant 0 : index
    %18 = vector.load %arg9[%c0_24, %c0_25] : memref<128x128xbf16, #tpu.memory_space<vmem>>, vector<128x128xbf16>
    %cst_26 = arith.constant dense<0.000000e+00> : vector<256x128xf32>
    %19 = tpu.matmul %17, %18, %cst_26 {dimension_numbers = #tpu.dot_dimension_numbers<[1], [0], [0], [1], [0, 0, 1, 1], [], []>} : vector<256x128xbf16>, vector<128x128xbf16>, vector<256x128xf32> -> vector<256x128xf32>
    %20 = arith.addf %15, %19 : vector<256x128xf32>
    %c0_27 = arith.constant 0 : index
    %c0_28 = arith.constant 0 : index
    %21 = vector.load %arg10[%c0_27, %c0_28] : memref<1x128xf32, #tpu.memory_space<vmem>>, vector<1x128xf32>
    %22 = vector.broadcast %21 : vector<1x128xf32> to vector<256x128xf32>
    %23 = arith.addf %20, %22 : vector<256x128xf32>
    %cst_29 = arith.constant 0.000000e+00 : f32
    %24 = vector.broadcast %cst_29 : f32 to vector<256x128xf32>
    %25 = arith.maximumf %23, %24 : vector<256x128xf32>
    %c0_30 = arith.constant 0 : index
    %c0_31 = arith.constant 0 : index
    %c0_32 = arith.constant 0 : index
    %c0_33 = arith.constant 0 : index
    %26 = vector.load %arg11[%c0_30, %c0_31, %c0_32, %c0_33] : memref<1x16x16x128xbf16, #tpu.memory_space<vmem>>, vector<1x16x16x128xbf16>
    %27 = vector.shape_cast %26 : vector<1x16x16x128xbf16> to vector<256x128xbf16>
    %28 = arith.extf %27 : vector<256x128xbf16> to vector<256x128xf32>
    %29 = arith.addf %25, %28 : vector<256x128xf32>
    %30 = vector.shape_cast %29 : vector<256x128xf32> to vector<1x16x16x128xf32>
    %c0_34 = arith.constant 0 : index
    %c0_35 = arith.constant 0 : index
    %c0_36 = arith.constant 0 : index
    %c0_37 = arith.constant 0 : index
    %31 = vector.load %arg12[%c0_34, %c0_35, %c0_36, %c0_37] : memref<1x16x16x128xf32, #tpu.memory_space<vmem>>, vector<1x16x16x128xf32>
    tpu.vector_store %arg12[%c0_34, %c0_35, %c0_36, %c0_37], %30 {strides = array<i32>} : memref<1x16x16x128xf32, #tpu.memory_space<vmem>>, vector<1x16x16x128xf32>,
    return
  }
  func.func @transform_0(%arg0: i32, %arg1: i32) -> (i32, i32, i32, i32) {
    %c0_i32 = arith.constant 0 : i32
    %c0_i32_0 = arith.constant 0 : i32
    %c0_i32_1 = arith.constant 0 : i32
    return %arg0, %arg1, %c0_i32, %c0_i32_0 : i32, i32, i32, i32
  }
  func.func @transform_1(%arg0: i32, %arg1: i32) -> (i32, i32, i32, i32) {
    %c0_i32 = arith.constant 0 : i32
    %c0_i32_0 = arith.constant 0 : i32
    %c0_i32_1 = arith.constant 0 : i32
    return %arg0, %arg1, %c0_i32, %c0_i32_0 : i32, i32, i32, i32
  }
  func.func @transform_2(%arg0: i32, %arg1: i32) -> (i32, i32, i32, i32) {
    %c0_i32 = arith.constant 0 : i32
    %c0_i32_0 = arith.constant 0 : i32
    %c0_i32_1 = arith.constant 0 : i32
    return %arg0, %arg1, %c0_i32, %c0_i32_0 : i32, i32, i32, i32
  }
  func.func @transform_3(%arg0: i32, %arg1: i32) -> (i32, i32, i32, i32) {
    %c0_i32 = arith.constant 0 : i32
    %c0_i32_0 = arith.constant 0 : i32
    %c0_i32_1 = arith.constant 0 : i32
    return %arg0, %arg1, %c0_i32, %c0_i32_0 : i32, i32, i32, i32
  }
  func.func @transform_4(%arg0: i32, %arg1: i32) -> (i32, i32) {
    %c0_i32 = arith.constant 0 : i32
    %c0_i32_0 = arith.constant 0 : i32
    %c0_i32_1 = arith.constant 0 : i32
    return %c0_i32, %c0_i32_0 : i32, i32
  }
  func.func @transform_5(%arg0: i32, %arg1: i32) -> (i32, i32) {
    %c0_i32 = arith.constant 0 : i32
    %c0_i32_0 = arith.constant 0 : i32
    %c0_i32_1 = arith.constant 0 : i32
    return %c0_i32, %c0_i32_0 : i32, i32
  }
  func.func @transform_6(%arg0: i32, %arg1: i32) -> (i32, i32) {
    %c0_i32 = arith.constant 0 : i32
    %c0_i32_0 = arith.constant 0 : i32
    %c0_i32_1 = arith.constant 0 : i32
    return %c0_i32, %c0_i32_0 : i32, i32
  }
  func.func @transform_7(%arg0: i32, %arg1: i32) -> (i32, i32) {
    %c0_i32 = arith.constant 0 : i32
    %c0_i32_0 = arith.constant 0 : i32
    %c0_i32_1 = arith.constant 0 : i32
    return %c0_i32, %c0_i32_0 : i32, i32
  }
  func.func @transform_8(%arg0: i32, %arg1: i32) -> (i32, i32) {
    %c0_i32 = arith.constant 0 : i32
    %c0_i32_0 = arith.constant 0 : i32
    %c0_i32_1 = arith.constant 0 : i32
    return %c0_i32, %c0_i32_0 : i32, i32
  }
  func.func @transform_9(%arg0: i32, %arg1: i32) -> (i32, i32, i32, i32) {
    %c0_i32 = arith.constant 0 : i32
    %c0_i32_0 = arith.constant 0 : i32
    %c0_i32_1 = arith.constant 0 : i32
    return %arg0, %arg1, %c0_i32, %c0_i32_0 : i32, i32, i32, i32
  }
  func.func @transform_10(%arg0: i32, %arg1: i32) -> (i32, i32, i32, i32) {
    %c0_i32 = arith.constant 0 : i32
    %c0_i32_0 = arith.constant 0 : i32
    %c0_i32_1 = arith.constant 0 : i32
    return %arg0, %arg1, %c0_i32, %c0_i32_0 : i32, i32, i32, i32
  }
}

module attributes {stable_mosaic.version = 11 : i64} {
  func.func @_conv3x3_bn_relu_kernel(%arg0: i32, %arg1: i32, %arg2: memref<1x18x18x128xbf16, #tpu.memory_space<vmem>>, %arg3: memref<3x3x128x128xbf16, #tpu.memory_space<vmem>>, %arg4: memref<1x128xf32, #tpu.memory_space<vmem>>, %arg5: memref<1x16x16x128xbf16, #tpu.memory_space<vmem>>) attributes {dimension_semantics = [#tpu.dimension_semantics<parallel>, #tpu.dimension_semantics<arbitrary>], iteration_bounds = array<i64: 2, 1>, scalar_prefetch = 0 : i64, scratch_operands = 0 : i64, tpu.core_type = #tpu.core_type<tc>, window_params = [{transform_indices = @transform_0, window_bounds = array<i64: 1, 18, 18, 128>}, {pipeline_mode = #tpu.pipeline_mode<synchronous>, transform_indices = @transform_1, window_bounds = array<i64: 3, 3, 128, 128>}, {pipeline_mode = #tpu.pipeline_mode<synchronous>, transform_indices = @transform_2, window_bounds = array<i64: 1, 128>}, {transform_indices = @transform_3, window_bounds = array<i64: 1, 16, 16, 128>}]} {
    %c16_i32 = arith.constant 16 : i32
    %0 = arith.muli %arg1, %c16_i32 : i32
    %cst = arith.constant 0.000000e+00 : f32
    %1 = vector.broadcast %cst : f32 to vector<256x128xf32>
    %c0_i32 = arith.constant 0 : i32
    %2 = arith.addi %0, %c0_i32 : i32
    %c0 = arith.constant 0 : index
    %3 = arith.index_cast %2 : i32 to index
    %c0_0 = arith.constant 0 : index
    %c0_1 = arith.constant 0 : index
    %4 = vector.load %arg2[%c0, %3, %c0_0, %c0_1] : memref<1x18x18x128xbf16, #tpu.memory_space<vmem>>, vector<1x16x16x128xbf16>
    %5 = vector.shape_cast %4 : vector<1x16x16x128xbf16> to vector<16x16x128xbf16>
    %6 = vector.shape_cast %5 : vector<16x16x128xbf16> to vector<256x128xbf16>
    %c0_2 = arith.constant 0 : index
    %c0_3 = arith.constant 0 : index
    %c0_4 = arith.constant 0 : index
    %c0_5 = arith.constant 0 : index
    %7 = vector.load %arg3[%c0_2, %c0_3, %c0_4, %c0_5] : memref<3x3x128x128xbf16, #tpu.memory_space<vmem>>, vector<1x1x128x128xbf16>
    %8 = vector.shape_cast %7 : vector<1x1x128x128xbf16> to vector<128x128xbf16>
    %cst_6 = arith.constant dense<0.000000e+00> : vector<256x128xf32>
    %9 = tpu.matmul %6, %8, %cst_6 {dimension_numbers = #tpu.dot_dimension_numbers<[1], [0], [0], [1], [0, 0, 1, 1], [], []>} : vector<256x128xbf16>, vector<128x128xbf16>, vector<256x128xf32> -> vector<256x128xf32>
    %10 = arith.addf %1, %9 : vector<256x128xf32>
    %c0_i32_7 = arith.constant 0 : i32
    %11 = arith.addi %0, %c0_i32_7 : i32
    %c0_8 = arith.constant 0 : index
    %12 = arith.index_cast %11 : i32 to index
    %c1 = arith.constant 1 : index
    %c0_9 = arith.constant 0 : index
    %13 = vector.load %arg2[%c0_8, %12, %c1, %c0_9] : memref<1x18x18x128xbf16, #tpu.memory_space<vmem>>, vector<1x16x16x128xbf16>
    %14 = vector.shape_cast %13 : vector<1x16x16x128xbf16> to vector<16x16x128xbf16>
    %15 = vector.shape_cast %14 : vector<16x16x128xbf16> to vector<256x128xbf16>
    %c0_10 = arith.constant 0 : index
    %c1_11 = arith.constant 1 : index
    %c0_12 = arith.constant 0 : index
    %c0_13 = arith.constant 0 : index
    %16 = vector.load %arg3[%c0_10, %c1_11, %c0_12, %c0_13] : memref<3x3x128x128xbf16, #tpu.memory_space<vmem>>, vector<1x1x128x128xbf16>
    %17 = vector.shape_cast %16 : vector<1x1x128x128xbf16> to vector<128x128xbf16>
    %cst_14 = arith.constant dense<0.000000e+00> : vector<256x128xf32>
    %18 = tpu.matmul %15, %17, %cst_14 {dimension_numbers = #tpu.dot_dimension_numbers<[1], [0], [0], [1], [0, 0, 1, 1], [], []>} : vector<256x128xbf16>, vector<128x128xbf16>, vector<256x128xf32> -> vector<256x128xf32>
    %19 = arith.addf %10, %18 : vector<256x128xf32>
    %c0_i32_15 = arith.constant 0 : i32
    %20 = arith.addi %0, %c0_i32_15 : i32
    %c0_16 = arith.constant 0 : index
    %21 = arith.index_cast %20 : i32 to index
    %c2 = arith.constant 2 : index
    %c0_17 = arith.constant 0 : index
    %22 = vector.load %arg2[%c0_16, %21, %c2, %c0_17] : memref<1x18x18x128xbf16, #tpu.memory_space<vmem>>, vector<1x16x16x128xbf16>
    %23 = vector.shape_cast %22 : vector<1x16x16x128xbf16> to vector<16x16x128xbf16>
    %24 = vector.shape_cast %23 : vector<16x16x128xbf16> to vector<256x128xbf16>
    %c0_18 = arith.constant 0 : index
    %c2_19 = arith.constant 2 : index
    %c0_20 = arith.constant 0 : index
    %c0_21 = arith.constant 0 : index
    %25 = vector.load %arg3[%c0_18, %c2_19, %c0_20, %c0_21] : memref<3x3x128x128xbf16, #tpu.memory_space<vmem>>, vector<1x1x128x128xbf16>
    %26 = vector.shape_cast %25 : vector<1x1x128x128xbf16> to vector<128x128xbf16>
    %cst_22 = arith.constant dense<0.000000e+00> : vector<256x128xf32>
    %27 = tpu.matmul %24, %26, %cst_22 {dimension_numbers = #tpu.dot_dimension_numbers<[1], [0], [0], [1], [0, 0, 1, 1], [], []>} : vector<256x128xbf16>, vector<128x128xbf16>, vector<256x128xf32> -> vector<256x128xf32>
    %28 = arith.addf %19, %27 : vector<256x128xf32>
    %c1_i32 = arith.constant 1 : i32
    %29 = arith.addi %0, %c1_i32 : i32
    %c0_23 = arith.constant 0 : index
    %30 = arith.index_cast %29 : i32 to index
    %c0_24 = arith.constant 0 : index
    %c0_25 = arith.constant 0 : index
    %31 = vector.load %arg2[%c0_23, %30, %c0_24, %c0_25] : memref<1x18x18x128xbf16, #tpu.memory_space<vmem>>, vector<1x16x16x128xbf16>
    %32 = vector.shape_cast %31 : vector<1x16x16x128xbf16> to vector<16x16x128xbf16>
    %33 = vector.shape_cast %32 : vector<16x16x128xbf16> to vector<256x128xbf16>
    %c1_26 = arith.constant 1 : index
    %c0_27 = arith.constant 0 : index
    %c0_28 = arith.constant 0 : index
    %c0_29 = arith.constant 0 : index
    %34 = vector.load %arg3[%c1_26, %c0_27, %c0_28, %c0_29] : memref<3x3x128x128xbf16, #tpu.memory_space<vmem>>, vector<1x1x128x128xbf16>
    %35 = vector.shape_cast %34 : vector<1x1x128x128xbf16> to vector<128x128xbf16>
    %cst_30 = arith.constant dense<0.000000e+00> : vector<256x128xf32>
    %36 = tpu.matmul %33, %35, %cst_30 {dimension_numbers = #tpu.dot_dimension_numbers<[1], [0], [0], [1], [0, 0, 1, 1], [], []>} : vector<256x128xbf16>, vector<128x128xbf16>, vector<256x128xf32> -> vector<256x128xf32>
    %37 = arith.addf %28, %36 : vector<256x128xf32>
    %c1_i32_31 = arith.constant 1 : i32
    %38 = arith.addi %0, %c1_i32_31 : i32
    %c0_32 = arith.constant 0 : index
    %39 = arith.index_cast %38 : i32 to index
    %c1_33 = arith.constant 1 : index
    %c0_34 = arith.constant 0 : index
    %40 = vector.load %arg2[%c0_32, %39, %c1_33, %c0_34] : memref<1x18x18x128xbf16, #tpu.memory_space<vmem>>, vector<1x16x16x128xbf16>
    %41 = vector.shape_cast %40 : vector<1x16x16x128xbf16> to vector<16x16x128xbf16>
    %42 = vector.shape_cast %41 : vector<16x16x128xbf16> to vector<256x128xbf16>
    %c1_35 = arith.constant 1 : index
    %c1_36 = arith.constant 1 : index
    %c0_37 = arith.constant 0 : index
    %c0_38 = arith.constant 0 : index
    %43 = vector.load %arg3[%c1_35, %c1_36, %c0_37, %c0_38] : memref<3x3x128x128xbf16, #tpu.memory_space<vmem>>, vector<1x1x128x128xbf16>
    %44 = vector.shape_cast %43 : vector<1x1x128x128xbf16> to vector<128x128xbf16>
    %cst_39 = arith.constant dense<0.000000e+00> : vector<256x128xf32>
    %45 = tpu.matmul %42, %44, %cst_39 {dimension_numbers = #tpu.dot_dimension_numbers<[1], [0], [0], [1], [0, 0, 1, 1], [], []>} : vector<256x128xbf16>, vector<128x128xbf16>, vector<256x128xf32> -> vector<256x128xf32>
    %46 = arith.addf %37, %45 : vector<256x128xf32>
    %c1_i32_40 = arith.constant 1 : i32
    %47 = arith.addi %0, %c1_i32_40 : i32
    %c0_41 = arith.constant 0 : index
    %48 = arith.index_cast %47 : i32 to index
    %c2_42 = arith.constant 2 : index
    %c0_43 = arith.constant 0 : index
    %49 = vector.load %arg2[%c0_41, %48, %c2_42, %c0_43] : memref<1x18x18x128xbf16, #tpu.memory_space<vmem>>, vector<1x16x16x128xbf16>
    %50 = vector.shape_cast %49 : vector<1x16x16x128xbf16> to vector<16x16x128xbf16>
    %51 = vector.shape_cast %50 : vector<16x16x128xbf16> to vector<256x128xbf16>
    %c1_44 = arith.constant 1 : index
    %c2_45 = arith.constant 2 : index
    %c0_46 = arith.constant 0 : index
    %c0_47 = arith.constant 0 : index
    %52 = vector.load %arg3[%c1_44, %c2_45, %c0_46, %c0_47] : memref<3x3x128x128xbf16, #tpu.memory_space<vmem>>, vector<1x1x128x128xbf16>
    %53 = vector.shape_cast %52 : vector<1x1x128x128xbf16> to vector<128x128xbf16>
    %cst_48 = arith.constant dense<0.000000e+00> : vector<256x128xf32>
    %54 = tpu.matmul %51, %53, %cst_48 {dimension_numbers = #tpu.dot_dimension_numbers<[1], [0], [0], [1], [0, 0, 1, 1], [], []>} : vector<256x128xbf16>, vector<128x128xbf16>, vector<256x128xf32> -> vector<256x128xf32>
    %55 = arith.addf %46, %54 : vector<256x128xf32>
    %c2_i32 = arith.constant 2 : i32
    %56 = arith.addi %0, %c2_i32 : i32
    %c0_49 = arith.constant 0 : index
    %57 = arith.index_cast %56 : i32 to index
    %c0_50 = arith.constant 0 : index
    %c0_51 = arith.constant 0 : index
    %58 = vector.load %arg2[%c0_49, %57, %c0_50, %c0_51] : memref<1x18x18x128xbf16, #tpu.memory_space<vmem>>, vector<1x16x16x128xbf16>
    %59 = vector.shape_cast %58 : vector<1x16x16x128xbf16> to vector<16x16x128xbf16>
    %60 = vector.shape_cast %59 : vector<16x16x128xbf16> to vector<256x128xbf16>
    %c2_52 = arith.constant 2 : index
    %c0_53 = arith.constant 0 : index
    %c0_54 = arith.constant 0 : index
    %c0_55 = arith.constant 0 : index
    %61 = vector.load %arg3[%c2_52, %c0_53, %c0_54, %c0_55] : memref<3x3x128x128xbf16, #tpu.memory_space<vmem>>, vector<1x1x128x128xbf16>
    %62 = vector.shape_cast %61 : vector<1x1x128x128xbf16> to vector<128x128xbf16>
    %cst_56 = arith.constant dense<0.000000e+00> : vector<256x128xf32>
    %63 = tpu.matmul %60, %62, %cst_56 {dimension_numbers = #tpu.dot_dimension_numbers<[1], [0], [0], [1], [0, 0, 1, 1], [], []>} : vector<256x128xbf16>, vector<128x128xbf16>, vector<256x128xf32> -> vector<256x128xf32>
    %64 = arith.addf %55, %63 : vector<256x128xf32>
    %c2_i32_57 = arith.constant 2 : i32
    %65 = arith.addi %0, %c2_i32_57 : i32
    %c0_58 = arith.constant 0 : index
    %66 = arith.index_cast %65 : i32 to index
    %c1_59 = arith.constant 1 : index
    %c0_60 = arith.constant 0 : index
    %67 = vector.load %arg2[%c0_58, %66, %c1_59, %c0_60] : memref<1x18x18x128xbf16, #tpu.memory_space<vmem>>, vector<1x16x16x128xbf16>
    %68 = vector.shape_cast %67 : vector<1x16x16x128xbf16> to vector<16x16x128xbf16>
    %69 = vector.shape_cast %68 : vector<16x16x128xbf16> to vector<256x128xbf16>
    %c2_61 = arith.constant 2 : index
    %c1_62 = arith.constant 1 : index
    %c0_63 = arith.constant 0 : index
    %c0_64 = arith.constant 0 : index
    %70 = vector.load %arg3[%c2_61, %c1_62, %c0_63, %c0_64] : memref<3x3x128x128xbf16, #tpu.memory_space<vmem>>, vector<1x1x128x128xbf16>
    %71 = vector.shape_cast %70 : vector<1x1x128x128xbf16> to vector<128x128xbf16>
    %cst_65 = arith.constant dense<0.000000e+00> : vector<256x128xf32>
    %72 = tpu.matmul %69, %71, %cst_65 {dimension_numbers = #tpu.dot_dimension_numbers<[1], [0], [0], [1], [0, 0, 1, 1], [], []>} : vector<256x128xbf16>, vector<128x128xbf16>, vector<256x128xf32> -> vector<256x128xf32>
    %73 = arith.addf %64, %72 : vector<256x128xf32>
    %c2_i32_66 = arith.constant 2 : i32
    %74 = arith.addi %0, %c2_i32_66 : i32
    %c0_67 = arith.constant 0 : index
    %75 = arith.index_cast %74 : i32 to index
    %c2_68 = arith.constant 2 : index
    %c0_69 = arith.constant 0 : index
    %76 = vector.load %arg2[%c0_67, %75, %c2_68, %c0_69] : memref<1x18x18x128xbf16, #tpu.memory_space<vmem>>, vector<1x16x16x128xbf16>
    %77 = vector.shape_cast %76 : vector<1x16x16x128xbf16> to vector<16x16x128xbf16>
    %78 = vector.shape_cast %77 : vector<16x16x128xbf16> to vector<256x128xbf16>
    %c2_70 = arith.constant 2 : index
    %c2_71 = arith.constant 2 : index
    %c0_72 = arith.constant 0 : index
    %c0_73 = arith.constant 0 : index
    %79 = vector.load %arg3[%c2_70, %c2_71, %c0_72, %c0_73] : memref<3x3x128x128xbf16, #tpu.memory_space<vmem>>, vector<1x1x128x128xbf16>
    %80 = vector.shape_cast %79 : vector<1x1x128x128xbf16> to vector<128x128xbf16>
    %cst_74 = arith.constant dense<0.000000e+00> : vector<256x128xf32>
    %81 = tpu.matmul %78, %80, %cst_74 {dimension_numbers = #tpu.dot_dimension_numbers<[1], [0], [0], [1], [0, 0, 1, 1], [], []>} : vector<256x128xbf16>, vector<128x128xbf16>, vector<256x128xf32> -> vector<256x128xf32>
    %82 = arith.addf %73, %81 : vector<256x128xf32>
    %c0_75 = arith.constant 0 : index
    %c0_76 = arith.constant 0 : index
    %83 = vector.load %arg4[%c0_75, %c0_76] : memref<1x128xf32, #tpu.memory_space<vmem>>, vector<1x128xf32>
    %84 = vector.broadcast %83 : vector<1x128xf32> to vector<256x128xf32>
    %85 = arith.addf %82, %84 : vector<256x128xf32>
    %cst_77 = arith.constant 0.000000e+00 : f32
    %86 = vector.broadcast %cst_77 : f32 to vector<256x128xf32>
    %87 = arith.maximumf %85, %86 : vector<256x128xf32>
    %88 = vector.shape_cast %87 : vector<256x128xf32> to vector<1x16x16x128xf32>
    %89 = arith.truncf %88 : vector<1x16x16x128xf32> to vector<1x16x16x128xbf16>
    %c0_78 = arith.constant 0 : index
    %c0_79 = arith.constant 0 : index
    %c0_80 = arith.constant 0 : index
    %c0_81 = arith.constant 0 : index
    %90 = vector.load %arg5[%c0_78, %c0_79, %c0_80, %c0_81] : memref<1x16x16x128xbf16, #tpu.memory_space<vmem>>, vector<1x16x16x128xbf16>
    tpu.vector_store %arg5[%c0_78, %c0_79, %c0_80, %c0_81], %89 {strides = array<i32>} : memref<1x16x16x128xbf16, #tpu.memory_space<vmem>>, vector<1x16x16x128xbf16>,
    return
  }
  func.func @transform_0(%arg0: i32, %arg1: i32) -> (i32, i32, i32, i32) {
    %c0_i32 = arith.constant 0 : i32
    %c0_i32_0 = arith.constant 0 : i32
    %c0_i32_1 = arith.constant 0 : i32
    %c0_i32_2 = arith.constant 0 : i32
    return %arg0, %c0_i32, %c0_i32_0, %c0_i32_1 : i32, i32, i32, i32
  }
  func.func @transform_1(%arg0: i32, %arg1: i32) -> (i32, i32, i32, i32) {
    %c0_i32 = arith.constant 0 : i32
    %c0_i32_0 = arith.constant 0 : i32
    %c0_i32_1 = arith.constant 0 : i32
    %c0_i32_2 = arith.constant 0 : i32
    %c0_i32_3 = arith.constant 0 : i32
    return %c0_i32, %c0_i32_0, %c0_i32_1, %c0_i32_2 : i32, i32, i32, i32
  }
  func.func @transform_2(%arg0: i32, %arg1: i32) -> (i32, i32) {
    %c0_i32 = arith.constant 0 : i32
    %c0_i32_0 = arith.constant 0 : i32
    %c0_i32_1 = arith.constant 0 : i32
    return %c0_i32, %c0_i32_0 : i32, i32
  }
  func.func @transform_3(%arg0: i32, %arg1: i32) -> (i32, i32, i32, i32) {
    %c0_i32 = arith.constant 0 : i32
    %c0_i32_0 = arith.constant 0 : i32
    %c0_i32_1 = arith.constant 0 : i32
    return %arg0, %arg1, %c0_i32, %c0_i32_0 : i32, i32, i32, i32
  }
}

</mosaic_0001>

<bundles_post_ra>
// kernel: _lambda_.7
= control target key start
LH: loop header
LB: loop body
LE: loop exit
PB: predicated region body
PF: predicated region fallthrough
CT: control target
= control target key end

     0   :  { %s3200_s13 = smov 0   ;;  %s3202_s14 = smov 0   ;;  %s3513_s0 = inlined_call_operand.vmem [shape: bf16[2,16,16,128], index: 0, kind: input, shape index: {}, may-alias: {0,9}]   ;;  %s3514_s1 = inlined_call_operand.vmem [shape: bf16[2,16,16,128], index: 1, kind: input, shape index: {}]   ;;  %s3515_s2 = inlined_call_operand.vmem [shape: bf16[2,16,16,128], index: 2, kind: input, shape index: {}]   ;;  %s3516_s3 = inlined_call_operand.vmem [shape: bf16[2,16,16,128], index: 3, kind: input, shape index: {}]   ;;  %s3517_s4 = inlined_call_operand.vmem [shape: bf16[128,128], index: 4, kind: input, shape index: {}]   ;;  %s3518_s5 = inlined_call_operand.vmem [shape: bf16[128,128], index: 5, kind: input, shape index: {}]   ;;  %s3519_s6 = inlined_call_operand.vmem [shape: bf16[128,128], index: 6, kind: input, shape index: {}]   ;;  %s3520_s7 = inlined_call_operand.vmem [shape: bf16[128,128], index: 7, kind: input, shape index: {}]   ;;  %s3521_s8 = inlined_call_operand.vmem [shape: f32[1,128], index: 8, kind: input, shape index: {}]   ;;  %s3522_s9 = inlined_call_operand.vmem [shape: bf16[2,16,16,128], index: 9, kind: input, shape index: {}, may-alias: {0,9}]   ;;  %s3523_s10 = inlined_call_operand.vmem [shape: f32[2,16,16,128], index: 10, kind: output, shape index: {}]  }
   0x1   :  { %s3204_s15 = smov 0  }
   0x2 LB: > { %s32_s16 = sadd.s32 1, %s3139_s14  ;;  %p2420_p0 = scmp.ge.s32.totalorder %s3143_s15, 1  ;;  %s3143_s15 = sphi %s3204_s15, %s20_s15   ;;  %s3139_s14 = sphi %s3202_s14, %s3525_s14   ;;  %s3135_s13 = sphi %s3200_s13, %s3524_s13  }
   0x3   : > { %p34_p1 = scmp.ge.s32.totalorder %s32_s16, 2  ;;  %p406_p2 = scmp.lt.s32.totalorder %s3143_s15, 3 }
   0x5   : > { %s3527_s16 = smov (%p34_p1, %s32_s16), 0  ;;  %p407_p3 = pnand %p2420_p0, %p406_p2 }
   0x6   : > { %v3025_v0 = vld [vmem:[%s3518_s5] sm:$0xff] (!%p407_p3)   ;;  %v3027_v2 = vld [vmem:[%s3518_s5 + $0x8] sm:$0xff] (!%p407_p3)   ;;  %p495_p4 = scmp.lt.s32.totalorder (!%p407_p3), %s3135_s13, 1  ;;  %v3029_v4 = vld [vmem:[%s3518_s5 + $0x10] sm:$0xff] (!%p407_p3)  }
   0x7   : > { %410 = sbr.rel (%p407_p3) target bundleno = 384 (0x180), region = 60  ;;  %v3026_v1 = vld [vmem:[%s3519_s6] sm:$0xff] (!%p407_p3)   ;;  %2713 = vmatprep.subr.bf16.mxu1 (!%p407_p3), %v3025_v0  ;;  %v3028_v3 = vld [vmem:[%s3519_s6 + $0x8] sm:$0xff] (!%p407_p3)   ;;  %v3030_v5 = vld [vmem:[%s3519_s6 + $0x10] sm:$0xff] (!%p407_p3)  }
   0x8   : > { %2809 = vmatprep.subr.bf16.mxu0 (!%p407_p3), %v3026_v1  ;;  %2714 = vmatpush3.bf16.msra.mxu1 (!%p407_p3), %v3025_v0  ;;  %v3031_v6 = vld [vmem:[%s3518_s5 + $0x18] sm:$0xff] (!%p407_p3)   ;;  %v3033_v8 = vld [vmem:[%s3518_s5 + $0x20] sm:$0xff] (!%p407_p3)   ;;  %v3035_v10 = vld [vmem:[%s3518_s5 + $0x28] sm:$0xff] (!%p407_p3)  }
   0x9   : > { %2810 = vmatpush3.bf16.msra.mxu0 (!%p407_p3), %v3026_v1  ;;  %2715 = vmatprep.subr.bf16.mxu1 (!%p407_p3), %v3027_v2  ;;  %v3032_v7 = vld [vmem:[%s3519_s6 + $0x18] sm:$0xff] (!%p407_p3)   ;;  %v3034_v9 = vld [vmem:[%s3519_s6 + $0x20] sm:$0xff] (!%p407_p3)   ;;  %v3036_v11 = vld [vmem:[%s3519_s6 + $0x28] sm:$0xff] (!%p407_p3)  }
   0xa   : > { %2811 = vmatprep.subr.bf16.mxu0 (!%p407_p3), %v3028_v3  ;;  %v3037_v14 = vld [vmem:[%s3518_s5 + $0x30] sm:$0xff] (!%p407_p3)   ;;  %v3039_v16 = vld [vmem:[%s3518_s5 + $0x38] sm:$0xff] (!%p407_p3)   ;;  %v3044_v19 = vld [vmem:[%s3517_s4] sm:$0xff] (!%p407_p3)  }
   0xb   : > { %v3038_v15 = vld [vmem:[%s3519_s6 + $0x30] sm:$0xff] (!%p407_p3)   ;;  %v3040_v17 = vld [vmem:[%s3519_s6 + $0x38] sm:$0xff] (!%p407_p3)   ;;  %v3046_v20 = vld [vmem:[%s3520_s7] sm:$0xff] (!%p407_p3)  }
   0xc   : > { %2716 = vmatpush3.bf16.msra.mxu1 (!%p407_p3), %v3027_v2  ;;  %v3050_v24 = vld [vmem:[%s3517_s4 + $0x8] sm:$0xff] (!%p407_p3)   ;;  %v3056_v27 = vld [vmem:[%s3517_s4 + $0x10] sm:$0xff] (!%p407_p3)   ;;  %v3062_v32 = vld [vmem:[%s3517_s4 + $0x18] sm:$0xff] (!%p407_p3)  }
   0xd   : > { %2812 = vmatpush3.bf16.msra.mxu0 (!%p407_p3), %v3028_v3  ;;  %2717 = vmatprep.subr.bf16.mxu1 (!%p407_p3), %v3029_v4  ;;  %v3052_v25 = vld [vmem:[%s3520_s7 + $0x8] sm:$0xff] (!%p407_p3)   ;;  %v3058_v28 = vld [vmem:[%s3520_s7 + $0x10] sm:$0xff] (!%p407_p3)   ;;  %v3064_v33 = vld [vmem:[%s3520_s7 + $0x18] sm:$0xff] (!%p407_p3)  }
   0xe   : > { %s3529_s13 = smov (!%p495_p4, %s3135_s13), 1  ;;  %2813 = vmatprep.subr.bf16.mxu0 %v3030_v5  ;;  %v3068_v36 = vld [vmem:[%s3517_s4 + $0x20] sm:$0xff]   ;;  %v3074_v40 = vld [vmem:[%s3517_s4 + $0x28] sm:$0xff]   ;;  %v3080_v45 = vld [vmem:[%s3517_s4 + $0x30] sm:$0xff]  }
   0xf   : > { %s3245_s17 = sshll.u32 %s3529_s13, 7  ;;  %v3070_v37 = vld [vmem:[%s3520_s7 + $0x20] sm:$0xff]   ;;  %v3076_v41 = vld [vmem:[%s3520_s7 + $0x28] sm:$0xff]   ;;  %v3082_v47 = vld [vmem:[%s3520_s7 + $0x30] sm:$0xff]  }
  0x10   : > { %2718 = vmatpush3.bf16.msra.mxu1 %v3029_v4  ;;  %s3257_s24 = scalar_lea.vmem %s3514_s1, %s3245_s17  ;;  %s3266_s29 = scalar_lea.vmem %s3515_s2, %s3245_s17  ;;  %v3086_v50 = vld [vmem:[%s3517_s4 + $0x38] sm:$0xff]  }
  0x11   : > { %2814 = vmatpush3.bf16.msra.mxu0 %v3030_v5  ;;  %2719 = vmatprep.subr.bf16.mxu1 %v3031_v6  ;;  %v3041_v12 = vld [vmem:[%s3257_s24] sm:$0xff]   ;;  %v3043_v18 = vld [vmem:[%s3257_s24 + $0x8] sm:$0xff]   ;;  %v3047_v22 = vld [vmem:[%s3257_s24 + $0x10] sm:$0xff]   ;;  %s3356_s20 = scalar_lea.vmem %s3513_s0, %s3245_s17  ;;  %s3363_s23 = scalar_lea.vmem %s3516_s3, %s3245_s17 }
  0x12   : > { %2815 = vmatprep.subr.bf16.mxu0 %v3032_v7  ;;  %v3042_v13 = vld [vmem:[%s3266_s29] sm:$0xff]   ;;  %2729 = vmatprep.mubr.bf16.mxu1 %v3041_v12  ;;  %v3045_v21 = vld [vmem:[%s3266_s29 + $0x8] sm:$0xff]   ;;  %v3048_v23 = vld [vmem:[%s3266_s29 + $0x10] sm:$0xff]   ;;  %s3411_s25 = scalar_lea.vmem %s3522_s9, %s3245_s17  ;;  %s2537_s17 = sshll.u32 %s3529_s13, 8 }
  0x13   : > { %2825 = vmatprep.mubr.bf16.mxu0 %v3042_v13  ;;  %v3049_v26 = vld [vmem:[%s3257_s24 + $0x18] sm:$0xff]   ;;  %v3053_v30 = vld [vmem:[%s3257_s24 + $0x20] sm:$0xff]   ;;  %v3055_v34 = vld [vmem:[%s3257_s24 + $0x28] sm:$0xff]   ;;  %s3427_s11 = scalar_lea.vmem %s3523_s10, %s2537_s17 }
  0x14   : > { %2720 = vmatpush3.bf16.msra.mxu1 %v3031_v6  ;;  %v3051_v29 = vld [vmem:[%s3266_s29 + $0x18] sm:$0xff]   ;;  %v3054_v31 = vld [vmem:[%s3266_s29 + $0x20] sm:$0xff]   ;;  %v3057_v35 = vld [vmem:[%s3266_s29 + $0x28] sm:$0xff]  }
  0x15   : > { %2816 = vmatpush3.bf16.msra.mxu0 %v3032_v7  ;;  %2721 = vmatprep.subr.bf16.mxu1 %v3033_v8  ;;  %v3059_v38 = vld [vmem:[%s3257_s24 + $0x30] sm:$0xff]   ;;  %v3061_v42 = vld [vmem:[%s3257_s24 + $0x38] sm:$0xff]   ;;  %v3065_v44 = vld [vmem:[%s3257_s24 + $0x40] sm:$0xff]  }
  0x16   : > { %2817 = vmatprep.subr.bf16.mxu0 %v3034_v9  ;;  %v3060_v39 = vld [vmem:[%s3266_s29 + $0x30] sm:$0xff]   ;;  %v3063_v43 = vld [vmem:[%s3266_s29 + $0x38] sm:$0xff]   ;;  %v3066_v46 = vld [vmem:[%s3266_s29 + $0x40] sm:$0xff]  }
  0x17   : > { %v3067_v48 = vld [vmem:[%s3257_s24 + $0x48] sm:$0xff]   ;;  %v3071_v51 = vld [vmem:[%s3257_s24 + $0x50] sm:$0xff]   ;;  %v3088_v52 = vld [vmem:[%s3520_s7 + $0x38] sm:$0xff]  }
  0x18   : > { %2722 = vmatpush3.bf16.msra.mxu1 %v3033_v8  ;;  %v3069_v49 = vld [vmem:[%s3266_s29 + $0x48] sm:$0xff]   ;;  %v3072_v53 = vld [vmem:[%s3266_s29 + $0x50] sm:$0xff]   ;;  %v3073_v54 = vld [vmem:[%s3257_s24 + $0x58] sm:$0xff]  }
  0x19   : > { %2818 = vmatpush3.bf16.msra.mxu0 %v3034_v9  ;;  %2723 = vmatprep.subr.bf16.mxu1 %v3035_v10  ;;  %v3075_v55 = vld [vmem:[%s3266_s29 + $0x58] sm:$0xff]   ;;  %v3077_v56 = vld [vmem:[%s3257_s24 + $0x60] sm:$0xff]   ;;  %v3079_v58 = vld [vmem:[%s3257_s24 + $0x68] sm:$0xff]  }
  0x1a   : > { %2819 = vmatprep.subr.bf16.mxu0 %v3036_v11  ;;  %v3078_v57 = vld [vmem:[%s3266_s29 + $0x60] sm:$0xff]   ;;  %v3081_v59 = vld [vmem:[%s3266_s29 + $0x68] sm:$0xff]   ;;  %v3083_v60 = vld [vmem:[%s3257_s24 + $0x70] sm:$0xff]  }
  0x1b   : > { %v3084_v61 = vld [vmem:[%s3266_s29 + $0x70] sm:$0xff]   ;;  %v3085_v62 = vld [vmem:[%s3257_s24 + $0x78] sm:$0xff]   ;;  %v3089_v0 = vld [vmem:[%s3356_s20] sm:$0xff]  }
  0x1c   : > { %2724 = vmatpush3.bf16.msra.mxu1 %v3035_v10  ;;  %v3087_v63 = vld [vmem:[%s3266_s29 + $0x78] sm:$0xff]   ;;  %v3090_v1 = vld [vmem:[%s3363_s23] sm:$0xff]   ;;  %v3091_v2 = vld [vmem:[%s3356_s20 + $0x8] sm:$0xff]  }
  0x1d   : > { %2820 = vmatpush3.bf16.msra.mxu0 %v3036_v11  ;;  %2725 = vmatprep.subr.bf16.mxu1 %v3037_v14  ;;  %v3092_v3 = vld [vmem:[%s3363_s23 + $0x8] sm:$0xff]   ;;  %v3093_v4 = vld [vmem:[%s3356_s20 + $0x10] sm:$0xff]   ;;  %v3095_v6 = vld [vmem:[%s3356_s20 + $0x18] sm:$0xff]  }
  0x1e   : > { %2821 = vmatprep.subr.bf16.mxu0 %v3038_v15  ;;  %v3094_v5 = vld [vmem:[%s3363_s23 + $0x10] sm:$0xff]   ;;  %v3096_v7 = vld [vmem:[%s3363_s23 + $0x18] sm:$0xff]   ;;  %v3097_v8 = vld [vmem:[%s3356_s20 + $0x20] sm:$0xff]  }
  0x1f   : > { %v3098_v9 = vld [vmem:[%s3363_s23 + $0x20] sm:$0xff]   ;;  %v3099_v10 = vld [vmem:[%s3356_s20 + $0x28] sm:$0xff]   ;;  %v3101_v12 = vld [vmem:[%s3356_s20 + $0x30] sm:$0xff]  }
  0x20   : > { %2726 = vmatpush3.bf16.msra.mxu1 %v3037_v14  ;;  %v3100_v11 = vld [vmem:[%s3363_s23 + $0x28] sm:$0xff]   ;;  %v3102_v13 = vld [vmem:[%s3363_s23 + $0x30] sm:$0xff]   ;;  %v3103_v14 = vld [vmem:[%s3356_s20 + $0x38] sm:$0xff]  }
  0x21   : > { %2822 = vmatpush3.bf16.msra.mxu0 %v3038_v15  ;;  %2727 = vmatprep.subr.bf16.mxu1 %v3039_v16  ;;  %v3104_v15 = vld [vmem:[%s3363_s23 + $0x38] sm:$0xff]  }
  0x22   : > { %2823 = vmatprep.subr.bf16.mxu0 %v3040_v17 }
  0x24   : > { %2728 = vmatpush3.bf16.msra.mxu1 %v3039_v16  ;;  %v3105_v16 = vld [vmem:[%s3356_s20 + $0x40] sm:$0xff]  }
  0x25   : > { %2824 = vmatpush3.bf16.msra.mxu0 %v3040_v17  ;;  %2761 = vmatprep.subr.bf16.mxu1 %v3044_v19  ;;  %v3106_v17 = vld [vmem:[%s3363_s23 + $0x40] sm:$0xff]  }
  0x26   : > { %2857 = vmatprep.subr.bf16.mxu0 %v3046_v20 }
  0x27   : > { %2730 = vmatmul.mubr.bf16.vlgmr.msra.gmra.mrb[0].mxu1 %v3043_v18  ;;  %v3107_v18 = vld [vmem:[%s3356_s20 + $0x48] sm:$0xff]  }
  0x28   : > { %2826 = vmatmul.mubr.bf16.vlgmr.msra.gmra.mrb[0].mxu0 %v3045_v21  ;;  %2762 = vmatpush3.bf16.msra.mxu1 %v3044_v19  ;;  %v3108_v19 = vld [vmem:[%s3363_s23 + $0x48] sm:$0xff]   ;;  %v3110_v21 = vld [vmem:[%s3363_s23 + $0x50] sm:$0xff]  }
  0x29   : > { %2858 = vmatpush3.bf16.msra.mxu0 %v3046_v20  ;;  %2733 = vmatprep.mubr.bf16.mxu1 %v3047_v22  ;;  %v3109_v20 = vld [vmem:[%s3356_s20 + $0x50] sm:$0xff]   ;;  %v3111_v22 = vld [vmem:[%s3356_s20 + $0x58] sm:$0xff]  }
  0x2a   : > { %2829 = vmatprep.mubr.bf16.mxu0 %v3048_v23  ;;  %2763 = vmatprep.subr.bf16.mxu1 %v3050_v24  ;;  %v3112_v23 = vld [vmem:[%s3363_s23 + $0x58] sm:$0xff]  }
  0x2b   : > { %2859 = vmatprep.subr.bf16.mxu0 %v3052_v25 }
  0x2c   : > { %2764 = vmatpush3.bf16.msra.mxu1 %v3050_v24  ;;  %v3113_v24 = vld [vmem:[%s3356_s20 + $0x60] sm:$0xff]  }
  0x2d   : > { %2860 = vmatpush3.bf16.msra.mxu0 %v3052_v25  ;;  %2765 = vmatprep.subr.bf16.mxu1 %v3056_v27  ;;  %v3114_v25 = vld [vmem:[%s3363_s23 + $0x60] sm:$0xff]  }
  0x2e   : > { %2861 = vmatprep.subr.bf16.mxu0 %v3058_v28 }
  0x2f   : > { %2734 = vmatmul.mubr.bf16.gmra.mrb[4].mxu1 %v3049_v26  ;;  %v3115_v26 = vld [vmem:[%s3356_s20 + $0x68] sm:$0xff]  }
  0x30   : > { %2830 = vmatmul.mubr.bf16.gmra.mrb[4].mxu0 %v3051_v29  ;;  %2737 = vmatprep.mubr.bf16.mxu1 %v3053_v30  ;;  %v3118_v29 = vld [vmem:[%s3363_s23 + $0x70] sm:$0xff]   ;;  %v3119_v30 = vld [vmem:[%s3356_s20 + $0x78] sm:$0xff]  }
  0x31   : > { %2833 = vmatprep.mubr.bf16.mxu0 %v3054_v31  ;;  %2766 = vmatpush3.bf16.msra.mxu1 %v3056_v27  ;;  %v3116_v27 = vld [vmem:[%s3363_s23 + $0x68] sm:$0xff]   ;;  %v3120_v31 = vld [vmem:[%s3363_s23 + $0x78] sm:$0xff]  }
  0x32   : > { %2862 = vmatpush3.bf16.msra.mxu0 %v3058_v28  ;;  %2767 = vmatprep.subr.bf16.mxu1 %v3062_v32  ;;  %v3117_v28 = vld [vmem:[%s3356_s20 + $0x70] sm:$0xff]  }
  0x33   : > { %2863 = vmatprep.subr.bf16.mxu0 %v3064_v33 }
  0x35   : > { %2768 = vmatpush3.bf16.msra.mxu1 %v3062_v32 }
  0x36   : > { %2864 = vmatpush3.bf16.msra.mxu0 %v3064_v33  ;;  %2769 = vmatprep.subr.bf16.mxu1 %v3068_v36 }
  0x37   : > { %2738 = vmatmul.mubr.bf16.gmra.mrb[8].mxu1 %v3055_v34  ;;  %2865 = vmatprep.subr.bf16.mxu0 %v3070_v37  ;;  %v3416_v34 = vld [vmem:[%s3521_s8] ss:$0 sm:$0xff] }
  0x38   : > { %2834 = vmatmul.mubr.bf16.gmra.mrb[8].mxu0 %v3057_v35  ;;  %2741 = vmatprep.mubr.bf16.mxu1 %v3059_v38  ;;  %v2602_v35 = vld [vmem:[%s3411_s25 + $0x8] sm:$0xff]  }
  0x39   : > { %2837 = vmatprep.mubr.bf16.mxu0 %v3060_v39  ;;  %2770 = vmatpush3.bf16.msra.mxu1 %v3068_v36  ;;  %v2539_v39 = vld [vmem:[%s3411_s25] sm:$0xff]  }
  0x3a   : > { %2866 = vmatpush3.bf16.msra.mxu0 %v3070_v37  ;;  %2771 = vmatprep.subr.bf16.mxu1 %v3074_v40 }
  0x3b   : > { %2867 = vmatprep.subr.bf16.mxu0 %v3076_v41 }
  0x3d   : > { %2772 = vmatpush3.bf16.msra.mxu1 %v3074_v40 }
  0x3e   : > { %2868 = vmatpush3.bf16.msra.mxu0 %v3076_v41  ;;  %2773 = vmatprep.subr.bf16.mxu1 %v3080_v45 }
  0x3f   : > { %2742 = vmatmul.mubr.bf16.gmra.mrb[12].mxu1 %v3061_v42  ;;  %2869 = vmatprep.subr.bf16.mxu0 %v3082_v47 }
  0x40   : > { %2838 = vmatmul.mubr.bf16.gmra.mrb[12].mxu0 %v3063_v43  ;;  %2745 = vmatprep.mubr.bf16.mxu1 %v3065_v44 }
  0x41   : > { %2841 = vmatprep.mubr.bf16.mxu0 %v3066_v46  ;;  %2774 = vmatpush3.bf16.msra.mxu1 %v3080_v45  ;;  %v2544_v45 = vunpack.c.l.bf16 %v2602_v35 }
  0x42   : > { %2870 = vmatpush3.bf16.msra.mxu0 %v3082_v47  ;;  %2775 = vmatprep.subr.bf16.mxu1 %v3086_v50 }
  0x43   : > { %2871 = vmatprep.subr.bf16.mxu0 %v3088_v52 }
  0x45   : > { %2776 = vmatpush3.bf16.msra.mxu1 %v3086_v50 }
  0x46   : > { %2872 = vmatpush3.bf16.msra.mxu0 %v3088_v52 }
  0x47   : > { %2746 = vmatmul.mubr.bf16.gmra.mrb[16].mxu1 %v3067_v48 }
  0x48   : > { %2842 = vmatmul.mubr.bf16.gmra.mrb[16].mxu0 %v3069_v49  ;;  %2749 = vmatprep.mubr.bf16.mxu1 %v3071_v51  ;;  %v2540_v49 = vunpack.c.l.bf16 %v2539_v39 }
  0x49   : > { %2845 = vmatprep.mubr.bf16.mxu0 %v3072_v53  ;;  %v2545_v53 = vunpack.c.h.bf16 %v2602_v35  ;;  %v2605_v35 = vld [vmem:[%s3411_s25 + $0x20] sm:$0xff]  }
  0x4f   : > { %2750 = vmatmul.mubr.bf16.gmra.mrb[20].mxu1 %v3073_v54 }
  0x50   : > { %2846 = vmatmul.mubr.bf16.gmra.mrb[20].mxu0 %v3075_v55  ;;  %2753 = vmatprep.mubr.bf16.mxu1 %v3077_v56  ;;  %v2541_v56 = vunpack.c.h.bf16 %v2539_v39 }
  0x51   : > { %2849 = vmatprep.mubr.bf16.mxu0 %v3078_v57 }
  0x57   : > { %2754 = vmatmul.mubr.bf16.gmra.mrb[24].mxu1 %v3079_v58 }
  0x58   : > { %2850 = vmatmul.mubr.bf16.gmra.mrb[24].mxu0 %v3081_v59  ;;  %2757 = vmatprep.mubr.bf16.mxu1 %v3083_v60 }
  0x59   : > { %2853 = vmatprep.mubr.bf16.mxu0 %v3084_v61 }
  0x5f   : > { %2758 = vmatmul.mubr.bf16.gmra.mrb[28].mxu1 %v3085_v62 }
  0x60   : > { %2854 = vmatmul.mubr.bf16.gmra.mrb[28].mxu0 %v3087_v63  ;;  %2777 = vmatprep.mubr.bf16.mxu1 %v3089_v0  ;;  %v2604_v63 = vld [vmem:[%s3411_s25 + $0x18] sm:$0xff]  }
  0x61   : > { %2873 = vmatprep.mubr.bf16.mxu0 %v3090_v1 }
  0x67   : > { %2778 = vmatmul.mubr.bf16.vlgmr.msra.gmra.mrb[0].mxu1 %v3091_v2 }
  0x68   : > { %2874 = vmatmul.mubr.bf16.vlgmr.msra.gmra.mrb[0].mxu0 %v3092_v3  ;;  %2781 = vmatprep.mubr.bf16.mxu1 %v3093_v4  ;;  %v2603_v4 = vld [vmem:[%s3411_s25 + $0x10] sm:$0xff]  }
  0x69   : > { %2877 = vmatprep.mubr.bf16.mxu0 %v3094_v5 }
  0x6f   : > { %2782 = vmatmul.mubr.bf16.gmra.mrb[4].mxu1 %v3095_v6 }
  0x70   : > { %2878 = vmatmul.mubr.bf16.gmra.mrb[4].mxu0 %v3096_v7  ;;  %2785 = vmatprep.mubr.bf16.mxu1 %v3097_v8 }
  0x71   : > { %2881 = vmatprep.mubr.bf16.mxu0 %v3098_v9 }
  0x77   : > { %2786 = vmatmul.mubr.bf16.gmra.mrb[8].mxu1 %v3099_v10 }
  0x78   : > { %2882 = vmatmul.mubr.bf16.gmra.mrb[8].mxu0 %v3100_v11  ;;  %2789 = vmatprep.mubr.bf16.mxu1 %v3101_v12  ;;  %v2552_v11 = vunpack.c.l.bf16 %v2604_v63 }
  0x79   : > { %2885 = vmatprep.mubr.bf16.mxu0 %v3102_v13 }
  0x7f   : > { %2790 = vmatmul.mubr.bf16.gmra.mrb[12].mxu1 %v3103_v14 }
  0x80   : > { %2886 = vmatmul.mubr.bf16.gmra.mrb[12].mxu0 %v3104_v15  ;;  %2793 = vmatprep.mubr.bf16.mxu1 %v3105_v16  ;;  %v2548_v15 = vunpack.c.l.bf16 %v2603_v4 }
  0x81   : > { %2889 = vmatprep.mubr.bf16.mxu0 %v3106_v17 }
  0x87   : > { %2794 = vmatmul.mubr.bf16.gmra.mrb[16].mxu1 %v3107_v18 }
  0x88   : > { %2890 = vmatmul.mubr.bf16.gmra.mrb[16].mxu0 %v3108_v19  ;;  %2797 = vmatprep.mubr.bf16.mxu1 %v3109_v20  ;;  %v2553_v19 = vunpack.c.h.bf16 %v2604_v63 }
  0x89   : > { %2893 = vmatprep.mubr.bf16.mxu0 %v3110_v21 }
  0x8f   : > { %2798 = vmatmul.mubr.bf16.gmra.mrb[20].mxu1 %v3111_v22  ;;  %v2549_v22 = vunpack.c.h.bf16 %v2603_v4 }
  0x90   : > { %2894 = vmatmul.mubr.bf16.gmra.mrb[20].mxu0 %v3112_v23  ;;  %2801 = vmatprep.mubr.bf16.mxu1 %v3113_v24 }
  0x91   : > { %2897 = vmatprep.mubr.bf16.mxu0 %v3114_v25 }
  0x97   : > { %2802 = vmatmul.mubr.bf16.gmra.mrb[24].mxu1 %v3115_v26 }
  0x98   : > { %2898 = vmatmul.mubr.bf16.gmra.mrb[24].mxu0 %v3116_v27  ;;  %2805 = vmatprep.mubr.bf16.mxu1 %v3117_v28 }
  0x99   : > { %2901 = vmatprep.mubr.bf16.mxu0 %v3118_v29  ;;  %v2606_v29 = vld [vmem:[%s3411_s25 + $0x28] sm:$0xff]  }
  0x9f   : > { %2806 = vmatmul.mubr.bf16.gmra.mrb[28].mxu1 %v3119_v30 }
  0xa0   : > { %2902 = vmatmul.mubr.bf16.gmra.mrb[28].mxu0 %v3120_v31 }
 0x13a   : > { %v2779_v32 = vpop.f32.mrb[0].mxu1 }
 0x13b   : > { %v2875_v33 = vpop.f32.mrb[0].mxu0  ;;  %v1140_v36 = vpop.f32.mrb[1].mxu1 }
 0x13c   : > { %v2905_v37 = vadd.f32 %v2875_v33, %v2779_v32  ;;  %v1878_v38 = vpop.f32.mrb[1].mxu0  ;;  %v2780_v40 = vpop.f32.mrb[2].mxu1 }
 0x13d   : > { %v2906_v41 = vadd.f32 %v1878_v38, %v1140_v36  ;;  %v2876_v42 = vpop.f32.mrb[2].mxu0  ;;  %v1143_v43 = vpop.f32.mrb[3].mxu1 }
 0x13e   : > { %v2046_v44 = vadd.f32 %v2905_v37, %v3416_v34  ;;  %v2907_v46 = vadd.f32 %v2876_v42, %v2780_v40  ;;  %v1881_v47 = vpop.f32.mrb[3].mxu0  ;;  %v2560_v42 = vunpack.c.l.bf16 %v2606_v29 }
 0x13f   : > { %v2044_v48 = vadd.f32 %v2906_v41, %v3416_v34  ;;  %v2908_v50 = vadd.f32 %v1881_v47, %v1143_v43 }
 0x140   : > { %v2078_v51 = vmax.f32 %v2046_v44, 0.0  ;;  %v2047_v52 = vadd.f32 %v2907_v46, %v3416_v34  ;;  %v2556_v46 = vunpack.c.l.bf16 %v2605_v35 }
 0x141   : > { %v2076_v54 = vmax.f32 %v2044_v48, 0.0  ;;  %v2045_v55 = vadd.f32 %v2908_v50, %v3416_v34  ;;  %v2561_v50 = vunpack.c.h.bf16 %v2606_v29 }
 0x142   : > { %v2174_v57 = vadd.f32 %v2544_v45, %v2078_v51  ;;  %v2079_v58 = vmax.f32 %v2047_v52, 0.0  ;;  %v2783_v59 = vpop.f32.mrb[4].mxu1 }
 0x143   : > { %v2172_v60 = vadd.f32 %v2540_v49, %v2076_v54  ;;  %v2077_v61 = vmax.f32 %v2045_v55, 0.0  ;;  %v2879_v62 = vpop.f32.mrb[4].mxu0  ;;  %v1156_v0 = vpop.f32.mrb[5].mxu1 }
 0x144   : > { %2206 = vst [vmem:[%s3427_s11 + $0x10] sm:$0xff] %v2174_v57  ;;  %v2175_v1 = vadd.f32 %v2545_v53, %v2079_v58  ;;  %v2909_v2 = vadd.f32 %v2879_v62, %v2783_v59  ;;  %v1894_v3 = vpop.f32.mrb[5].mxu0  ;;  %v2784_v5 = vpop.f32.mrb[6].mxu1  ;;  %v2557_v53 = vunpack.c.h.bf16 %v2605_v35 }
 0x145   : > { %2204 = vst [vmem:[%s3427_s11] sm:$0xff] %v2172_v60  ;;  %v2173_v6 = vadd.f32 %v2541_v56, %v2077_v61  ;;  %v2910_v7 = vadd.f32 %v1894_v3, %v1156_v0  ;;  %v2880_v8 = vpop.f32.mrb[6].mxu0  ;;  %v1159_v9 = vpop.f32.mrb[7].mxu1  ;;  %v2608_v60 = vld [vmem:[%s3411_s25 + $0x38] sm:$0xff]  }
 0x146   : > { %2207 = vst [vmem:[%s3427_s11 + $0x18] sm:$0xff] %v2175_v1  ;;  %v2050_v10 = vadd.f32 %v2909_v2, %v3416_v34  ;;  %v2911_v12 = vadd.f32 %v2880_v8, %v2784_v5  ;;  %v1897_v13 = vpop.f32.mrb[7].mxu0  ;;  %v2607_v1 = vld [vmem:[%s3411_s25 + $0x30] sm:$0xff]   ;;  %v2568_v8 = vunpack.c.l.bf16 %v2608_v60 }
 0x147   : > { %2205 = vst [vmem:[%s3427_s11 + $0x8] sm:$0xff] %v2173_v6  ;;  %v2048_v14 = vadd.f32 %v2910_v7, %v3416_v34  ;;  %v2912_v16 = vadd.f32 %v1897_v13, %v1159_v9 }
 0x148   : > { %v2082_v17 = vmax.f32 %v2050_v10, 0.0  ;;  %v2051_v18 = vadd.f32 %v2911_v12, %v3416_v34  ;;  %v2564_v12 = vunpack.c.l.bf16 %v2607_v1 }
 0x149   : > { %v2080_v20 = vmax.f32 %v2048_v14, 0.0  ;;  %v2049_v21 = vadd.f32 %v2912_v16, %v3416_v34  ;;  %v2569_v16 = vunpack.c.h.bf16 %v2608_v60 }
 0x14a   : > { %v2178_v23 = vadd.f32 %v2552_v11, %v2082_v17  ;;  %v2083_v24 = vmax.f32 %v2051_v18, 0.0  ;;  %v2787_v25 = vpop.f32.mrb[8].mxu1 }
 0x14b   : > { %v2176_v26 = vadd.f32 %v2548_v15, %v2080_v20  ;;  %v2081_v27 = vmax.f32 %v2049_v21, 0.0  ;;  %v2883_v28 = vpop.f32.mrb[8].mxu0  ;;  %v1172_v30 = vpop.f32.mrb[9].mxu1 }
 0x14c   : > { %2210 = vst [vmem:[%s3427_s11 + $0x30] sm:$0xff] %v2178_v23  ;;  %v2179_v31 = vadd.f32 %v2553_v19, %v2083_v24  ;;  %v2913_v32 = vadd.f32 %v2883_v28, %v2787_v25  ;;  %v1910_v33 = vpop.f32.mrb[9].mxu0  ;;  %v2788_v36 = vpop.f32.mrb[10].mxu1  ;;  %v2565_v19 = vunpack.c.h.bf16 %v2607_v1 }
 0x14d   : > { %2208 = vst [vmem:[%s3427_s11 + $0x20] sm:$0xff] %v2176_v26  ;;  %v2177_v37 = vadd.f32 %v2549_v22, %v2081_v27  ;;  %v2914_v38 = vadd.f32 %v1910_v33, %v1172_v30  ;;  %v2884_v39 = vpop.f32.mrb[10].mxu0  ;;  %v1175_v40 = vpop.f32.mrb[11].mxu1  ;;  %v2610_v26 = vld [vmem:[%s3411_s25 + $0x48] sm:$0xff]  }
 0x14e   : > { %2211 = vst [vmem:[%s3427_s11 + $0x38] sm:$0xff] %v2179_v31  ;;  %v2054_v41 = vadd.f32 %v2913_v32, %v3416_v34  ;;  %v2915_v43 = vadd.f32 %v2884_v39, %v2788_v36  ;;  %v1913_v44 = vpop.f32.mrb[11].mxu0  ;;  %v2609_v31 = vld [vmem:[%s3411_s25 + $0x40] sm:$0xff]   ;;  %v2576_v39 = vunpack.c.l.bf16 %v2610_v26 }
 0x14f   : > { %2209 = vst [vmem:[%s3427_s11 + $0x28] sm:$0xff] %v2177_v37  ;;  %v2052_v45 = vadd.f32 %v2914_v38, %v3416_v34  ;;  %v2916_v47 = vadd.f32 %v1913_v44, %v1175_v40 }
 0x150   : > { %v2086_v48 = vmax.f32 %v2054_v41, 0.0  ;;  %v2055_v49 = vadd.f32 %v2915_v43, %v3416_v34  ;;  %v2572_v43 = vunpack.c.l.bf16 %v2609_v31 }
 0x151   : > { %v2084_v51 = vmax.f32 %v2052_v45, 0.0  ;;  %v2053_v52 = vadd.f32 %v2916_v47, %v3416_v34  ;;  %v2577_v47 = vunpack.c.h.bf16 %v2610_v26 }
 0x152   : > { %v2182_v54 = vadd.f32 %v2560_v42, %v2086_v48  ;;  %v2087_v55 = vmax.f32 %v2055_v49, 0.0  ;;  %v2791_v56 = vpop.f32.mrb[12].mxu1 }
 0x153   : > { %v2180_v57 = vadd.f32 %v2556_v46, %v2084_v51  ;;  %v2085_v58 = vmax.f32 %v2053_v52, 0.0  ;;  %v2887_v59 = vpop.f32.mrb[12].mxu0  ;;  %v1188_v61 = vpop.f32.mrb[13].mxu1 }
 0x154   : > { %2214 = vst [vmem:[%s3427_s11 + $0x50] sm:$0xff] %v2182_v54  ;;  %v2183_v62 = vadd.f32 %v2561_v50, %v2087_v55  ;;  %v2917_v63 = vadd.f32 %v2887_v59, %v2791_v56  ;;  %v1926_v0 = vpop.f32.mrb[13].mxu0  ;;  %v2792_v2 = vpop.f32.mrb[14].mxu1  ;;  %v2573_v50 = vunpack.c.h.bf16 %v2609_v31 }
 0x155   : > { %2212 = vst [vmem:[%s3427_s11 + $0x40] sm:$0xff] %v2180_v57  ;;  %v2181_v3 = vadd.f32 %v2557_v53, %v2085_v58  ;;  %v2918_v4 = vadd.f32 %v1926_v0, %v1188_v61  ;;  %v2888_v5 = vpop.f32.mrb[14].mxu0  ;;  %v1191_v6 = vpop.f32.mrb[15].mxu1  ;;  %v2612_v57 = vld [vmem:[%s3411_s25 + $0x58] sm:$0xff]  }
 0x156   : > { %2215 = vst [vmem:[%s3427_s11 + $0x58] sm:$0xff] %v2183_v62  ;;  %v2058_v7 = vadd.f32 %v2917_v63, %v3416_v34  ;;  %v2919_v9 = vadd.f32 %v2888_v5, %v2792_v2  ;;  %v1929_v10 = vpop.f32.mrb[15].mxu0  ;;  %v2611_v62 = vld [vmem:[%s3411_s25 + $0x50] sm:$0xff]   ;;  %v2584_v5 = vunpack.c.l.bf16 %v2612_v57 }
 0x157   : > { %2213 = vst [vmem:[%s3427_s11 + $0x48] sm:$0xff] %v2181_v3  ;;  %v2056_v11 = vadd.f32 %v2918_v4, %v3416_v34  ;;  %v2920_v13 = vadd.f32 %v1929_v10, %v1191_v6 }
 0x158   : > { %v2090_v14 = vmax.f32 %v2058_v7, 0.0  ;;  %v2059_v15 = vadd.f32 %v2919_v9, %v3416_v34  ;;  %v2580_v9 = vunpack.c.l.bf16 %v2611_v62 }
 0x159   : > { %v2088_v17 = vmax.f32 %v2056_v11, 0.0  ;;  %v2057_v18 = vadd.f32 %v2920_v13, %v3416_v34  ;;  %v2585_v13 = vunpack.c.h.bf16 %v2612_v57 }
 0x15a   : > { %v2186_v20 = vadd.f32 %v2568_v8, %v2090_v14  ;;  %v2091_v21 = vmax.f32 %v2059_v15, 0.0  ;;  %v2795_v22 = vpop.f32.mrb[16].mxu1 }
 0x15b   : > { %v2184_v23 = vadd.f32 %v2564_v12, %v2088_v17  ;;  %v2089_v24 = vmax.f32 %v2057_v18, 0.0  ;;  %v2891_v25 = vpop.f32.mrb[16].mxu0  ;;  %v1204_v27 = vpop.f32.mrb[17].mxu1 }
 0x15c   : > { %2218 = vst [vmem:[%s3427_s11 + $0x70] sm:$0xff] %v2186_v20  ;;  %v2187_v28 = vadd.f32 %v2569_v16, %v2091_v21  ;;  %v2921_v29 = vadd.f32 %v2891_v25, %v2795_v22  ;;  %v1942_v30 = vpop.f32.mrb[17].mxu0  ;;  %v2796_v32 = vpop.f32.mrb[18].mxu1  ;;  %v2581_v16 = vunpack.c.h.bf16 %v2611_v62 }
 0x15d   : > { %2216 = vst [vmem:[%s3427_s11 + $0x60] sm:$0xff] %v2184_v23  ;;  %v2185_v33 = vadd.f32 %v2565_v19, %v2089_v24  ;;  %v2922_v35 = vadd.f32 %v1942_v30, %v1204_v27  ;;  %v2892_v36 = vpop.f32.mrb[18].mxu0  ;;  %v1207_v37 = vpop.f32.mrb[19].mxu1  ;;  %v2614_v23 = vld [vmem:[%s3411_s25 + $0x68] sm:$0xff]  }
 0x15e   : > { %2219 = vst [vmem:[%s3427_s11 + $0x78] sm:$0xff] %v2187_v28  ;;  %v2062_v38 = vadd.f32 %v2921_v29, %v3416_v34  ;;  %v2923_v40 = vadd.f32 %v2892_v36, %v2796_v32  ;;  %v1945_v41 = vpop.f32.mrb[19].mxu0  ;;  %v2613_v28 = vld [vmem:[%s3411_s25 + $0x60] sm:$0xff]   ;;  %v2592_v36 = vunpack.c.l.bf16 %v2614_v23 }
 0x15f   : > { %2217 = vst [vmem:[%s3427_s11 + $0x68] sm:$0xff] %v2185_v33  ;;  %v2060_v42 = vadd.f32 %v2922_v35, %v3416_v34  ;;  %v2924_v44 = vadd.f32 %v1945_v41, %v1207_v37 }
 0x160   : > { %v2094_v45 = vmax.f32 %v2062_v38, 0.0  ;;  %v2063_v46 = vadd.f32 %v2923_v40, %v3416_v34  ;;  %v2588_v40 = vunpack.c.l.bf16 %v2613_v28 }
 0x161   : > { %v2092_v48 = vmax.f32 %v2060_v42, 0.0  ;;  %v2061_v49 = vadd.f32 %v2924_v44, %v3416_v34  ;;  %v2593_v44 = vunpack.c.h.bf16 %v2614_v23 }
 0x162   : > { %v2190_v51 = vadd.f32 %v2576_v39, %v2094_v45  ;;  %v2095_v52 = vmax.f32 %v2063_v46, 0.0  ;;  %v2799_v53 = vpop.f32.mrb[20].mxu1 }
 0x163   : > { %v2188_v54 = vadd.f32 %v2572_v43, %v2092_v48  ;;  %v2093_v55 = vmax.f32 %v2061_v49, 0.0  ;;  %v2895_v56 = vpop.f32.mrb[20].mxu0  ;;  %v1220_v58 = vpop.f32.mrb[21].mxu1 }
 0x164   : > { %2222 = vst [vmem:[%s3427_s11 + $0x90] sm:$0xff] %v2190_v51  ;;  %v2191_v59 = vadd.f32 %v2577_v47, %v2095_v52  ;;  %v2925_v60 = vadd.f32 %v2895_v56, %v2799_v53  ;;  %v1958_v61 = vpop.f32.mrb[21].mxu0  ;;  %v2800_v63 = vpop.f32.mrb[22].mxu1  ;;  %v2589_v47 = vunpack.c.h.bf16 %v2613_v28 }
 0x165   : > { %2220 = vst [vmem:[%s3427_s11 + $0x80] sm:$0xff] %v2188_v54  ;;  %v2189_v0 = vadd.f32 %v2573_v50, %v2093_v55  ;;  %v2926_v1 = vadd.f32 %v1958_v61, %v1220_v58  ;;  %v2896_v2 = vpop.f32.mrb[22].mxu0  ;;  %v1223_v3 = vpop.f32.mrb[23].mxu1  ;;  %v2616_v54 = vld [vmem:[%s3411_s25 + $0x78] sm:$0xff]  }
 0x166   : > { %2223 = vst [vmem:[%s3427_s11 + $0x98] sm:$0xff] %v2191_v59  ;;  %v2066_v4 = vadd.f32 %v2925_v60, %v3416_v34  ;;  %v2927_v6 = vadd.f32 %v2896_v2, %v2800_v63  ;;  %v1961_v7 = vpop.f32.mrb[23].mxu0  ;;  %v2615_v59 = vld [vmem:[%s3411_s25 + $0x70] sm:$0xff]   ;;  %v2600_v2 = vunpack.c.l.bf16 %v2616_v54 }
 0x167   : > { %2221 = vst [vmem:[%s3427_s11 + $0x88] sm:$0xff] %v2189_v0  ;;  %v2064_v8 = vadd.f32 %v2926_v1, %v3416_v34  ;;  %v2928_v10 = vadd.f32 %v1961_v7, %v1223_v3 }
 0x168   : > { %v2098_v11 = vmax.f32 %v2066_v4, 0.0  ;;  %v2067_v12 = vadd.f32 %v2927_v6, %v3416_v34  ;;  %v2596_v6 = vunpack.c.l.bf16 %v2615_v59 }
 0x169   : > { %v2096_v14 = vmax.f32 %v2064_v8, 0.0  ;;  %v2065_v15 = vadd.f32 %v2928_v10, %v3416_v34  ;;  %v2601_v10 = vunpack.c.h.bf16 %v2616_v54 }
 0x16a   : > { %v2194_v17 = vadd.f32 %v2584_v5, %v2098_v11  ;;  %v2099_v18 = vmax.f32 %v2067_v12, 0.0  ;;  %v2803_v19 = vpop.f32.mrb[24].mxu1 }
 0x16b   : > { %v2192_v20 = vadd.f32 %v2580_v9, %v2096_v14  ;;  %v2097_v21 = vmax.f32 %v2065_v15, 0.0  ;;  %v2899_v22 = vpop.f32.mrb[24].mxu0  ;;  %v1236_v24 = vpop.f32.mrb[25].mxu1 }
 0x16c   : > { %2226 = vst [vmem:[%s3427_s11 + $0xb0] sm:$0xff] %v2194_v17  ;;  %v2195_v25 = vadd.f32 %v2585_v13, %v2099_v18  ;;  %v2929_v26 = vadd.f32 %v2899_v22, %v2803_v19  ;;  %v1974_v27 = vpop.f32.mrb[25].mxu0  ;;  %v2804_v29 = vpop.f32.mrb[26].mxu1  ;;  %v2597_v13 = vunpack.c.h.bf16 %v2615_v59 }
 0x16d   : > { %2224 = vst [vmem:[%s3427_s11 + $0xa0] sm:$0xff] %v2192_v20  ;;  %v2193_v30 = vadd.f32 %v2581_v16, %v2097_v21  ;;  %v2930_v31 = vadd.f32 %v1974_v27, %v1236_v24  ;;  %v2900_v32 = vpop.f32.mrb[26].mxu0  ;;  %v1239_v33 = vpop.f32.mrb[27].mxu1 }
 0x16e   : > { %2227 = vst [vmem:[%s3427_s11 + $0xb8] sm:$0xff] %v2195_v25  ;;  %v2070_v35 = vadd.f32 %v2929_v26, %v3416_v34  ;;  %v2931_v37 = vadd.f32 %v2900_v32, %v2804_v29  ;;  %v1977_v38 = vpop.f32.mrb[27].mxu0 }
 0x16f   : > { %2225 = vst [vmem:[%s3427_s11 + $0xa8] sm:$0xff] %v2193_v30  ;;  %v2068_v39 = vadd.f32 %v2930_v31, %v3416_v34  ;;  %v2932_v41 = vadd.f32 %v1977_v38, %v1239_v33 }
 0x170   : > { %v2102_v42 = vmax.f32 %v2070_v35, 0.0  ;;  %v2071_v43 = vadd.f32 %v2931_v37, %v3416_v34 }
 0x171   : > { %v2100_v45 = vmax.f32 %v2068_v39, 0.0  ;;  %v2069_v46 = vadd.f32 %v2932_v41, %v3416_v34 }
 0x172   : > { %v2198_v48 = vadd.f32 %v2592_v36, %v2102_v42  ;;  %v2103_v49 = vmax.f32 %v2071_v43, 0.0  ;;  %v2807_v50 = vpop.f32.mrb[28].mxu1 }
 0x173   : > { %v2196_v51 = vadd.f32 %v2588_v40, %v2100_v45  ;;  %v2101_v52 = vmax.f32 %v2069_v46, 0.0  ;;  %v2903_v53 = vpop.f32.mrb[28].mxu0  ;;  %v1252_v55 = vpop.f32.mrb[29].mxu1 }
 0x174   : > { %2230 = vst [vmem:[%s3427_s11 + $0xd0] sm:$0xff] %v2198_v48  ;;  %v2199_v56 = vadd.f32 %v2593_v44, %v2103_v49  ;;  %v2933_v57 = vadd.f32 %v2903_v53, %v2807_v50  ;;  %v1990_v58 = vpop.f32.mrb[29].mxu0  ;;  %v2808_v60 = vpop.f32.mrb[30].mxu1 }
 0x175   : > { %2228 = vst [vmem:[%s3427_s11 + $0xc0] sm:$0xff] %v2196_v51  ;;  %v2197_v61 = vadd.f32 %v2589_v47, %v2101_v52  ;;  %v2934_v62 = vadd.f32 %v1990_v58, %v1252_v55  ;;  %v2904_v63 = vpop.f32.mrb[30].mxu0  ;;  %v1255_v0 = vpop.f32.mrb[31].mxu1 }
 0x176   : > { %2231 = vst [vmem:[%s3427_s11 + $0xd8] sm:$0xff] %v2199_v56  ;;  %v2074_v1 = vadd.f32 %v2933_v57, %v3416_v34  ;;  %v2935_v3 = vadd.f32 %v2904_v63, %v2808_v60  ;;  %v1993_v4 = vpop.f32.mrb[31].mxu0 }
 0x177   : > { %2229 = vst [vmem:[%s3427_s11 + $0xc8] sm:$0xff] %v2197_v61  ;;  %v2072_v5 = vadd.f32 %v2934_v62, %v3416_v34  ;;  %v2936_v7 = vadd.f32 %v1993_v4, %v1255_v0 }
 0x178   : > { %v2106_v8 = vmax.f32 %v2074_v1, 0.0  ;;  %v2075_v9 = vadd.f32 %v2935_v3, %v3416_v34 }
 0x179   : > { %v2104_v11 = vmax.f32 %v2072_v5, 0.0  ;;  %v2073_v12 = vadd.f32 %v2936_v7, %v3416_v34 }
 0x17a   : > { %v2202_v14 = vadd.f32 %v2600_v2, %v2106_v8  ;;  %v2107_v15 = vmax.f32 %v2075_v9, 0.0 }
 0x17b   : > { %v2200_v16 = vadd.f32 %v2596_v6, %v2104_v11  ;;  %v2105_v17 = vmax.f32 %v2073_v12, 0.0 }
 0x17c   : > { %2234 = vst [vmem:[%s3427_s11 + $0xf0] sm:$0xff] %v2202_v14  ;;  %v2203_v18 = vadd.f32 %v2601_v10, %v2107_v15 }
 0x17d   : > { %2232 = vst [vmem:[%s3427_s11 + $0xe0] sm:$0xff] %v2200_v16  ;;  %v2201_v19 = vadd.f32 %v2597_v13, %v2105_v17 }
 0x17e   : > { %2235 = vst [vmem:[%s3427_s11 + $0xf8] sm:$0xff] %v2203_v18 }
 0x17f   : > { %2233 = vst [vmem:[%s3427_s11 + $0xe8] sm:$0xff] %v2201_v19 }
 0x180 PF: > { %s20_s15 = sadd.s32 1, %s3143_s15   ;;  %s3524_s13 = smov %s3139_s14 }
 0x181   : > { %p17_p5 = scmp.ge.s32.totalorder %s20_s15, 4   ;;  %s3525_s14 = smov %s3527_s16 }
 0x183   :  { %19 = sbr.rel (!%p17_p5) target bundleno = 2 (0x2), region = 102 }

// kernel: _lambda_.4
= control target key start
LH: loop header
LB: loop body
LE: loop exit
PB: predicated region body
PF: predicated region fallthrough
CT: control target
= control target key end

     0   :  { %s7278_s12 = smov 0   ;;  %s7280_s13 = smov 0   ;;  %s9140_s0 = inlined_call_operand.vmem [shape: bf16[2,18,18,128], index: 0, kind: input, shape index: {}]   ;;  %s9141_s1 = inlined_call_operand.vmem [shape: bf16[3,3,128,128], index: 1, kind: input, shape index: {}]   ;;  %s9142_s2 = inlined_call_operand.vmem [shape: f32[1,128], index: 2, kind: input, shape index: {}]   ;;  %s9143_s3 = inlined_call_operand.vmem [shape: bf16[2,16,16,128], index: 3, kind: output, shape index: {}]  }
   0x1   :  { %s7282_s14 = smov 0  }
   0x2 LB: > { %s25_s15 = sadd.s32 1, %s7252_s13  ;;  %p5348_p0 = scmp.ge.s32.totalorder %s7256_s14, 1  ;;  %s7256_s14 = sphi %s7282_s14, %s13_s14   ;;  %s7252_s13 = sphi %s7280_s13, %s9211_s13   ;;  %s7248_s12 = sphi %s7278_s12, %s9210_s12  }
   0x3   : > { %p27_p1 = scmp.ge.s32.totalorder %s25_s15, 2  ;;  %p151_p2 = scmp.lt.s32.totalorder %s7256_s14, 3 }
   0x5   : > { %s9213_s15 = smov (%p27_p1, %s25_s15), 0  ;;  %p152_p3 = pnand %p5348_p0, %p151_p2 }
   0x7   : > { %155 = sbr.rel (%p152_p3) target bundleno = 590 (0x24e), region = 32 }
   0xe   : > { %v7044_v0 = vld [vmem:[%s9141_s1 + $0x40] sm:$0xff]   ;;  %p180_p4 = scmp.lt.s32.totalorder %s7248_s12, 1  ;;  %v7046_v2 = vld [vmem:[%s9141_s1 + $0x48] sm:$0xff]   ;;  %v7048_v4 = vld [vmem:[%s9141_s1 + $0x50] sm:$0xff]   ;;  %vm265_vm0 = vsmask.f32 3328 }
   0xf   : > { %v7045_v1 = vld [vmem:[%s9141_s1 + $0x100] sm:$0xff]   ;;  %6315 = vmatprep.subr.bf16.mxu1 %v7044_v0  ;;  %v7047_v3 = vld [vmem:[%s9141_s1 + $0x108] sm:$0xff]   ;;  %v7049_v5 = vld [vmem:[%s9141_s1 + $0x110] sm:$0xff]   ;;  %vm266_vm1 = vsmask.f32 7440  ;;  %vm1295_vm3 = vcmask 1042432  }
  0x10   : > { %6507 = vmatprep.subr.bf16.mxu0 %v7045_v1  ;;  %6316 = vmatpush3.bf16.msra.mxu1 %v7044_v0  ;;  %s9215_s12 = smov (!%p180_p4, %s7248_s12), 1  ;;  %v7050_v6 = vld [vmem:[%s9141_s1 + $0x58] sm:$0xff]   ;;  %v7052_v8 = vld [vmem:[%s9141_s1 + $0x60] sm:$0xff]   ;;  %v7054_v10 = vld [vmem:[%s9141_s1 + $0x68] sm:$0xff]   ;;  %vm1296_vm4 = vcmask 1046532  }
  0x11   : > { %6508 = vmatpush3.bf16.msra.mxu0 %v7045_v1  ;;  %6317 = vmatprep.subr.bf16.mxu1 %v7046_v2  ;;  %v7051_v7 = vld [vmem:[%s9141_s1 + $0x118] sm:$0xff]   ;;  %s7019_s5 = smul.u32 216, %s9215_s12  ;;  %v7053_v9 = vld [vmem:[%s9141_s1 + $0x120] sm:$0xff]   ;;  %v7055_v11 = vld [vmem:[%s9141_s1 + $0x128] sm:$0xff]   ;;  %s5971_s26 = sshll.u32 %s9215_s12, 7 }
  0x12   : > { %6509 = vmatprep.subr.bf16.mxu0 %v7047_v3  ;;  %v7056_v25 = vld [vmem:[%s9141_s1 + $0x70] sm:$0xff]   ;;  %v7058_v36 = vld [vmem:[%s9141_s1 + $0x78] sm:$0xff]   ;;  %vm7364_vm2 = vmor %vm265_vm0, %vm266_vm1  ;;  %s9081_s29 = scalar_lea.vmem %s9143_s3, %s5971_s26 }
  0x13   : > { %s7332_s16 = scalar_lea.vmem %s9140_s0, %s7019_s5  ;;  %v7057_v30 = vld [vmem:[%s9141_s1 + $0x130] sm:$0xff]   ;;  %v7059_v51 = vld [vmem:[%s9141_s1 + $0x138] sm:$0xff]   ;;  %vm7610_vm5 = vmor %vm1295_vm3, %vm1296_vm4 }
  0x14   : > { %6318 = vmatpush3.bf16.msra.mxu1 %v7046_v2  ;;  %v201_v12 = vld [vmem:[%s7332_s16] sm:$0xf]  ;;  %v202_v13 = vld [vmem:[%s7332_s16 + $0x4] sm:$0xf]  ;;  %v249_v14 = vld [vmem:[%s7332_s16 + $0x8] sm:$0x1] }
  0x15   : > { %6510 = vmatpush3.bf16.msra.mxu0 %v7047_v3  ;;  %6319 = vmatprep.subr.bf16.mxu1 %v7048_v4  ;;  %v269_v15 = vshrl.u32 %v201_v12, 16  ;;  %v272_v16 = vshll.u32 %v201_v12, 16  ;;  %v278_v17 = vshll.u32 %v202_v13, 16  ;;  %v282_v18 = vshrl.u32 %v202_v13, 16  ;;  %v5544_v20 = vld [vmem:[%s7332_s16 + $0xc] sm:$0xf] }
  0x16   : > { %6511 = vmatprep.subr.bf16.mxu0 %v7049_v5  ;;  %v288_v19 = vshll.u32 %v249_v14, 16  ;;  %v7345_v23 = vld [vmem:[%s7332_s16 + $0x10] sm:$0xf]  ;;  %v7348_v24 = vld [vmem:[%s7332_s16 + $0x14] sm:$0x1]  ;;  %v2171_v29 = vshrl.u32 %v5544_v20, 16 }
  0x17   : > { %v271_v21 = vrot.slane %v269_v15, 4  ;;  %v274_v22 = vrot.slane %v272_v16, 5  ;;  %v280_v26 = vrot.slane %v278_v17, 5  ;;  %v284_v27 = vrot.slane %v282_v18, 4  ;;  %v203_v35 = vld [vmem:[%s7332_s16 + $0xc] sm:$0xf] }
  0x18   : > { %6320 = vmatpush3.bf16.msra.mxu1 %v7048_v4  ;;  %v290_v28 = vrot.slane %v288_v19, 5  ;;  %v2174_v32 = vshll.u32 %v5544_v20, 16  ;;  %v2180_v33 = vshll.u32 %v7345_v23, 16  ;;  %v2184_v34 = vshrl.u32 %v7345_v23, 16  ;;  %v204_v42 = vld [vmem:[%s7332_s16 + $0x10] sm:$0xf] }
  0x19   : > { %6512 = vmatpush3.bf16.msra.mxu0 %v7049_v5  ;;  %6321 = vmatprep.subr.bf16.mxu1 %v7050_v6  ;;  %v275_v31 = vor.u32 %v274_v22, %v271_v21  ;;  %v285_v38 = vor.u32 %v284_v27, %v280_v26  ;;  %v2173_v39 = vrot.slane %v2171_v29, 4  ;;  %v2190_v40 = vshll.u32 %v7348_v24, 16  ;;  %v250_v55 = vld [vmem:[%s7332_s16 + $0x14] sm:$0x1]  ;;  %v5547_v57 = vld [vmem:[%s7332_s16 + $0x18] sm:$0xf] }
  0x1a   : > { %6513 = vmatprep.subr.bf16.mxu0 %v7051_v7  ;;  %v2945_v41 = vrot.slane %v7348_v24, 5  ;;  %v2176_v44 = vrot.slane %v2174_v32, 5  ;;  %v2182_v45 = vrot.slane %v2180_v33, 5  ;;  %v2186_v46 = vrot.slane %v2184_v34, 4  ;;  %v7381_v62 = vld [vmem:[%s7332_s16 + $0x1c] sm:$0xf] }
  0x1b   : > { %v276_v43 = vrot.slane %v275_v31, 4  ;;  %v286_v47 = vrot.slane %v285_v38, 4  ;;  %v2192_v48 = vrot.slane %v2190_v40, 5  ;;  %v293_v49 = vshrl.u32 %v203_v35, 16  ;;  %v7060_v3 = vld [vmem:[%s9141_s1] sm:$0xff]  }
  0x1c   : > { %6322 = vmatpush3.bf16.msra.mxu1 %v7050_v6  ;;  %v296_v50 = vshll.u32 %v203_v35, 16  ;;  %v2177_v53 = vor.u32 %v2176_v44, %v2173_v39  ;;  %v2187_v54 = vor.u32 %v2186_v46, %v2182_v45  ;;  %v302_v56 = vshll.u32 %v204_v42, 16  ;;  %v7389_v4 = vld [vmem:[%s9141_s1 + $0x140] sm:$0xff]   ;;  %v205_v21 = vld [vmem:[%s7332_s16 + $0x18] sm:$0xf]  ;;  %v7063_v46 = vld [vmem:[%s9141_s1 + $0x8] sm:$0xff]  }
  0x1d   : > { %6514 = vmatpush3.bf16.msra.mxu0 %v7051_v7  ;;  %6323 = vmatprep.subr.bf16.mxu1 %v7052_v8  ;;  %v281_v52 = vsel %vm7364_vm2, %v276_v43, %v280_v26  ;;  %v291_v58 = vsel %vm7364_vm2, %v286_v47, %v290_v28  ;;  %v295_v59 = vrot.slane %v293_v49, 4  ;;  %v306_v61 = vshrl.u32 %v204_v42, 16  ;;  %v206_v28 = vld [vmem:[%s7332_s16 + $0x1c] sm:$0xf]  ;;  %v251_v33 = vld [vmem:[%s7332_s16 + $0x20] sm:$0x1] }
  0x1e   : > { %6515 = vmatprep.subr.bf16.mxu0 %v7053_v9  ;;  %v298_v60 = vrot.slane %v296_v50, 5  ;;  %v5368_v63 = vcombine.low %v281_v52, %v291_v58  ;;  %v2178_v0 = vrot.slane %v2177_v53, 4  ;;  %v2188_v1 = vrot.slane %v2187_v54, 4  ;;  %v5550_v39 = vld [vmem:[%s7332_s16 + $0x24] sm:$0xf] }
  0x1f   : > { %v304_v2 = vrot.slane %v302_v56, 5  ;;  %v308_v6 = vrot.slane %v306_v61, 4  ;;  %v312_v7 = vshll.u32 %v250_v55, 16  ;;  %v2198_v12 = vshll.u32 %v5547_v57, 16  ;;  %v207_v52 = vld [vmem:[%s7332_s16 + $0x24] sm:$0xf] }
  0x20   : > { %6324 = vmatpush3.bf16.msra.mxu1 %v7052_v8  ;;  %v299_v5 = vor.u32 %v298_v60, %v295_v59  ;;  %v7392_v8 = vld [vmem:[%s7332_s16 + $0x20] sm:$0x1]  ;;  %6331 = vmatprep.mubr.bf16.mxu1 %v5368_v63  ;;  %v2204_v19 = vshll.u32 %v7381_v62, 16  ;;  %v2208_v20 = vshrl.u32 %v7381_v62, 16  ;;  %v2949_v27 = vrot.slane %v7381_v62, 5  ;;  %v7062_v63 = vld [vmem:[%s9141_s1 + $0x148] sm:$0xff]  }
  0x21   : > { %6516 = vmatpush3.bf16.msra.mxu0 %v7053_v9  ;;  %6325 = vmatprep.subr.bf16.mxu1 %v7054_v10  ;;  %v2183_v9 = vsel %vm7364_vm2, %v2178_v0, %v2182_v45  ;;  %v309_v15 = vor.u32 %v308_v6, %v304_v2  ;;  %v314_v16 = vrot.slane %v312_v7, 5  ;;  %v2200_v18 = vrot.slane %v2198_v12, 5  ;;  %v7417_v45 = vld [vmem:[%s7332_s16 + $0x28] sm:$0xf] }
  0x22   : > { %6517 = vmatprep.subr.bf16.mxu0 %v7055_v11  ;;  %v300_v14 = vrot.slane %v299_v5, 4  ;;  %v2214_v26 = vshll.u32 %v7392_v8, 16  ;;  %v2210_v31 = vrot.slane %v2208_v20, 4  ;;  %v2952_v32 = vrot.slane %v7392_v8, 5  ;;  %v208_v5 = vld [vmem:[%s7332_s16 + $0x28] sm:$0xf] }
  0x23   : > { %v317_v38 = vshrl.u32 %v205_v21, 16  ;;  %v320_v44 = vshll.u32 %v205_v21, 16  ;;  %v330_v49 = vshrl.u32 %v206_v28, 16  ;;  %v336_v50 = vshll.u32 %v251_v33, 16  ;;  %v7448_v33 = vld [vmem:[%s7332_s16 + $0x34] sm:$0xf] }
  0x24   : > { %6326 = vmatpush3.bf16.msra.mxu1 %v7054_v10  ;;  %v2193_v10 = vsel %vm7364_vm2, %v2188_v1, %v2192_v48  ;;  %v305_v22 = vsel %vm7364_vm2, %v300_v14, %v304_v2  ;;  %v2216_v35 = vrot.slane %v2214_v26, 5  ;;  %v326_v48 = vshll.u32 %v206_v28, 16 }
  0x25   : > { %6518 = vmatpush3.bf16.msra.mxu0 %v7055_v11  ;;  %6327 = vmatprep.subr.bf16.mxu1 %v7056_v25  ;;  %v2195_v11 = vshrl.u32 %v5547_v57, 16  ;;  %v5608_v13 = vcombine.low %v2183_v9, %v2193_v10  ;;  %v319_v47 = vrot.slane %v317_v38, 4  ;;  %v322_v55 = vrot.slane %v320_v44, 5 }
  0x26   : > { %6519 = vmatprep.subr.bf16.mxu0 %v7057_v30  ;;  %v2219_v56 = vshrl.u32 %v5550_v39, 16  ;;  %v328_v57 = vrot.slane %v326_v48, 5  ;;  %v332_v58 = vrot.slane %v330_v49, 4  ;;  %v338_v59 = vrot.slane %v336_v50, 5  ;;  %v7065_v48 = vld [vmem:[%s9141_s1 + $0x158] sm:$0xff]  }
  0x27   : > { %v2197_v17 = vrot.slane %v2195_v11, 4  ;;  %6523 = vmatprep.mubr.bf16.mxu0 %v5608_v13  ;;  %v2222_v60 = vshll.u32 %v5550_v39, 16  ;;  %v323_v0 = vor.u32 %v322_v55, %v319_v47  ;;  %v2228_v2 = vshll.u32 %v7417_v45, 16  ;;  %v252_v11 = vld [vmem:[%s7332_s16 + $0x2c] sm:$0x1] }
  0x28   : > { %6328 = vmatpush3.bf16.msra.mxu1 %v7056_v25  ;;  %v310_v25 = vrot.slane %v309_v15, 4  ;;  %v2221_v1 = vrot.slane %v2219_v56, 4  ;;  %v333_v7 = vor.u32 %v332_v58, %v328_v57  ;;  %v2232_v10 = vshrl.u32 %v7417_v45, 16 }
  0x29   : > { %6520 = vmatpush3.bf16.msra.mxu0 %v7057_v30  ;;  %6329 = vmatprep.subr.bf16.mxu1 %v7058_v36  ;;  %v2201_v29 = vor.u32 %v2200_v18, %v2197_v17  ;;  %v2206_v30 = vrot.slane %v2204_v19, 5  ;;  %v2224_v9 = vrot.slane %v2222_v60, 5  ;;  %v324_v12 = vrot.slane %v323_v0, 4  ;;  %v7072_v60 = vld [vmem:[%s9141_s1 + $0x20] sm:$0xff]  }
  0x2a   : > { %6521 = vmatprep.subr.bf16.mxu0 %v7059_v51  ;;  %v315_v34 = vsel %vm7364_vm2, %v310_v25, %v314_v16  ;;  %v2230_v13 = vrot.slane %v2228_v2, 5  ;;  %v341_v15 = vshrl.u32 %v207_v52, 16  ;;  %v5553_v16 = vld [vmem:[%s7332_s16 + $0x30] sm:$0xf]  ;;  %v334_v17 = vrot.slane %v333_v7, 4 }
  0x2b   : > { %v5369_v40 = vcombine.low %v305_v22, %v315_v34  ;;  %v2202_v42 = vrot.slane %v2201_v29, 4  ;;  %v2211_v43 = vor.u32 %v2210_v31, %v2206_v30  ;;  %v2225_v18 = vor.u32 %v2224_v9, %v2221_v1  ;;  %v7069_v34 = vld [vmem:[%s9141_s1 + $0x18] sm:$0xff]  }
  0x2c   : > { %6330 = vmatpush3.bf16.msra.mxu1 %v7058_v36  ;;  %v7413_v36 = vrot.slane %v2949_v27, 4  ;;  %v2234_v19 = vrot.slane %v2232_v10, 4  ;;  %v344_v20 = vshll.u32 %v207_v52, 16  ;;  %v329_v21 = vsel %vm7364_vm2, %v324_v12, %v328_v57  ;;  %v253_v2 = vld [vmem:[%s7332_s16 + $0x38] sm:$0x1] }
  0x2d   : > { %6522 = vmatpush3.bf16.msra.mxu0 %v7059_v51  ;;  %6363 = vmatprep.subr.bf16.mxu1 %v7060_v3  ;;  %v7423_v51 = vld [vmem:[%s7332_s16 + $0x2c] sm:$0x1]  ;;  %v2207_v53 = vsel %vm7364_vm2, %v2202_v42, %v2206_v30  ;;  %v2212_v54 = vrot.slane %v2211_v43, 4  ;;  %v343_v25 = vrot.slane %v341_v15, 4  ;;  %v350_v26 = vshll.u32 %v208_v5, 16 }
  0x2e   : > { %6555 = vmatprep.subr.bf16.mxu0 %v7389_v4  ;;  %v2238_v14 = vshll.u32 %v7423_v51, 16  ;;  %v339_v28 = vsel %vm7364_vm2, %v334_v17, %v338_v59  ;;  %v2226_v29 = vrot.slane %v2225_v18, 4  ;;  %v2235_v30 = vor.u32 %v2234_v19, %v2230_v13  ;;  %v210_v59 = vld [vmem:[%s7332_s16 + $0x34] sm:$0xf]  ;;  %v5556_v9 = vld [vmem:[%s7332_s16 + $0x3c] sm:$0xf] }
  0x2f   : > { %6332 = vmatmul.mubr.bf16.vlgmr.msra.gmra.mrb[0].mxu1 %v5369_v40  ;;  %v2217_v61 = vsel %vm7364_vm2, %v2212_v54, %v2216_v35  ;;  %v346_v31 = vrot.slane %v344_v20, 5  ;;  %v5370_v35 = vcombine.low %v329_v21, %v339_v28  ;;  %v352_v38 = vrot.slane %v350_v26, 5  ;;  %v209_v54 = vld [vmem:[%s7332_s16 + $0x30] sm:$0xf]  ;;  %v7482_v19 = vld [vmem:[%s7332_s16 + $0x40] sm:$0xf] }
  0x30   : > { %6364 = vmatpush3.bf16.msra.mxu1 %v7060_v3  ;;  %v7066_v3 = vld [vmem:[%s9141_s1 + $0x10] sm:$0xff]   ;;  %v5609_v6 = vcombine.low %v2207_v53, %v2217_v61  ;;  %v2240_v22 = vrot.slane %v2238_v14, 5  ;;  %v354_v39 = vshrl.u32 %v208_v5, 16  ;;  %v360_v40 = vshll.u32 %v252_v11, 16  ;;  %v7074_v14 = vld [vmem:[%s9141_s1 + $0x28] sm:$0xff]   ;;  %v7067_v20 = vld [vmem:[%s9141_s1 + $0x160] sm:$0xff]  }
  0x31   : > { %6365 = vmatprep.subr.bf16.mxu1 %v7063_v46  ;;  %v2231_v42 = vsel %vm7364_vm2, %v2226_v29, %v2230_v13  ;;  %v2236_v43 = vrot.slane %v2235_v30, 4  ;;  %v347_v44 = vor.u32 %v346_v31, %v343_v25  ;;  %v2243_v47 = vshrl.u32 %v5553_v16, 16  ;;  %6335 = vmatprep.mubr.bf16.mxu1 %v5370_v35  ;;  %v7490_v28 = vld [vmem:[%s7332_s16 + $0x44] sm:$0x1]  ;;  %v7076_v35 = vld [vmem:[%s9141_s1 + $0x30] sm:$0xff]  }
  0x32   : > { %6524 = vmatmul.mubr.bf16.vlgmr.msra.gmra.mrb[0].mxu0 %v5609_v6  ;;  %v356_v49 = vrot.slane %v354_v39, 4  ;;  %v362_v50 = vrot.slane %v360_v40, 5  ;;  %v2246_v52 = vshll.u32 %v5553_v16, 16  ;;  %v2252_v53 = vshll.u32 %v7448_v33, 16 }
  0x33   : > { %6556 = vmatpush3.bf16.msra.mxu0 %v7389_v4  ;;  %v7064_v4 = vld [vmem:[%s9141_s1 + $0x150] sm:$0xff]   ;;  %v2241_v55 = vsel %vm7364_vm2, %v2236_v43, %v2240_v22  ;;  %v348_v56 = vrot.slane %v347_v44, 4  ;;  %v2245_v57 = vrot.slane %v2243_v47, 4  ;;  %v2256_v58 = vshrl.u32 %v7448_v33, 16 }
  0x34   : > { %6366 = vmatpush3.bf16.msra.mxu1 %v7063_v46  ;;  %6557 = vmatprep.subr.bf16.mxu0 %v7062_v63  ;;  %v7459_v46 = vld [vmem:[%s7332_s16 + $0x38] sm:$0x1]  ;;  %v5610_v61 = vcombine.low %v2231_v42, %v2241_v55  ;;  %v2248_v0 = vrot.slane %v2246_v52, 5  ;;  %v2254_v1 = vrot.slane %v2252_v53, 5  ;;  %v365_v7 = vshrl.u32 %v209_v54, 16 }
  0x35   : > { %6367 = vmatprep.subr.bf16.mxu1 %v7066_v3  ;;  %v353_v5 = vsel %vm7364_vm2, %v348_v56, %v352_v38  ;;  %v2262_v6 = vshll.u32 %v7459_v46, 16  ;;  %v368_v12 = vshll.u32 %v209_v54, 16  ;;  %v374_v13 = vshll.u32 %v210_v59, 16  ;;  %v212_v55 = vld [vmem:[%s7332_s16 + $0x40] sm:$0xf] }
  0x36   : > { %6527 = vmatprep.mubr.bf16.mxu0 %v5610_v61  ;;  %v2249_v11 = vor.u32 %v2248_v0, %v2245_v57  ;;  %v367_v17 = vrot.slane %v365_v7, 4  ;;  %v378_v18 = vshrl.u32 %v210_v59, 16  ;;  %v2267_v40 = vshrl.u32 %v5556_v9, 16 }
  0x37   : > { %6558 = vmatpush3.bf16.msra.mxu0 %v7062_v63  ;;  %v357_v63 = vor.u32 %v356_v49, %v352_v38  ;;  %v2264_v16 = vrot.slane %v2262_v6, 5  ;;  %v370_v25 = vrot.slane %v368_v12, 5  ;;  %v376_v26 = vrot.slane %v374_v13, 5 }
  0x38   : > { %6368 = vmatpush3.bf16.msra.mxu1 %v7066_v3  ;;  %6559 = vmatprep.subr.bf16.mxu0 %v7064_v4  ;;  %v2258_v3 = vrot.slane %v2256_v58, 4  ;;  %v2250_v22 = vrot.slane %v2249_v11, 4  ;;  %v380_v31 = vrot.slane %v378_v18, 4  ;;  %v2270_v42 = vshll.u32 %v5556_v9, 16  ;;  %v5559_v9 = vld [vmem:[%s7332_s16 + $0x48] sm:$0xf] }
  0x39   : > { %6369 = vmatprep.subr.bf16.mxu1 %v7069_v34  ;;  %v358_v10 = vrot.slane %v357_v63, 4  ;;  %v371_v39 = vor.u32 %v370_v25, %v367_v17  ;;  %v2276_v49 = vshll.u32 %v7482_v19, 16  ;;  %v2269_v53 = vrot.slane %v2267_v40, 4  ;;  %v254_v63 = vld [vmem:[%s7332_s16 + $0x44] sm:$0x1] }
  0x3a   : > { %v2259_v15 = vor.u32 %v2258_v3, %v2254_v1  ;;  %v2255_v38 = vsel %vm7364_vm2, %v2250_v22, %v2254_v1  ;;  %v381_v44 = vor.u32 %v380_v31, %v376_v26  ;;  %v2272_v54 = vrot.slane %v2270_v42, 5  ;;  %v7523_v22 = vld [vmem:[%s7332_s16 + $0x50] sm:$0x1]  ;;  %v7071_v31 = vld [vmem:[%s9141_s1 + $0x178] sm:$0xff]  }
  0x3b   : > { %6560 = vmatpush3.bf16.msra.mxu0 %v7064_v4  ;;  %v363_v21 = vsel %vm7364_vm2, %v358_v10, %v362_v50  ;;  %v384_v4 = vshll.u32 %v253_v2, 16  ;;  %v372_v52 = vrot.slane %v371_v39, 4  ;;  %v2278_v57 = vrot.slane %v2276_v49, 5  ;;  %v7078_v2 = vld [vmem:[%s9141_s1 + $0x38] sm:$0xff]  }
  0x3c   : > { %6370 = vmatpush3.bf16.msra.mxu1 %v7069_v34  ;;  %6561 = vmatprep.subr.bf16.mxu0 %v7065_v48  ;;  %v5371_v29 = vcombine.low %v353_v5, %v363_v21  ;;  %v2260_v30 = vrot.slane %v2259_v15, 4  ;;  %v211_v34 = vld [vmem:[%s7332_s16 + $0x3c] sm:$0xf]  ;;  %v382_v56 = vrot.slane %v381_v44, 4  ;;  %v2280_v58 = vshrl.u32 %v7482_v19, 16  ;;  %v7070_v15 = vld [vmem:[%s9141_s1 + $0x170] sm:$0xff]  }
  0x3d   : > { %6371 = vmatprep.subr.bf16.mxu1 %v7072_v60  ;;  %v386_v47 = vrot.slane %v384_v4, 5  ;;  %v2286_v59 = vshll.u32 %v7490_v28, 16  ;;  %v2273_v61 = vor.u32 %v2272_v54, %v2269_v53  ;;  %v389_v0 = vshrl.u32 %v211_v34, 16  ;;  %v7534_v4 = vld [vmem:[%s9141_s1 + $0x80] sm:$0xff]   ;;  %v214_v53 = vld [vmem:[%s7332_s16 + $0x4c] sm:$0xf] }
  0x3e   : > { %6336 = vmatmul.mubr.bf16.gmra.mrb[4].mxu1 %v5371_v29  ;;  %v2265_v43 = vsel %vm7364_vm2, %v2260_v30, %v2264_v16  ;;  %v392_v1 = vshll.u32 %v211_v34, 16  ;;  %v2282_v3 = vrot.slane %v2280_v58, 4  ;;  %v398_v7 = vshll.u32 %v212_v55, 16  ;;  %v213_v30 = vld [vmem:[%s7332_s16 + $0x48] sm:$0xf] }
  0x3f   : > { %6562 = vmatpush3.bf16.msra.mxu0 %v7065_v48  ;;  %v5611_v50 = vcombine.low %v2255_v38, %v2265_v43  ;;  %v7068_v48 = vld [vmem:[%s9141_s1 + $0x168] sm:$0xff]   ;;  %v387_v5 = vsel %vm7364_vm2, %v382_v56, %v386_v47  ;;  %v2288_v6 = vrot.slane %v2286_v59, 5  ;;  %v2274_v11 = vrot.slane %v2273_v61, 4  ;;  %v255_v54 = vld [vmem:[%s7332_s16 + $0x50] sm:$0x1] }
  0x40   : > { %6372 = vmatpush3.bf16.msra.mxu1 %v7072_v60  ;;  %6563 = vmatprep.subr.bf16.mxu0 %v7067_v20  ;;  %v377_v60 = vsel %vm7364_vm2, %v372_v52, %v376_v26  ;;  %v391_v12 = vrot.slane %v389_v0, 4  ;;  %v394_v13 = vrot.slane %v392_v1, 5  ;;  %v2283_v16 = vor.u32 %v2282_v3, %v2278_v57  ;;  %v5562_v58 = vld [vmem:[%s7332_s16 + $0x54] sm:$0xf]  ;;  %v7548_v0 = vld [vmem:[%s7332_s16 + $0x58] sm:$0xf] }
  0x41   : > { %6373 = vmatprep.subr.bf16.mxu1 %v7074_v14  ;;  %6528 = vmatmul.mubr.bf16.gmra.mrb[4].mxu0 %v5611_v50  ;;  %v5372_v10 = vcombine.low %v377_v60, %v387_v5  ;;  %v400_v17 = vrot.slane %v398_v7, 5  ;;  %v402_v18 = vshrl.u32 %v212_v55, 16  ;;  %v408_v21 = vshll.u32 %v254_v63, 16 }
  0x42   : > { %v395_v25 = vor.u32 %v394_v13, %v391_v12  ;;  %v2291_v26 = vshrl.u32 %v5559_v9, 16  ;;  %v2294_v29 = vshll.u32 %v5559_v9, 16  ;;  %v2284_v34 = vrot.slane %v2283_v16, 4 }
  0x43   : > { %6564 = vmatpush3.bf16.msra.mxu0 %v7067_v20  ;;  %6339 = vmatprep.mubr.bf16.mxu1 %v5372_v10  ;;  %v2279_v20 = vsel %vm7364_vm2, %v2274_v11, %v2278_v57  ;;  %v410_v38 = vrot.slane %v408_v21, 5  ;;  %v2310_v52 = vshll.u32 %v7523_v22, 16  ;;  %v413_v61 = vshrl.u32 %v213_v30, 16 }
  0x44   : > { %6374 = vmatpush3.bf16.msra.mxu1 %v7074_v14  ;;  %v7517_v14 = vld [vmem:[%s7332_s16 + $0x4c] sm:$0xf]  ;;  %6565 = vmatprep.subr.bf16.mxu0 %v7068_v48  ;;  %v396_v40 = vrot.slane %v395_v25, 4  ;;  %v2293_v42 = vrot.slane %v2291_v26, 4  ;;  %v2296_v43 = vrot.slane %v2294_v29, 5  ;;  %v2289_v47 = vsel %vm7364_vm2, %v2284_v34, %v2288_v6  ;;  %v7553_v6 = vld [vmem:[%s9141_s1 + $0x180] sm:$0xff]  }
  0x45   : > { %6375 = vmatprep.subr.bf16.mxu1 %v7076_v35  ;;  %v2300_v39 = vshll.u32 %v7517_v14, 16  ;;  %v2304_v44 = vshrl.u32 %v7517_v14, 16  ;;  %v5612_v55 = vcombine.low %v2279_v20, %v2289_v47  ;;  %v2312_v60 = vrot.slane %v2310_v52, 5  ;;  %v7560_v20 = vld [vmem:[%s7332_s16 + $0x5c] sm:$0x1] }
  0x46   : > { %v2297_v56 = vor.u32 %v2296_v43, %v2293_v42  ;;  %v416_v63 = vshll.u32 %v213_v30, 16  ;;  %v426_v3 = vshrl.u32 %v214_v53, 16  ;;  %v415_v9 = vrot.slane %v413_v61, 4  ;;  %v216_v43 = vld [vmem:[%s7332_s16 + $0x58] sm:$0xf] }
  0x47   : > { %6566 = vmatpush3.bf16.msra.mxu0 %v7068_v48  ;;  %v2302_v50 = vrot.slane %v2300_v39, 5  ;;  %v401_v48 = vsel %vm7364_vm2, %v396_v40, %v400_v17  ;;  %v2306_v57 = vrot.slane %v2304_v44, 4  ;;  %6531 = vmatprep.mubr.bf16.mxu0 %v5612_v55  ;;  %v432_v11 = vshll.u32 %v255_v54, 16  ;;  %v5565_v52 = vld [vmem:[%s7332_s16 + $0x60] sm:$0xf] }
  0x48   : > { %6376 = vmatpush3.bf16.msra.mxu1 %v7076_v35  ;;  %v404_v35 = vrot.slane %v402_v18, 4  ;;  %6567 = vmatprep.subr.bf16.mxu0 %v7070_v15  ;;  %v2298_v1 = vrot.slane %v2297_v56, 4  ;;  %v418_v10 = vrot.slane %v416_v63, 5  ;;  %v428_v18 = vrot.slane %v426_v3, 4 }
  0x49   : > { %6377 = vmatprep.subr.bf16.mxu1 %v7078_v2  ;;  %v2307_v5 = vor.u32 %v2306_v57, %v2302_v50  ;;  %v434_v21 = vrot.slane %v432_v11, 5  ;;  %v2315_v25 = vshrl.u32 %v5562_v58, 16  ;;  %v2318_v29 = vshll.u32 %v5562_v58, 16 }
  0x4a   : > { %v405_v49 = vor.u32 %v404_v35, %v400_v17  ;;  %v2303_v13 = vsel %vm7364_vm2, %v2298_v1, %v2302_v50  ;;  %v419_v17 = vor.u32 %v418_v10, %v415_v9  ;;  %v2324_v30 = vshll.u32 %v7548_v0, 16  ;;  %v215_v35 = vld [vmem:[%s7332_s16 + $0x54] sm:$0xf]  ;;  %v256_v50 = vld [vmem:[%s7332_s16 + $0x5c] sm:$0x1] }
  0x4b   : > { %6568 = vmatpush3.bf16.msra.mxu0 %v7070_v15  ;;  %v2308_v15 = vrot.slane %v2307_v5, 4  ;;  %v2328_v34 = vshrl.u32 %v7548_v0, 16  ;;  %v2317_v42 = vrot.slane %v2315_v25, 4  ;;  %v437_v55 = vshrl.u32 %v215_v35, 16  ;;  %v7588_v25 = vld [vmem:[%s7332_s16 + $0x60] sm:$0xf] }
  0x4c   : > { %6378 = vmatpush3.bf16.msra.mxu1 %v7078_v2  ;;  %v406_v59 = vrot.slane %v405_v49, 4  ;;  %v422_v2 = vshll.u32 %v214_v53, 16  ;;  %6569 = vmatprep.subr.bf16.mxu0 %v7071_v31  ;;  %v420_v39 = vrot.slane %v419_v17, 4  ;;  %v2326_v44 = vrot.slane %v2324_v30, 5  ;;  %v7584_v17 = vld [vmem:[%s7332_s16 + $0x68] sm:$0x1] }
  0x4d   : > { %6411 = vmatprep.subr.bf16.mxu1 %v7534_v4  ;;  %v2313_v26 = vsel %vm7364_vm2, %v2308_v15, %v2312_v60  ;;  %v2330_v47 = vrot.slane %v2328_v34, 4  ;;  %v2334_v49 = vshll.u32 %v7560_v20, 16  ;;  %v7575_v60 = vld [vmem:[%s7332_s16 + $0x64] sm:$0xf]  ;;  %v439_v63 = vrot.slane %v437_v55, 4 }
  0x4e   : > { %v411_v7 = vsel %vm7364_vm2, %v406_v59, %v410_v38  ;;  %v424_v16 = vrot.slane %v422_v2, 5  ;;  %v5613_v38 = vcombine.low %v2303_v13, %v2313_v26  ;;  %v446_v59 = vshll.u32 %v216_v43, 16 }
  0x4f   : > { %v5373_v12 = vcombine.low %v401_v48, %v411_v7  ;;  %6570 = vmatpush3.bf16.msra.mxu0 %v7071_v31  ;;  %v2320_v31 = vrot.slane %v2318_v29, 5  ;;  %v440_v48 = vshll.u32 %v215_v35, 16  ;;  %v2331_v57 = vor.u32 %v2330_v47, %v2326_v44  ;;  %v7591_v35 = vld [vmem:[%s7332_s16 + $0x64] sm:$0xf] }
  0x50   : > { %6603 = vmatprep.subr.bf16.mxu0 %v7553_v6  ;;  %v429_v40 = vor.u32 %v428_v18, %v424_v16  ;;  %6532 = vmatmul.mubr.bf16.gmra.mrb[8].mxu0 %v5613_v38  ;;  %v425_v53 = vsel %vm7364_vm2, %v420_v39, %v424_v16  ;;  %v2336_v58 = vrot.slane %v2334_v49, 5  ;;  %v450_v5 = vshrl.u32 %v216_v43, 16  ;;  %v257_v43 = vld [vmem:[%s7332_s16 + $0x68] sm:$0x1] }
  0x51   : > { %6340 = vmatmul.mubr.bf16.gmra.mrb[8].mxu1 %v5373_v12  ;;  %v2321_v56 = vor.u32 %v2320_v31, %v2317_v42  ;;  %v442_v1 = vrot.slane %v440_v48, 5  ;;  %v2332_v7 = vrot.slane %v2331_v57, 4  ;;  %v448_v9 = vrot.slane %v446_v59, 5 }
  0x52   : > { %v430_v54 = vrot.slane %v429_v40, 4  ;;  %v452_v11 = vrot.slane %v450_v5, 4  ;;  %v456_v12 = vshll.u32 %v256_v50, 16  ;;  %v2339_v13 = vshrl.u32 %v5565_v52, 16  ;;  %v5632_v50 = vld [vmem:[%s7332_s16 + $0xc] sm:$0xe] }
  0x53   : > { %v2322_v3 = vrot.slane %v2321_v56, 4  ;;  %v443_v10 = vor.u32 %v442_v1, %v439_v63  ;;  %v2337_v16 = vsel %vm7364_vm2, %v2332_v7, %v2336_v58  ;;  %v2342_v18 = vshll.u32 %v5565_v52, 16  ;;  %v7606_v5 = vld [vmem:[%s7332_s16 + $0x6c] sm:$0xf] }
  0x54   : > { %v435_v61 = vsel %vm7364_vm2, %v430_v54, %v434_v21  ;;  %v2348_v21 = vshll.u32 %v7575_v60, 16  ;;  %v453_v30 = vor.u32 %v452_v11, %v448_v9  ;;  %v458_v34 = vrot.slane %v456_v12, 5 }
  0x55   : > { %v5374_v2 = vcombine.low %v425_v53, %v435_v61  ;;  %v2327_v15 = vsel %vm7364_vm2, %v2322_v3, %v2326_v44  ;;  %v444_v29 = vrot.slane %v443_v10, 4  ;;  %v2341_v38 = vrot.slane %v2339_v13, 4 }
  0x56   : > { %v5614_v26 = vcombine.low %v2327_v15, %v2337_v16  ;;  %v2344_v39 = vrot.slane %v2342_v18, 5  ;;  %v2350_v40 = vrot.slane %v2348_v21, 5  ;;  %v2352_v42 = vshrl.u32 %v7575_v60, 16  ;;  %v7618_v21 = vld [vmem:[%s7332_s16 + $0x70] sm:$0xf] }
  0x57   : > { %6343 = vmatprep.mubr.bf16.mxu1 %v5374_v2  ;;  %v449_v31 = vsel %vm7364_vm2, %v444_v29, %v448_v9  ;;  %v454_v44 = vrot.slane %v453_v30, 4  ;;  %v2358_v47 = vshll.u32 %v7584_v17, 16  ;;  %v461_v49 = vshrl.u32 %v7588_v25, 16  ;;  %v7162_v9 = vld [vmem:[%s7332_s16 + $0xb4] sm:$0xff]  }
  0x58   : > { %6535 = vmatprep.mubr.bf16.mxu0 %v5614_v26  ;;  %v2345_v52 = vor.u32 %v2344_v39, %v2341_v38  ;;  %v2354_v53 = vrot.slane %v2352_v42, 4  ;;  %v464_v54 = vshll.u32 %v7588_v25, 16  ;;  %v470_v55 = vshll.u32 %v7591_v35, 16 }
  0x59   : > { %v459_v48 = vsel %vm7364_vm2, %v454_v44, %v458_v34  ;;  %v2360_v56 = vrot.slane %v2358_v47, 5  ;;  %v463_v57 = vrot.slane %v461_v49, 4  ;;  %v474_v58 = vshrl.u32 %v7591_v35, 16  ;;  %v7629_v47 = vld [vmem:[%s7332_s16 + $0x78] sm:$0xf] }
  0x5a   : > { %v5375_v59 = vcombine.low %v449_v31, %v459_v48  ;;  %v2346_v61 = vrot.slane %v2345_v52, 4  ;;  %v2355_v63 = vor.u32 %v2354_v53, %v2350_v40  ;;  %v466_v1 = vrot.slane %v464_v54, 5  ;;  %v7640_v54 = vld [vmem:[%s7332_s16 + $0x7c] sm:$0xf] }
  0x5b   : > { %v472_v2 = vrot.slane %v470_v55, 5  ;;  %v476_v3 = vrot.slane %v474_v58, 4  ;;  %v480_v7 = vshll.u32 %v257_v43, 16  ;;  %v5648_v10 = vrot.slane %v5632_v50, 9  ;;  %v259_v58 = vld [vmem:[%s7332_s16 + $0x80] sm:$0x1] }
  0x5c   : > { %6344 = vmatmul.mubr.bf16.gmra.mrb[12].mxu1 %v5375_v59  ;;  %v2351_v11 = vsel %vm7364_vm2, %v2346_v61, %v2350_v40  ;;  %v2356_v12 = vrot.slane %v2355_v63, 4  ;;  %v467_v13 = vor.u32 %v466_v1, %v463_v57  ;;  %v2942_v15 = vrot.slane %v7345_v23, 5  ;;  %v258_v40 = vld [vmem:[%s7332_s16 + $0x74] sm:$0x1]  ;;  %v5633_v23 = vld [vmem:[%s7332_s16 + $0x18] sm:$0xe] }
  0x5d   : > { %v477_v16 = vor.u32 %v476_v3, %v472_v2  ;;  %v482_v18 = vrot.slane %v480_v7, 5  ;;  %v485_v26 = vshrl.u32 %v7606_v5, 16  ;;  %v488_v29 = vshll.u32 %v7606_v5, 16 }
  0x5e   : > { %v2361_v30 = vsel %vm7364_vm2, %v2356_v12, %v2360_v56  ;;  %v468_v34 = vrot.slane %v467_v13, 4  ;;  %v2943_v38 = vsel %vm7610_vm5, %v5648_v10, %v2942_v15  ;;  %v2944_v39 = vrot.slane %v2942_v15, 4  ;;  %v5634_v13 = vld [vmem:[%s7332_s16 + $0x24] sm:$0xe] }
  0x5f   : > { %v5615_v42 = vcombine.low %v2351_v11, %v2361_v30  ;;  %v478_v43 = vrot.slane %v477_v16, 4  ;;  %v487_v31 = vrot.slane %v485_v26, 4  ;;  %v490_v44 = vrot.slane %v488_v29, 5  ;;  %v7662_v16 = vld [vmem:[%s7332_s16 + $0x84] sm:$0xf]  ;;  %v7075_v29 = vld [vmem:[%s9141_s1 + $0x188] sm:$0xff]  }
  0x60   : > { %v473_v49 = vsel %vm7364_vm2, %v468_v34, %v472_v2  ;;  %v2946_v50 = vsel %vm7610_vm5, %v2944_v39, %v2945_v41  ;;  %v494_v52 = vshll.u32 %v7618_v21, 16  ;;  %v498_v53 = vshrl.u32 %v7618_v21, 16 }
  0x61   : > { %6536 = vmatmul.mubr.bf16.gmra.mrb[12].mxu0 %v5615_v42  ;;  %v483_v55 = vsel %vm7364_vm2, %v478_v43, %v482_v18  ;;  %v5680_v48 = vcombine.low %v2943_v38, %v2946_v50  ;;  %v491_v56 = vor.u32 %v490_v44, %v487_v31  ;;  %v504_v57 = vshll.u32 %v258_v40, 16  ;;  %v7670_v40 = vld [vmem:[%s7332_s16 + $0x88] sm:$0xf]  ;;  %v260_v31 = vld [vmem:[%s7332_s16 + $0x8c] sm:$0x1] }
  0x62   : > { %v5376_v59 = vcombine.low %v473_v49, %v483_v55  ;;  %v496_v24 = vrot.slane %v494_v52, 5  ;;  %v500_v61 = vrot.slane %v498_v53, 4  ;;  %v5649_v63 = vrot.slane %v5633_v23, 9 }
  0x63   : > { %6571 = vmatprep.mubr.bf16.mxu0 %v5680_v48  ;;  %v492_v41 = vrot.slane %v491_v56, 4  ;;  %v506_v1 = vrot.slane %v504_v57, 5  ;;  %v2953_v2 = vsel %vm7610_vm5, %v7413_v36, %v2952_v32  ;;  %v509_v3 = vshrl.u32 %v7629_v47, 16 }
  0x64   : > { %6347 = vmatprep.mubr.bf16.mxu1 %v5376_v59  ;;  %v501_v7 = vor.u32 %v500_v61, %v496_v24  ;;  %v2950_v10 = vsel %vm7610_vm5, %v5649_v63, %v2949_v27  ;;  %v512_v11 = vshll.u32 %v7629_v47, 16  ;;  %v518_v12 = vshll.u32 %v7640_v54, 16 }
  0x65   : > { %v497_v8 = vsel %vm7364_vm2, %v492_v41, %v496_v24  ;;  %v5681_v15 = vcombine.low %v2950_v10, %v2953_v2  ;;  %v511_v32 = vrot.slane %v509_v3, 4  ;;  %v522_v36 = vshrl.u32 %v7640_v54, 16  ;;  %v7691_v2 = vld [vmem:[%s7332_s16 + $0x90] sm:$0xf]  ;;  %v7694_v3 = vld [vmem:[%s7332_s16 + $0x94] sm:$0xf] }
  0x66   : > { %v502_v62 = vrot.slane %v501_v7, 4  ;;  %v514_v18 = vrot.slane %v512_v11, 5  ;;  %v520_v26 = vrot.slane %v518_v12, 5  ;;  %v528_v27 = vshll.u32 %v259_v58, 16 }
  0x67   : > { %v524_v30 = vrot.slane %v522_v36, 4  ;;  %v5650_v34 = vrot.slane %v5634_v13, 9  ;;  %v2956_v38 = vrot.slane %v7417_v45, 5  ;;  %v2959_v39 = vrot.slane %v7423_v51, 5  ;;  %v5635_v45 = vld [vmem:[%s7332_s16 + $0x30] sm:$0xe] }
  0x68   : > { %v507_v23 = vsel %vm7364_vm2, %v502_v62, %v506_v1  ;;  %v515_v42 = vor.u32 %v514_v18, %v511_v32  ;;  %v530_v43 = vrot.slane %v528_v27, 5  ;;  %v533_v44 = vshrl.u32 %v7662_v16, 16  ;;  %v261_v62 = vld [vmem:[%s7332_s16 + $0x98] sm:$0x1] }
  0x69   : > { %v5377_v49 = vcombine.low %v497_v8, %v507_v23  ;;  %6572 = vmatmul.mubr.bf16.vlgmr.msra.gmra.mrb[0].mxu0 %v5681_v15  ;;  %v525_v50 = vor.u32 %v524_v30, %v520_v26  ;;  %v2957_v52 = vsel %vm7610_vm5, %v5650_v34, %v2956_v38  ;;  %v2958_v53 = vrot.slane %v2956_v38, 4  ;;  %v7079_v30 = vld [vmem:[%s9141_s1 + $0x198] sm:$0xff]  }
  0x6a   : > { %6604 = vmatpush3.bf16.msra.mxu0 %v7553_v6  ;;  %v516_v51 = vrot.slane %v515_v42, 4  ;;  %v535_v55 = vrot.slane %v533_v44, 4  ;;  %v536_v48 = vshll.u32 %v7662_v16, 16  ;;  %v542_v56 = vshll.u32 %v7670_v40, 16  ;;  %v7077_v6 = vld [vmem:[%s9141_s1 + $0x190] sm:$0xff]  }
  0x6b   : > { %6348 = vmatmul.mubr.bf16.gmra.mrb[16].mxu1 %v5377_v49  ;;  %v526_v57 = vrot.slane %v525_v50, 4  ;;  %v2960_v58 = vsel %vm7610_vm5, %v2958_v53, %v2959_v39  ;;  %v546_v59 = vshrl.u32 %v7670_v40, 16  ;;  %v552_v24 = vshll.u32 %v260_v31, 16  ;;  %6605 = vmatprep.subr.bf16.mxu0 %v7075_v29  ;;  %v5636_v38 = vld [vmem:[%s7332_s16 + $0x3c] sm:$0xe] }
  0x6c   : > { %v521_v61 = vsel %vm7364_vm2, %v516_v51, %v520_v26  ;;  %v5682_v63 = vcombine.low %v2957_v52, %v2960_v58  ;;  %v538_v41 = vrot.slane %v536_v48, 5  ;;  %v544_v1 = vrot.slane %v542_v56, 5  ;;  %v7712_v31 = vld [vmem:[%s7332_s16 + $0x9c] sm:$0xf]  ;;  %v7721_v48 = vld [vmem:[%s7332_s16 + $0xa0] sm:$0xf] }
  0x6d   : > { %v531_v7 = vsel %vm7364_vm2, %v526_v57, %v530_v43  ;;  %v548_v10 = vrot.slane %v546_v59, 4  ;;  %v554_v11 = vrot.slane %v552_v24, 5  ;;  %v5651_v12 = vrot.slane %v5635_v45, 9  ;;  %v7083_v56 = vld [vmem:[%s9141_s1 + $0x1a0] sm:$0xff]  }
  0x6e   : > { %v5378_v13 = vcombine.low %v521_v61, %v531_v7  ;;  %6575 = vmatprep.mubr.bf16.mxu0 %v5682_v63  ;;  %v539_v8 = vor.u32 %v538_v41, %v535_v55  ;;  %v2963_v15 = vrot.slane %v7448_v33, 5  ;;  %v2966_v32 = vrot.slane %v7459_v46, 5  ;;  %6606 = vmatpush3.bf16.msra.mxu0 %v7075_v29  ;;  %v262_v61 = vld [vmem:[%s7332_s16 + $0xa4] sm:$0x1] }
  0x6f   : > { %v549_v36 = vor.u32 %v548_v10, %v544_v1  ;;  %v557_v18 = vshrl.u32 %v7691_v2, 16  ;;  %v560_v26 = vshll.u32 %v7691_v2, 16  ;;  %v566_v27 = vshll.u32 %v7694_v3, 16  ;;  %6607 = vmatprep.subr.bf16.mxu0 %v7077_v6 }
  0x70   : > { %6351 = vmatprep.mubr.bf16.mxu1 %v5378_v13  ;;  %v540_v34 = vrot.slane %v539_v8, 4  ;;  %v2964_v33 = vsel %vm7610_vm5, %v5651_v12, %v2963_v15  ;;  %v2965_v46 = vrot.slane %v2963_v15, 4  ;;  %v570_v29 = vshrl.u32 %v7694_v3, 16  ;;  %v5637_v15 = vld [vmem:[%s7332_s16 + $0x48] sm:$0xe] }
  0x71   : > { %v550_v39 = vrot.slane %v549_v36, 4  ;;  %v559_v23 = vrot.slane %v557_v18, 4  ;;  %v562_v42 = vrot.slane %v560_v26, 5  ;;  %v568_v43 = vrot.slane %v566_v27, 5  ;;  %v7746_v27 = vld [vmem:[%s7332_s16 + $0xa8] sm:$0xf] }
  0x72   : > { %v545_v44 = vsel %vm7364_vm2, %v540_v34, %v544_v1  ;;  %v2967_v49 = vsel %vm7610_vm5, %v2965_v46, %v2966_v32  ;;  %v572_v50 = vrot.slane %v570_v29, 4  ;;  %v576_v52 = vshll.u32 %v261_v62, 16  ;;  %6608 = vmatpush3.bf16.msra.mxu0 %v7077_v6  ;;  %v7087_v32 = vld [vmem:[%s9141_s1 + $0x1a8] sm:$0xff]  }
  0x73   : > { %v555_v53 = vsel %vm7364_vm2, %v550_v39, %v554_v11  ;;  %v5683_v45 = vcombine.low %v2964_v33, %v2967_v49  ;;  %v563_v51 = vor.u32 %v562_v42, %v559_v23  ;;  %v5652_v55 = vrot.slane %v5636_v38, 9  ;;  %6609 = vmatprep.subr.bf16.mxu0 %v7079_v30  ;;  %v7749_v29 = vld [vmem:[%s7332_s16 + $0xac] sm:$0xf] }
  0x74   : > { %v5379_v57 = vcombine.low %v545_v44, %v555_v53  ;;  %v573_v58 = vor.u32 %v572_v50, %v568_v43  ;;  %v578_v59 = vrot.slane %v576_v52, 5  ;;  %v2970_v24 = vrot.slane %v7482_v19, 5  ;;  %v5638_v53 = vld [vmem:[%s7332_s16 + $0x54] sm:$0xe] }
  0x75   : > { %6576 = vmatmul.mubr.bf16.gmra.mrb[4].mxu0 %v5683_v45  ;;  %v564_v6 = vrot.slane %v563_v51, 4  ;;  %v2973_v63 = vrot.slane %v7490_v28, 5  ;;  %v581_v41 = vshrl.u32 %v7712_v31, 16  ;;  %v584_v1 = vshll.u32 %v7712_v31, 16  ;;  %v7091_v45 = vld [vmem:[%s9141_s1 + $0x1b0] sm:$0xff]  }
  0x76   : > { %6352 = vmatmul.mubr.bf16.gmra.mrb[20].mxu1 %v5379_v57  ;;  %v574_v7 = vrot.slane %v573_v58, 4  ;;  %v2971_v10 = vsel %vm7610_vm5, %v5652_v55, %v2970_v24  ;;  %v2972_v11 = vrot.slane %v2970_v24, 4  ;;  %v590_v12 = vshll.u32 %v7721_v48, 16  ;;  %6610 = vmatpush3.bf16.msra.mxu0 %v7079_v30 }
  0x77   : > { %v569_v19 = vsel %vm7364_vm2, %v564_v6, %v568_v43  ;;  %v583_v13 = vrot.slane %v581_v41, 4  ;;  %v586_v28 = vrot.slane %v584_v1, 5  ;;  %v594_v8 = vshrl.u32 %v7721_v48, 16  ;;  %6611 = vmatprep.subr.bf16.mxu0 %v7083_v56  ;;  %v263_v43 = vld [vmem:[%s7332_s16 + $0xb0] sm:$0x1] }
  0x78   : > { %v579_v36 = vsel %vm7364_vm2, %v574_v7, %v578_v59  ;;  %v2974_v62 = vsel %vm7610_vm5, %v2972_v11, %v2973_v63  ;;  %v592_v18 = vrot.slane %v590_v12, 5  ;;  %v600_v26 = vshll.u32 %v262_v61, 16  ;;  %v7769_v41 = vld [vmem:[%s7332_s16 + $0xb4] sm:$0xf]  ;;  %v7774_v12 = vld [vmem:[%s7332_s16 + $0xb8] sm:$0xf] }
  0x79   : > { %v5380_v30 = vcombine.low %v569_v19, %v579_v36  ;;  %v5684_v34 = vcombine.low %v2971_v10, %v2974_v62  ;;  %v587_v33 = vor.u32 %v586_v28, %v583_v13  ;;  %v596_v46 = vrot.slane %v594_v8, 4  ;;  %v264_v19 = vld [vmem:[%s7332_s16 + $0xbc] sm:$0x1] }
  0x7a   : > { %v602_v38 = vrot.slane %v600_v26, 5  ;;  %v5653_v39 = vrot.slane %v5637_v15, 9  ;;  %v2977_v23 = vrot.slane %v7517_v14, 5  ;;  %v2980_v42 = vrot.slane %v7523_v22, 5  ;;  %6612 = vmatpush3.bf16.msra.mxu0 %v7083_v56  ;;  %v7095_v13 = vld [vmem:[%s9141_s1 + $0x1b8] sm:$0xff]  }
  0x7b   : > { %6355 = vmatprep.mubr.bf16.mxu1 %v5380_v30  ;;  %6579 = vmatprep.mubr.bf16.mxu0 %v5684_v34  ;;  %v588_v44 = vrot.slane %v587_v33, 4  ;;  %v597_v49 = vor.u32 %v596_v46, %v592_v18  ;;  %v605_v50 = vshrl.u32 %v7746_v27, 16  ;;  %v608_v52 = vshll.u32 %v7746_v27, 16  ;;  %v5639_v30 = vld [vmem:[%s7332_s16 + $0x60] sm:$0xe] }
  0x7c   : > { %v2978_v14 = vsel %vm7610_vm5, %v5653_v39, %v2977_v23  ;;  %v2979_v22 = vrot.slane %v2977_v23, 4  ;;  %v614_v51 = vshll.u32 %v7749_v29, 16  ;;  %v618_v55 = vshrl.u32 %v7749_v29, 16  ;;  %6613 = vmatprep.subr.bf16.mxu0 %v7087_v32  ;;  %v5569_v39 = vld [vmem:[%s7332_s16 + $0x70] sm:$0xf] }
  0x7d   : > { %v593_v56 = vsel %vm7364_vm2, %v588_v44, %v592_v18  ;;  %v598_v57 = vrot.slane %v597_v49, 4  ;;  %v607_v58 = vrot.slane %v605_v50, 4  ;;  %v610_v59 = vrot.slane %v608_v52, 5  ;;  %v7796_v44 = vld [vmem:[%s9141_s1 + $0x1c0] sm:$0xff]  }
  0x7e   : > { %v2981_v24 = vsel %vm7610_vm5, %v2979_v22, %v2980_v42  ;;  %v616_v61 = vrot.slane %v614_v51, 5  ;;  %v620_v6 = vrot.slane %v618_v55, 4  ;;  %v624_v63 = vshll.u32 %v263_v43, 16  ;;  %6614 = vmatpush3.bf16.msra.mxu0 %v7087_v32  ;;  %v5640_v43 = vld [vmem:[%s7332_s16 + $0x6c] sm:$0xe] }
  0x7f   : > { %v603_v1 = vsel %vm7364_vm2, %v598_v57, %v602_v38  ;;  %v5685_v7 = vcombine.low %v2978_v14, %v2981_v24  ;;  %v611_v10 = vor.u32 %v610_v59, %v607_v58  ;;  %v5654_v11 = vrot.slane %v5638_v53, 9  ;;  %6615 = vmatprep.subr.bf16.mxu0 %v7091_v45  ;;  %v5570_v55 = vld [vmem:[%s7332_s16 + $0x74] sm:$0x1]  ;;  %v5641_v24 = vld [vmem:[%s7332_s16 + $0x78] sm:$0xe] }
  0x80   : > { %v5381_v28 = vcombine.low %v593_v56, %v603_v1  ;;  %v621_v8 = vor.u32 %v620_v6, %v616_v61  ;;  %v626_v15 = vrot.slane %v624_v63, 5  ;;  %v2984_v32 = vrot.slane %v7548_v0, 5 }
  0x81   : > { %6580 = vmatmul.mubr.bf16.gmra.mrb[8].mxu0 %v5685_v7  ;;  %v612_v36 = vrot.slane %v611_v10, 4  ;;  %v2987_v62 = vrot.slane %v7560_v20, 5  ;;  %v629_v18 = vshrl.u32 %v7769_v41, 16  ;;  %v632_v26 = vshll.u32 %v7769_v41, 16 }
  0x82   : > { %6356 = vmatmul.mubr.bf16.gmra.mrb[24].mxu1 %v5381_v28  ;;  %v622_v34 = vrot.slane %v621_v8, 4  ;;  %v2985_v33 = vsel %vm7610_vm5, %v5654_v11, %v2984_v32  ;;  %v2986_v46 = vrot.slane %v2984_v32, 4  ;;  %v638_v38 = vshll.u32 %v7774_v12, 16  ;;  %6616 = vmatpush3.bf16.msra.mxu0 %v7091_v45  ;;  %v7809_v11 = vld [vmem:[%s7332_s16 + $0x7c] sm:$0xf] }
  0x83   : > { %v617_v0 = vsel %vm7364_vm2, %v612_v36, %v616_v61  ;;  %v631_v20 = vrot.slane %v629_v18, 4  ;;  %v634_v23 = vrot.slane %v632_v26, 5  ;;  %v642_v42 = vshrl.u32 %v7774_v12, 16  ;;  %6617 = vmatprep.subr.bf16.mxu0 %v7095_v13  ;;  %v7164_v36 = vld [vmem:[%s7332_s16] sm:$0xf] }
  0x84   : > { %v627_v49 = vsel %vm7364_vm2, %v622_v34, %v626_v15  ;;  %v2988_v50 = vsel %vm7610_vm5, %v2986_v46, %v2987_v62  ;;  %v640_v52 = vrot.slane %v638_v38, 5  ;;  %v648_v53 = vshll.u32 %v264_v19, 16  ;;  %v5575_v15 = vld [vmem:[%s7332_s16 + $0x88] sm:$0xf]  ;;  %v7824_v62 = vld [vmem:[%s7332_s16 + $0x4] sm:$0xf] }
  0x85   : > { %v5382_v45 = vcombine.low %v617_v0, %v627_v49  ;;  %v5686_v14 = vcombine.low %v2985_v33, %v2988_v50  ;;  %v635_v22 = vor.u32 %v634_v23, %v631_v20  ;;  %v644_v51 = vrot.slane %v642_v42, 4  ;;  %v5576_v26 = vld [vmem:[%s7332_s16 + $0x8c] sm:$0x1]  ;;  %v5579_v23 = vld [vmem:[%s7332_s16 + $0x98] sm:$0x1] }
  0x86   : > { %v650_v56 = vrot.slane %v648_v53, 5  ;;  %v5655_v57 = vrot.slane %v5639_v30, 9  ;;  %v2991_v58 = vrot.slane %v7575_v60, 5  ;;  %v2994_v59 = vrot.slane %v7584_v17, 5  ;;  %6618 = vmatpush3.bf16.msra.mxu0 %v7095_v13  ;;  %v7812_v17 = vld [vmem:[%s7332_s16 + $0x80] sm:$0x1] }
  0x87   : > { %6359 = vmatprep.mubr.bf16.mxu1 %v5382_v45  ;;  %6583 = vmatprep.mubr.bf16.mxu0 %v5686_v14  ;;  %v636_v61 = vrot.slane %v635_v22, 4  ;;  %v645_v6 = vor.u32 %v644_v51, %v640_v52  ;;  %v5656_v63 = vrot.slane %v5640_v43, 9  ;;  %v2998_v1 = vrot.slane %v5569_v39, 5  ;;  %v5642_v30 = vld [vmem:[%s7332_s16 + $0x84] sm:$0xe] }
  0x88   : > { %v2992_v7 = vsel %vm7610_vm5, %v5655_v57, %v2991_v58  ;;  %v2993_v10 = vrot.slane %v2991_v58, 4  ;;  %v3001_v60 = vrot.slane %v5570_v55, 5  ;;  %6651 = vmatprep.subr.bf16.mxu0 %v7796_v44  ;;  %v5392_v18 = vcombine.low %v7164_v36, %v7824_v62  ;;  %v5578_v39 = vld [vmem:[%s7332_s16 + $0x94] sm:$0xf]  ;;  %v5643_v42 = vld [vmem:[%s7332_s16 + $0x90] sm:$0xe] }
  0x89   : > { %v641_v19 = vsel %vm7364_vm2, %v636_v61, %v640_v52  ;;  %v646_v13 = vrot.slane %v645_v6, 4  ;;  %v2999_v28 = vsel %vm7610_vm5, %v5656_v63, %v2998_v1  ;;  %v3000_v8 = vrot.slane %v2998_v1, 4  ;;  %v5644_v50 = vld [vmem:[%s7332_s16 + $0x9c] sm:$0xe]  ;;  %v5581_v14 = vld [vmem:[%s7332_s16 + $0xa0] sm:$0xf] }
  0x8a   : > { %v2995_v32 = vsel %vm7610_vm5, %v2993_v10, %v2994_v59  ;;  %v5657_v38 = vrot.slane %v5641_v24, 9  ;;  %v3005_v43 = vrot.slane %v7809_v11, 5  ;;  %v3008_v49 = vrot.slane %v7812_v17, 5  ;;  %v5582_v22 = vld [vmem:[%s7332_s16 + $0xa4] sm:$0x1] }
  0x8b   : > { %v651_v34 = vsel %vm7364_vm2, %v646_v13, %v650_v56  ;;  %v5687_v33 = vcombine.low %v2992_v7, %v2995_v32  ;;  %v3002_v46 = vsel %vm7610_vm5, %v3000_v8, %v3001_v60  ;;  %v5658_v52 = vrot.slane %v5642_v30, 9  ;;  %v5584_v59 = vld [vmem:[%s7332_s16 + $0xac] sm:$0xf]  ;;  %v7848_v61 = vld [vmem:[%s7332_s16 + $0x10] sm:$0xf] }
  0x8c   : > { %v5383_v0 = vcombine.low %v641_v19, %v651_v34  ;;  %v5688_v20 = vcombine.low %v2999_v28, %v3002_v46  ;;  %v3012_v53 = vrot.slane %v5575_v15, 5  ;;  %v3015_v45 = vrot.slane %v5576_v26, 5  ;;  %v7166_v24 = vld [vmem:[%s7332_s16 + $0xc] sm:$0xf]  ;;  %v7168_v8 = vld [vmem:[%s7332_s16 + $0x18] sm:$0xf] }
  0x8d   : > { %6584 = vmatmul.mubr.bf16.gmra.mrb[12].mxu0 %v5687_v33  ;;  %v3006_v51 = vsel %vm7610_vm5, %v5657_v38, %v3005_v43  ;;  %v3007_v55 = vrot.slane %v3005_v43, 4  ;;  %v3019_v58 = vrot.slane %v5578_v39, 5  ;;  %v5393_v6 = vcombine.low %v7166_v24, %v7848_v61  ;;  %v7086_v19 = vld [vmem:[%s9141_s1 + $0x88] sm:$0xff]   ;;  %v7860_v15 = vld [vmem:[%s7332_s16 + $0x1c] sm:$0xf] }
  0x8e   : > { %6360 = vmatmul.mubr.bf16.gmra.mrb[28].mxu1 %v5383_v0  ;;  %6587 = vmatprep.mubr.bf16.mxu0 %v5688_v20  ;;  %v3013_v56 = vsel %vm7610_vm5, %v5658_v52, %v3012_v53  ;;  %v3014_v57 = vrot.slane %v3012_v53, 4  ;;  %v5659_v1 = vrot.slane %v5643_v42, 9  ;;  %v3022_v7 = vrot.slane %v5579_v23, 5  ;;  %v5585_v30 = vld [vmem:[%s7332_s16 + $0xb0] sm:$0x1] }
  0x8f   : > { %6379 = vmatprep.mubr.bf16.mxu1 %v5392_v18  ;;  %v3009_v63 = vsel %vm7610_vm5, %v3007_v55, %v3008_v49  ;;  %v3021_v13 = vrot.slane %v3019_v58, 4  ;;  %v5660_v28 = vrot.slane %v5644_v50, 9  ;;  %v5394_v32 = vcombine.low %v7168_v8, %v7860_v15  ;;  %v5645_v34 = vld [vmem:[%s7332_s16 + $0xa8] sm:$0xe]  ;;  %v5587_v33 = vld [vmem:[%s7332_s16 + $0xb8] sm:$0xf] }
  0x90   : > { %v5689_v10 = vcombine.low %v3006_v51, %v3009_v63  ;;  %v3016_v60 = vsel %vm7610_vm5, %v3014_v57, %v3015_v45  ;;  %v3026_v18 = vrot.slane %v5581_v14, 5  ;;  %v3029_v26 = vrot.slane %v5582_v22, 5  ;;  %v5588_v20 = vld [vmem:[%s7332_s16 + $0xbc] sm:$0x1]  ;;  %v5646_v23 = vld [vmem:[%s7332_s16 + $0xb4] sm:$0xe] }
  0x91   : > { %v5690_v36 = vcombine.low %v3013_v56, %v3016_v60  ;;  %v3033_v38 = vrot.slane %v5584_v59, 5  ;;  %v3020_v39 = vsel %vm7610_vm5, %v5659_v1, %v3019_v58  ;;  %v3023_v0 = vsel %vm7610_vm5, %v3021_v13, %v3022_v7  ;;  %v7090_v50 = vld [vmem:[%s9141_s1 + $0x90] sm:$0xff]   ;;  %v5590_v53 = vld [vmem:[%s7332_s16 + $0xc4] sm:$0xf]  ;;  %v7883_v51 = vld [vmem:[%s7332_s16 + $0x28] sm:$0xf] }
  0x92   : > { %v3028_v46 = vrot.slane %v3026_v18, 4  ;;  %v3027_v42 = vsel %vm7610_vm5, %v5660_v28, %v3026_v18  ;;  %v3040_v49 = vrot.slane %v5587_v33, 5  ;;  %v5661_v52 = vrot.slane %v5645_v34, 9  ;;  %v7170_v22 = vld [vmem:[%s7332_s16 + $0x24] sm:$0xf]  ;;  %v7094_v1 = vld [vmem:[%s9141_s1 + $0x98] sm:$0xff]  }
  0x93   : > { %v5691_v45 = vcombine.low %v3020_v39, %v3023_v0  ;;  %v3035_v14 = vrot.slane %v3033_v38, 4  ;;  %v5395_v55 = vcombine.low %v7170_v22, %v7883_v51  ;;  %v7172_v57 = vld [vmem:[%s7332_s16 + $0x30] sm:$0xf]  ;;  %v7888_v58 = vld [vmem:[%s7332_s16 + $0x34] sm:$0xf]  ;;  %v5662_v24 = vrot.slane %v5646_v23, 9 }
  0x94   : > { %v3030_v43 = vsel %vm7610_vm5, %v3028_v46, %v3029_v26  ;;  %v5396_v59 = vcombine.low %v7172_v57, %v7888_v58  ;;  %v3043_v63 = vrot.slane %v5588_v20, 5  ;;  %v5647_v7 = vld [vmem:[%s7332_s16 + $0xc0] sm:$0xe]  ;;  %v3034_v60 = vsel %vm7610_vm5, %v5661_v52, %v3033_v38  ;;  %v5591_v8 = vld [vmem:[%s7332_s16 + $0xc8] sm:$0x1]  ;;  %v7097_v22 = vld [vmem:[%s7332_s16 + $0x18] sm:$0xff]  }
  0x95   : > { %6588 = vmatmul.mubr.bf16.gmra.mrb[16].mxu0 %v5689_v10  ;;  %v5692_v56 = vcombine.low %v3027_v42, %v3030_v43  ;;  %v3047_v10 = vrot.slane %v5590_v53, 5  ;;  %v3041_v13 = vsel %vm7610_vm5, %v5662_v24, %v3040_v49  ;;  %v5663_v18 = vrot.slane %v5647_v7, 9  ;;  %v7174_v26 = vld [vmem:[%s7332_s16 + $0x3c] sm:$0xf]  ;;  %v7176_v39 = vld [vmem:[%s7332_s16 + $0x48] sm:$0xf] }
  0x96   : > { %6380 = vmatmul.mubr.bf16.vlgmr.msra.gmra.mrb[0].mxu1 %v5393_v6  ;;  %6591 = vmatprep.mubr.bf16.mxu0 %v5690_v36  ;;  %v3042_v6 = vrot.slane %v3040_v49, 4  ;;  %v3050_v38 = vrot.slane %v5591_v8, 5  ;;  %v7914_v0 = vld [vmem:[%s7332_s16 + $0x4c] sm:$0xf]  ;;  %v7111_v49 = vld [vmem:[%s9141_s1 + $0xb0] sm:$0xff]   ;;  %v2400_v52 = vshrl.u32 %v7809_v11, 16 }
  0x97   : > { %6412 = vmatpush3.bf16.msra.mxu1 %v7534_v4  ;;  %6383 = vmatprep.mubr.bf16.mxu1 %v5394_v32  ;;  %v3036_v4 = vrot.slane %v5585_v30, 5  ;;  %v7099_v32 = vld [vmem:[%s9141_s1 + $0xa0] sm:$0xff]   ;;  %v3049_v46 = vrot.slane %v3047_v10, 4  ;;  %v5398_v20 = vcombine.low %v7176_v39, %v7914_v0  ;;  %v7105_v23 = vld [vmem:[%s9141_s1 + $0xa8] sm:$0xff]   ;;  %v3048_v42 = vsel %vm7610_vm5, %v5663_v18, %v3047_v10  ;;  %v7103_v18 = vld [vmem:[%s7332_s16 + $0x30] sm:$0xff]  }
  0x98   : > { %6413 = vmatprep.subr.bf16.mxu1 %v7086_v19  ;;  %v3044_v28 = vsel %vm7610_vm5, %v3042_v6, %v3043_v63  ;;  %v7909_v30 = vld [vmem:[%s7332_s16 + $0x40] sm:$0xf]  ;;  %v7942_v57 = vrot.slane %v2400_v52, 4  ;;  %v7100_v6 = vld [vmem:[%s7332_s16 + $0x24] sm:$0xff]   ;;  %v1307_v7 = vrot.slane %v7848_v61, 5  ;;  %v2406_v8 = vshll.u32 %v7812_v17, 16 }
  0x99   : > { %v5397_v34 = vcombine.low %v7174_v26, %v7909_v30  ;;  %v5694_v33 = vcombine.low %v3041_v13, %v3044_v28  ;;  %v3051_v43 = vsel %vm7610_vm5, %v3049_v46, %v3050_v38  ;;  %v1247_v63 = vld [vmem:[%s7332_s16] sm:$0xe]  ;;  %v1248_v10 = vld [vmem:[%s7332_s16 + $0xc] sm:$0xe]  ;;  %v1314_v13 = vrot.slane %v7860_v15, 5 }
  0x9a   : > { %v5695_v53 = vcombine.low %v3048_v42, %v3051_v43  ;;  %v1250_v61 = vld [vmem:[%s7332_s16 + $0x24] sm:$0xe]  ;;  %v5403_v15 = vcombine.low %v7662_v16, %v7670_v40  ;;  %v5404_v26 = vcombine.low %v7691_v2, %v7694_v3  ;;  %v5416_v17 = vrot.slane %v1247_v63, 9  ;;  %v7182_v38 = vld [vmem:[%s7332_s16 + $0x20] sm:$0x1]  ;;  %v7112_v2 = vld [vmem:[%s7332_s16 + $0x54] sm:$0xff]  }
  0x9b   : > { %6414 = vmatpush3.bf16.msra.mxu1 %v7086_v19  ;;  %v3037_v19 = vsel %vm7610_vm5, %v3035_v14, %v3036_v4  ;;  %v7931_v14 = vld [vmem:[%s7332_s16 + $0x58] sm:$0xf]  ;;  %v1316_v46 = vrot.slane %v1314_v13, 4  ;;  %v1317_v39 = vrot.slane %v7182_v38, 5  ;;  %v7183_v43 = vld [vmem:[%s7332_s16 + $0x2c] sm:$0x1] }
  0x9c   : > { %6415 = vmatprep.subr.bf16.mxu1 %v7090_v50  ;;  %v5693_v36 = vcombine.low %v3034_v60, %v3037_v19  ;;  %v7957_v60 = vld [vmem:[%s9141_s1 + $0xc0] sm:$0xff]   ;;  %v1249_v19 = vld [vmem:[%s7332_s16 + $0x18] sm:$0xe]  ;;  %v7186_v38 = vld [vmem:[%s7332_s16 + $0x50] sm:$0x1]  ;;  %v1349_v16 = vrot.slane %v7931_v14, 5 }
  0x9d   : > { %6592 = vmatmul.mubr.bf16.gmra.mrb[20].mxu0 %v5691_v45  ;;  %v7178_v45 = vld [vmem:[%s7332_s16 + $0x54] sm:$0xf]  ;;  %v8080_v40 = vld [vmem:[%s7332_s16 + $0x64] sm:$0xf] }
  0x9e   : > { %6384 = vmatmul.mubr.bf16.gmra.mrb[4].mxu1 %v5395_v55  ;;  %6595 = vmatprep.mubr.bf16.mxu0 %v5692_v56  ;;  %v5399_v4 = vcombine.low %v7178_v45, %v7931_v14  ;;  %v5400_v55 = vcombine.low %v7588_v25, %v7591_v35  ;;  %v7117_v56 = vld [vmem:[%s9141_s1 + $0xb8] sm:$0xff]   ;;  %v7181_v25 = vld [vmem:[%s7332_s16 + $0x14] sm:$0x1]  ;;  %v7115_v3 = vld [vmem:[%s7332_s16 + $0x60] sm:$0xff]  }
  0x9f   : > { %6387 = vmatprep.mubr.bf16.mxu1 %v5396_v59  ;;  %6416 = vmatpush3.bf16.msra.mxu1 %v7090_v50  ;;  %v2396_v50 = vshll.u32 %v7809_v11, 16  ;;  %v7945_v59 = vld [vmem:[%s7332_s16 + $0x8] sm:$0x1]  ;;  %v1310_v35 = vrot.slane %v7181_v25, 5 }
  0xa0   : > { %6417 = vmatprep.subr.bf16.mxu1 %v7094_v1  ;;  %v1303_v24 = vrot.slane %v7945_v59, 5 }
  0xa1   : > { %v7940_v11 = vrot.slane %v2396_v50, 5 }
  0xa3   : > { %6418 = vmatpush3.bf16.msra.mxu1 %v7094_v1  ;;  %v1300_v1 = vrot.slane %v7824_v62, 5  ;;  %v5401_v62 = vcombine.low %v7606_v5, %v7618_v21  ;;  %v5417_v21 = vrot.slane %v1248_v10, 9  ;;  %v5776_v10 = vld [vmem:[%s7332_s16 + $0x18] sm:$0xf] }
  0xa4   : > { %6419 = vmatprep.subr.bf16.mxu1 %v7099_v32 }
  0xa5   : > { %6596 = vmatmul.mubr.bf16.gmra.mrb[24].mxu0 %v5693_v36  ;;  %v5402_v36 = vcombine.low %v7629_v47, %v7640_v54  ;;  %v1302_v5 = vrot.slane %v1300_v1, 4  ;;  %v7107_v47 = vld [vmem:[%s9141_s1 + $0x1c8] sm:$0xff]   ;;  %v5418_v54 = vrot.slane %v1249_v19, 9  ;;  %v8000_v59 = vsel %vm7610_vm5, %v5416_v17, %v1300_v1  ;;  %v5777_v19 = vld [vmem:[%s7332_s16 + $0x1c] sm:$0xf] }
  0xa6   : > { %6388 = vmatmul.mubr.bf16.gmra.mrb[8].mxu1 %v5397_v34  ;;  %6599 = vmatprep.mubr.bf16.mxu0 %v5694_v33  ;;  %v1328_v34 = vrot.slane %v7888_v58, 5  ;;  %v1309_v33 = vrot.slane %v1307_v7, 4  ;;  %v5419_v58 = vrot.slane %v1250_v61, 9  ;;  %v1342_v1 = vrot.slane %v7914_v0, 5  ;;  %v7109_v0 = vld [vmem:[%s7332_s16 + $0x48] sm:$0xff]  }
  0xa7   : > { %6391 = vmatprep.mubr.bf16.mxu1 %v5398_v20  ;;  %6420 = vmatpush3.bf16.msra.mxu1 %v7099_v32  ;;  %v1321_v32 = vrot.slane %v7883_v51, 5  ;;  %v1251_v51 = vld [vmem:[%s7332_s16 + $0x30] sm:$0xe]  ;;  %v5405_v20 = vcombine.low %v7712_v31, %v7721_v48  ;;  %v8008_v25 = vsel %vm7610_vm5, %v1302_v5, %v1303_v24  ;;  %v8016_v63 = vsel %vm7610_vm5, %v5418_v54, %v1314_v13  ;;  %v1253_v13 = vld [vmem:[%s7332_s16 + $0x48] sm:$0xe] }
  0xa8   : > { %6421 = vmatprep.subr.bf16.mxu1 %v7105_v23  ;;  %v5420_v50 = vrot.slane %v1251_v51, 9  ;;  %v1330_v52 = vrot.slane %v1328_v34, 4  ;;  %v3813_v5 = vshrl.u32 %v5776_v10, 16  ;;  %v3826_v51 = vshrl.u32 %v5777_v19, 16  ;;  %v7118_v48 = vld [vmem:[%s7332_s16 + $0x6c] sm:$0xff]  }
  0xa9   : > { %v1323_v42 = vrot.slane %v1321_v32, 4  ;;  %v8028_v24 = vsel %vm7610_vm5, %v5419_v58, %v1321_v32  ;;  %v7185_v32 = vld [vmem:[%s7332_s16 + $0x44] sm:$0x1]  ;;  %v5422_v54 = vrot.slane %v1253_v13, 9  ;;  %v5780_v13 = vld [vmem:[%s7332_s16 + $0x28] sm:$0xf] }
  0xaa   : > { %v8038_v61 = vsel %vm7610_vm5, %v5420_v50, %v1328_v34  ;;  %v1338_v17 = vrot.slane %v7185_v32, 5  ;;  %v5778_v50 = vld [vmem:[%s7332_s16 + $0x20] sm:$0x1]  ;;  %v1255_v32 = vld [vmem:[%s7332_s16 + $0x60] sm:$0xe] }
  0xab   : > { %6422 = vmatpush3.bf16.msra.mxu1 %v7105_v23  ;;  %v5406_v23 = vcombine.low %v7746_v27, %v7749_v29 }
  0xac   : > { %6423 = vmatprep.subr.bf16.mxu1 %v7111_v49 }
  0xad   : > { %6600 = vmatmul.mubr.bf16.gmra.mrb[28].mxu0 %v5695_v53  ;;  %v7184_v53 = vld [vmem:[%s7332_s16 + $0x38] sm:$0x1] }
  0xae   : > { %6392 = vmatmul.mubr.bf16.gmra.mrb[12].mxu1 %v5399_v4  ;;  %6619 = vmatprep.mubr.bf16.mxu0 %v7097_v22  ;;  %v1331_v45 = vrot.slane %v7184_v53, 5  ;;  %v1252_v4 = vld [vmem:[%s7332_s16 + $0x3c] sm:$0xe]  ;;  %v1335_v22 = vrot.slane %v7909_v30, 5  ;;  %v8004_v30 = vsel %vm7610_vm5, %v5417_v21, %v1307_v7  ;;  %v3816_v21 = vshll.u32 %v5776_v10, 16  ;;  %v7123_v53 = vld [vmem:[%s9141_s1 + $0x1e0] sm:$0xff]  }
  0xaf   : > { %6395 = vmatprep.mubr.bf16.mxu1 %v5400_v55  ;;  %6424 = vmatpush3.bf16.msra.mxu1 %v7111_v49  ;;  %v1324_v49 = vrot.slane %v7183_v43, 5  ;;  %v7991_v55 = vrot.slane %v2406_v8, 5  ;;  %v7106_v7 = vld [vmem:[%s7332_s16 + $0x3c] sm:$0xff]   ;;  %v8024_v8 = vsel %vm7610_vm5, %v1316_v46, %v1317_v39  ;;  %v1344_v46 = vrot.slane %v1342_v1, 4  ;;  %v5782_v43 = vld [vmem:[%s7332_s16 + $0x30] sm:$0xf] }
  0xb0   : > { %6425 = vmatprep.subr.bf16.mxu1 %v7117_v56  ;;  %v1345_v39 = vrot.slane %v7186_v38, 5  ;;  %v3815_v10 = vrot.slane %v3813_v5, 4 }
  0xb1   : > { %9162 = vst [vmem:[#allocation2_spill] sm:$0xff] %v7991_v55 }
  0xb3   : > { %6426 = vmatpush3.bf16.msra.mxu1 %v7117_v56  ;;  %v7113_v56 = vld [vmem:[%s9141_s1 + $0x1d0] sm:$0xff]  }
  0xb4   : > { %6459 = vmatprep.subr.bf16.mxu1 %v7957_v60 }
  0xb5   : > { %6620 = vmatmul.mubr.bf16.vlgmr.msra.gmra.mrb[0].mxu0 %v7100_v6  ;;  %v8012_v6 = vsel %vm7610_vm5, %v1309_v33, %v1310_v35  ;;  %v8032_v35 = vsel %vm7610_vm5, %v1323_v42, %v1324_v49  ;;  %v3822_v33 = vshll.u32 %v5777_v19, 16  ;;  %v3818_v19 = vrot.slane %v3816_v21, 5  ;;  %v1256_v21 = vld [vmem:[%s7332_s16 + $0x6c] sm:$0xe] }
  0xb6   : > { %6396 = vmatmul.mubr.bf16.gmra.mrb[16].mxu1 %v5401_v62  ;;  %6652 = vmatpush3.bf16.msra.mxu0 %v7796_v44  ;;  %v5421_v62 = vrot.slane %v1252_v4, 9  ;;  %v5425_v58 = vrot.slane %v1256_v21, 9 }
  0xb7   : > { %6399 = vmatprep.mubr.bf16.mxu1 %v5402_v36  ;;  %6623 = vmatprep.mubr.bf16.mxu0 %v7103_v18  ;;  %v8042_v36 = vsel %vm7610_vm5, %v1330_v52, %v1331_v45  ;;  %v1337_v18 = vrot.slane %v1335_v22, 4  ;;  %v5779_v52 = vld [vmem:[%s7332_s16 + $0x24] sm:$0xf]  ;;  %v3850_v45 = vshrl.u32 %v5780_v13, 16 }
  0xb8   : > { %6653 = vmatprep.subr.bf16.mxu0 %v7107_v47  ;;  %v8059_v49 = vsel %vm7610_vm5, %v5421_v62, %v1335_v22  ;;  %v8076_v22 = vld [vmem:[%s7332_s16 + $0x54] sm:$0xe]  ;;  %v3828_v62 = vrot.slane %v3826_v51, 4  ;;  %v3837_v38 = vshrl.u32 %v5779_v52, 16  ;;  %v3840_v28 = vshll.u32 %v5779_v52, 16 }
  0xb9   : > { %v8073_v4 = vsel %vm7610_vm5, %v1337_v18, %v1338_v17  ;;  %v3832_v17 = vshll.u32 %v5778_v50, 16  ;;  %v5423_v5 = vrot.slane %v8076_v22, 9  ;;  %v7127_v50 = vld [vmem:[%s9141_s1 + $0x1e8] sm:$0xff]   ;;  %v1351_v52 = vrot.slane %v1349_v16, 4 }
  0xba   : > { %6654 = vmatpush3.bf16.msra.mxu0 %v7107_v47  ;;  %v7119_v47 = vld [vmem:[%s9141_s1 + $0x1d8] sm:$0xff]   ;;  %v3819_v22 = vor.u32 %v3818_v19, %v3815_v10  ;;  %v3839_v34 = vrot.slane %v3837_v38, 4  ;;  %v3842_v44 = vrot.slane %v3840_v28, 5  ;;  %v7191_v10 = vld [vmem:[%s7332_s16 + $0x74] sm:$0x1]  ;;  %v3852_v28 = vrot.slane %v3850_v45, 4 }
  0xbb   : > { %6655 = vmatprep.subr.bf16.mxu0 %v7113_v56  ;;  %v8114_v42 = vrot.slane %v3832_v17, 5  ;;  %v1366_v19 = vrot.slane %v7191_v10, 5  ;;  %v3861_v38 = vshrl.u32 %v5782_v43, 16  ;;  %v8139_v27 = vsel %vm7610_vm5, %v5423_v5, %v1349_v16 }
  0xbc   : > { %v3820_v21 = vrot.slane %v3819_v22, 4 }
  0xbd   : > { %6624 = vmatmul.mubr.bf16.gmra.mrb[4].mxu0 %v7106_v7  ;;  %v8086_v7 = vrot.slane %v3822_v33, 5  ;;  %v7189_v33 = vld [vmem:[%s7332_s16 + $0x70] sm:$0xf] }
  0xbe   : > { %6400 = vmatmul.mubr.bf16.gmra.mrb[20].mxu1 %v5403_v15  ;;  %6627 = vmatprep.mubr.bf16.mxu0 %v7109_v0  ;;  %v1356_v15 = vrot.slane %v8080_v40, 5  ;;  %v7188_v0 = vld [vmem:[%s7332_s16 + $0x5c] sm:$0x1]  ;;  %v1363_v51 = vrot.slane %v7189_v33, 5 }
  0xbf   : > { %6403 = vmatprep.mubr.bf16.mxu1 %v5404_v26  ;;  %6656 = vmatpush3.bf16.msra.mxu0 %v7113_v56  ;;  %v1352_v18 = vrot.slane %v7188_v0, 5  ;;  %v8095_v26 = vsel %vm7610_vm5, %v5422_v54, %v1342_v1  ;;  %v8099_v56 = vsel %vm7610_vm5, %v1344_v46, %v1345_v39  ;;  %v7190_v1 = vld [vmem:[%s7332_s16 + $0x68] sm:$0x1]  ;;  %v3846_v0 = vshll.u32 %v5780_v13, 16  ;;  %v7135_v40 = vld [vmem:[%s9141_s1 + $0x1f8] sm:$0xff]  }
  0xc0   : > { %6657 = vmatprep.subr.bf16.mxu0 %v7119_v47  ;;  %v1359_v54 = vrot.slane %v7190_v1, 5  ;;  %v5424_v46 = vrot.slane %v1255_v32, 9  ;;  %v1358_v39 = vrot.slane %v1356_v15, 4  ;;  %v3829_v33 = vor.u32 %v3828_v62, %v8086_v7  ;;  %v5783_v1 = vld [vmem:[%s7332_s16 + $0x34] sm:$0xf] }
  0xc1   : > { %v1365_v32 = vrot.slane %v1363_v51, 4  ;;  %v5781_v62 = vld [vmem:[%s7332_s16 + $0x2c] sm:$0x1]  ;;  %v8126_v17 = vrot.slane %v3846_v0, 5  ;;  %v3870_v13 = vshll.u32 %v5783_v1, 16  ;;  %v3874_v31 = vshrl.u32 %v5783_v1, 16 }
  0xc2   : > { %v3830_v10 = vrot.slane %v3829_v33, 4  ;;  %v8143_v29 = vsel %vm7610_vm5, %v1351_v52, %v1352_v18  ;;  %v8150_v45 = vsel %vm7610_vm5, %v5424_v46, %v1356_v15  ;;  %v8154_v14 = vsel %vm7610_vm5, %v1358_v39, %v1359_v54  ;;  %v1257_v18 = vld [vmem:[%s7332_s16 + $0x78] sm:$0xe] }
  0xc3   : > { %6658 = vmatpush3.bf16.msra.mxu0 %v7119_v47  ;;  %v8158_v16 = vsel %vm7610_vm5, %v5425_v58, %v1363_v51  ;;  %v8168_v15 = vsel %vm7610_vm5, %v1365_v32, %v1366_v19  ;;  %v3853_v5 = vor.u32 %v3852_v28, %v8126_v17  ;;  %v3863_v52 = vrot.slane %v3861_v38, 4  ;;  %v5785_v58 = vld [vmem:[%s7332_s16 + $0x3c] sm:$0xf]  ;;  %v5786_v51 = vld [vmem:[%s7332_s16 + $0x40] sm:$0xf] }
  0xc4   : > { %6659 = vmatprep.subr.bf16.mxu0 %v7123_v53  ;;  %v3825_v0 = vsel %vm7364_vm2, %v3820_v21, %v8086_v7  ;;  %v3835_v46 = vsel %vm7364_vm2, %v3830_v10, %v8114_v42  ;;  %v8179_v39 = vrot.slane %v3870_v13, 5  ;;  %v3876_v22 = vrot.slane %v3874_v31, 4  ;;  %v7193_v19 = vld [vmem:[%s7332_s16 + $0x80] sm:$0x1]  ;;  %v8338_v47 = vld [vmem:[%s7332_s16 + $0x68] sm:$0x1] }
  0xc5   : > { %6628 = vmatmul.mubr.bf16.gmra.mrb[8].mxu0 %v7112_v2  ;;  %v3864_v2 = vshll.u32 %v5782_v43, 16  ;;  %v3856_v43 = vshll.u32 %v5781_v62, 16  ;;  %v5426_v32 = vrot.slane %v1257_v18, 9  ;;  %v1258_v62 = vld [vmem:[%s7332_s16 + $0x84] sm:$0xe]  ;;  %v3885_v28 = vshrl.u32 %v5785_v58, 16 }
  0xc6   : > { %6404 = vmatmul.mubr.bf16.gmra.mrb[24].mxu1 %v5405_v20  ;;  %6631 = vmatprep.mubr.bf16.mxu0 %v7115_v3  ;;  %v7131_v20 = vld [vmem:[%s9141_s1 + $0x1f0] sm:$0xff]   ;;  %v7192_v3 = vld [vmem:[%s7332_s16 + $0x7c] sm:$0xf]  ;;  %v3888_v7 = vshll.u32 %v5785_v58, 16  ;;  %v3894_v38 = vshll.u32 %v5786_v51, 16  ;;  %v9163_v42 = vcombine.low %v7769_v41, %v7774_v12  ;;  %v8190_v13 = vrot.slane %v3853_v5, 4 }
  0xc7   : > { %6407 = vmatprep.mubr.bf16.mxu1 %v5406_v23  ;;  %6660 = vmatpush3.bf16.msra.mxu0 %v7123_v53  ;;  %v3843_v23 = vor.u32 %v3842_v44, %v3839_v34  ;;  %v7120_v53 = vld [vmem:[%s7332_s16 + $0x78] sm:$0xff]   ;;  %v1370_v44 = vrot.slane %v7192_v3, 5  ;;  %v3866_v54 = vrot.slane %v3864_v2, 5  ;;  %v8183_v1 = vrot.slane %v3856_v43, 5  ;;  %v8195_v21 = vld [vmem:[%s9141_s1 + $0x200] sm:$0xff]   ;;  %9171 = vst [vmem:[#allocation5_spill] sm:$0xff] %v8338_v47 }
  0xc8   : > { %6661 = vmatprep.subr.bf16.mxu0 %v7127_v50  ;;  %v5784_v34 = vld [vmem:[%s7332_s16 + $0x38] sm:$0x1]  ;;  %v3898_v2 = vshrl.u32 %v5786_v51, 16  ;;  %v7122_v43 = vld [vmem:[%s7332_s16 + $0x84] sm:$0xff]   ;;  %v3877_v12 = vor.u32 %v3876_v22, %v8179_v39  ;;  %v3890_v58 = vrot.slane %v3888_v7, 5  ;;  %v8217_v51 = vrot.slane %v3894_v38, 5 }
  0xc9   : > { %v8181_v33 = vrot.slane %v3843_v23, 4  ;;  %v1372_v10 = vrot.slane %v1370_v44, 4  ;;  %v3867_v31 = vor.u32 %v3866_v54, %v3863_v52  ;;  %v9164_v23 = vcombine.low %v8000_v59, %v8008_v25  ;;  %v7194_v18 = vld [vmem:[%s7332_s16 + $0x88] sm:$0xf]  ;;  %v5787_v5 = vld [vmem:[%s7332_s16 + $0x44] sm:$0x1] }
  0xca   : > { %v1377_v3 = vrot.slane %v7194_v18, 5  ;;  %v8208_v59 = vcombine.low %v3825_v0, %v3835_v46  ;;  %v5788_v52 = vld [vmem:[%s7332_s16 + $0x48] sm:$0xf]  ;;  %v3887_v54 = vrot.slane %v3885_v28, 4  ;;  %v3900_v22 = vrot.slane %v3898_v2, 4 }
  0xcb   : > { %6662 = vmatpush3.bf16.msra.mxu0 %v7127_v50  ;;  %v1373_v50 = vrot.slane %v7193_v19, 5  ;;  %v7124_v19 = vld [vmem:[%s7332_s16 + $0x90] sm:$0xff]   ;;  %v3849_v0 = vsel %vm7364_vm2, %v8181_v33, %v8126_v17  ;;  %v3868_v46 = vrot.slane %v3867_v31, 4  ;;  %v3859_v28 = vsel %vm7364_vm2, %v8190_v13, %v8183_v1  ;;  %v8239_v33 = vld [vmem:[%s7332_s16 + $0x58] sm:$0xf]  ;;  %v7125_v31 = vld [vmem:[%s9141_s1 + $0xc8] sm:$0xff]  }
  0xcc   : > { %6663 = vmatprep.subr.bf16.mxu0 %v7131_v20  ;;  %v3878_v38 = vrot.slane %v3877_v12, 4  ;;  %v1379_v2 = vrot.slane %v1377_v3, 4  ;;  %v5791_v17 = vld [vmem:[%s7332_s16 + $0x54] sm:$0xf]  ;;  %v3904_v1 = vshll.u32 %v5787_v5, 16  ;;  %v3909_v13 = vshrl.u32 %v5788_v52, 16 }
  0xcd   : > { %6632 = vmatmul.mubr.bf16.gmra.mrb[12].mxu0 %v7118_v48  ;;  %v3880_v48 = vshll.u32 %v5784_v34, 16  ;;  %v8235_v7 = vsel %vm7610_vm5, %v1372_v10, %v1373_v50  ;;  %v3912_v50 = vshll.u32 %v5788_v52, 16  ;;  %v3891_v10 = vor.u32 %v3890_v58, %v3887_v54  ;;  %v7126_v54 = vld [vmem:[%s7332_s16 + $0x9c] sm:$0xff]   ;;  %v7200_v41 = vld [vmem:[%s7332_s16 + $0xac] sm:$0xf] }
  0xce   : > { %6408 = vmatmul.mubr.bf16.gmra.mrb[28].mxu1 %v9163_v42  ;;  %6635 = vmatprep.mubr.bf16.mxu0 %v7120_v53  ;;  %v5427_v53 = vrot.slane %v1258_v62, 9  ;;  %v7195_v42 = vld [vmem:[%s7332_s16 + $0x8c] sm:$0x1]  ;;  %v3942_v5 = vshll.u32 %v8239_v33, 16  ;;  %v9166_v52 = vcombine.low %v8016_v63, %v8024_v8  ;;  %v8275_v63 = vld [vmem:[%s7332_s16 + $0x50] sm:$0x1] }
  0xcf   : > { %6427 = vmatprep.mubr.bf16.mxu1 %v9164_v23  ;;  %6664 = vmatpush3.bf16.msra.mxu0 %v7131_v20  ;;  %v8214_v20 = vsel %vm7610_vm5, %v5426_v32, %v1370_v44  ;;  %v3882_v62 = vrot.slane %v3880_v48, 5  ;;  %v1380_v23 = vrot.slane %v7195_v42, 5  ;;  %v1259_v44 = vld [vmem:[%s7332_s16 + $0x90] sm:$0xe]  ;;  %v8227_v32 = vld [vmem:[%s7332_s16 + $0x4c] sm:$0xf]  ;;  %v3901_v48 = vor.u32 %v3900_v22, %v8217_v51 }
  0xd0   : > { %6665 = vmatprep.subr.bf16.mxu0 %v7135_v40  ;;  %v3918_v12 = vshll.u32 %v8227_v32, 16  ;;  %v3922_v18 = vshrl.u32 %v8227_v32, 16  ;;  %v9165_v42 = vcombine.low %v8004_v30, %v8012_v6  ;;  %v7129_v30 = vld [vmem:[%s9141_s1 + $0xd0] sm:$0xff]   ;;  %v3873_v6 = vsel %vm7364_vm2, %v3868_v46, %v8179_v39  ;;  %v7128_v8 = vld [vmem:[%s7332_s16 + $0xa8] sm:$0xff]   ;;  %v8282_v39 = vld [vmem:[%s7332_s16 + $0x5c] sm:$0x1] }
  0xd1   : > { %v3883_v58 = vsel %vm7364_vm2, %v3878_v38, %v3882_v62  ;;  %v5428_v22 = vrot.slane %v1259_v44, 9  ;;  %v3914_v25 = vrot.slane %v3912_v50, 5  ;;  %9167 = vst [vmem:[#allocation3_spill] sm:$0xff] %v8282_v39  ;;  %v3892_v46 = vrot.slane %v3891_v10, 4 }
  0xd2   : > { %v3902_v62 = vrot.slane %v3901_v48, 4  ;;  %v8284_v38 = vrot.slane %v3918_v12, 5  ;;  %v8286_v34 = vrot.slane %v3942_v5, 5  ;;  %v8291_v50 = vcombine.low %v3849_v0, %v3859_v28  ;;  %v5794_v28 = vld [vmem:[%s7332_s16 + $0x60] sm:$0xf] }
  0xd3   : > { %6666 = vmatpush3.bf16.msra.mxu0 %v7135_v40  ;;  %v8247_v40 = vsel %vm7610_vm5, %v5427_v53, %v1377_v3  ;;  %v3933_v53 = vshrl.u32 %v5791_v17, 16  ;;  %v3936_v3 = vshll.u32 %v5791_v17, 16  ;;  %v7196_v17 = vld [vmem:[%s7332_s16 + $0x94] sm:$0xf]  ;;  %v8295_v48 = vcombine.low %v3873_v6, %v3883_v58 }
  0xd4   : > { %6699 = vmatprep.subr.bf16.mxu0 %v8195_v21  ;;  %v3928_v0 = vshll.u32 %v8275_v63, 16  ;;  %v3897_v6 = vsel %vm7364_vm2, %v3892_v46, %v8217_v51  ;;  %v9170_v46 = vcombine.low %v8038_v61, %v8042_v36 }
  0xd5   : > { %6636 = vmatmul.mubr.bf16.gmra.mrb[16].mxu0 %v7122_v43  ;;  %v3946_v43 = vshrl.u32 %v8239_v33, 16  ;;  %v3935_v44 = vrot.slane %v3933_v53, 4  ;;  %v7197_v53 = vld [vmem:[%s7332_s16 + $0x98] sm:$0x1] }
  0xd6   : > { %6428 = vmatmul.mubr.bf16.vlgmr.msra.gmra.mrb[0].mxu1 %v9165_v42  ;;  %6639 = vmatprep.mubr.bf16.mxu0 %v7124_v19  ;;  %v8278_v19 = vrot.slane %v3904_v1, 5  ;;  %v1384_v42 = vrot.slane %v7196_v17, 5  ;;  %v7198_v17 = vld [vmem:[%s7332_s16 + $0xa0] sm:$0xf]  ;;  %v3930_v36 = vrot.slane %v3928_v0, 5 }
  0xd7   : > { %6460 = vmatpush3.bf16.msra.mxu1 %v7957_v60  ;;  %6431 = vmatprep.mubr.bf16.mxu1 %v9166_v52  ;;  %v8272_v60 = vsel %vm7610_vm5, %v1379_v2, %v1380_v23  ;;  %v3911_v52 = vrot.slane %v3909_v13, 4  ;;  %v3924_v23 = vrot.slane %v3922_v18, 4  ;;  %v3938_v2 = vrot.slane %v3936_v3, 5  ;;  %v7133_v13 = vld [vmem:[%s9141_s1 + $0xd8] sm:$0xff]  }
  0xd8   : > { %6461 = vmatprep.subr.bf16.mxu1 %v7125_v31  ;;  %v3948_v1 = vrot.slane %v3946_v43, 4  ;;  %v1260_v18 = vld [vmem:[%s7332_s16 + $0x9c] sm:$0xe]  ;;  %v1387_v3 = vrot.slane %v7197_v53, 5  ;;  %v8308_v43 = vld [vmem:[%s7332_s16 + $0x64] sm:$0xf] }
  0xd9   : > { %v3915_v5 = vor.u32 %v3914_v25, %v3911_v52  ;;  %9168 = vst [vmem:[#allocation4_spill] sm:$0xff] %v8308_v43  ;;  %v3925_v58 = vor.u32 %v3924_v23, %v8284_v38  ;;  %v1391_v12 = vrot.slane %v7198_v17, 5  ;;  %v9169_v25 = vcombine.low %v8028_v24, %v8032_v35  ;;  %v7130_v23 = vld [vmem:[%s7332_s16 + $0xb4] sm:$0xff]   ;;  %v7136_v24 = vld [vmem:[%s9141_s1 + $0xe0] sm:$0xff]   ;;  %v5797_v17 = vld [vmem:[%s7332_s16 + $0x6c] sm:$0xf] }
  0xda   : > { %v1386_v52 = vrot.slane %v1384_v42, 4  ;;  %v3939_v53 = vor.u32 %v3938_v2, %v3935_v44  ;;  %v3949_v51 = vor.u32 %v3948_v1, %v8286_v34  ;;  %v3957_v35 = vshrl.u32 %v5794_v28, 16  ;;  %v7199_v2 = vld [vmem:[%s7332_s16 + $0xa4] sm:$0x1] }
  0xdb   : > { %6462 = vmatpush3.bf16.msra.mxu1 %v7125_v31  ;;  %v8302_v31 = vsel %vm7610_vm5, %v5428_v22, %v1384_v42  ;;  %v3952_v22 = vshll.u32 %v8282_v39, 16  ;;  %v3970_v42 = vshrl.u32 %v8308_v43, 16  ;;  %v3916_v61 = vrot.slane %v3915_v5, 4  ;;  %v8477_v39 = vld [vmem:[%s7332_s16 + $0x98] sm:$0x1] }
  0xdc   : > { %6463 = vmatprep.subr.bf16.mxu1 %v7129_v30  ;;  %v5429_v44 = vrot.slane %v1260_v18, 9  ;;  %v1394_v1 = vrot.slane %v7199_v2, 5  ;;  %v3940_v5 = vrot.slane %v3939_v53, 4  ;;  %v3950_v18 = vrot.slane %v3949_v51, 4  ;;  %9184 = vst [vmem:[#allocation14_spill] sm:$0xff] %v8477_v39 }
  0xdd   : > { %6640 = vmatmul.mubr.bf16.gmra.mrb[20].mxu0 %v7126_v54  ;;  %v3907_v54 = vsel %vm7364_vm2, %v3902_v62, %v8278_v19  ;;  %v3966_v19 = vshll.u32 %v8308_v43, 16  ;;  %v7132_v62 = vld [vmem:[%s7332_s16 + $0xc0] sm:$0xff]   ;;  %v3954_v10 = vrot.slane %v3952_v22, 5  ;;  %v8344_v43 = vsel %vm7610_vm5, %v1386_v52, %v1387_v3 }
  0xde   : > { %6432 = vmatmul.mubr.bf16.gmra.mrb[4].mxu1 %v9169_v25  ;;  %6643 = vmatprep.mubr.bf16.mxu0 %v7128_v8  ;;  %v3960_v8 = vshll.u32 %v5794_v28, 16  ;;  %v3926_v25 = vrot.slane %v3925_v58, 4  ;;  %v1398_v28 = vrot.slane %v7200_v41, 5  ;;  %v8340_v55 = vcombine.low %v3897_v6, %v3907_v54  ;;  %v7138_v41 = vld [vmem:[%s9141_s1 + $0xe8] sm:$0xff]  }
  0xdf   : > { %6435 = vmatprep.mubr.bf16.mxu1 %v9170_v46  ;;  %6464 = vmatpush3.bf16.msra.mxu1 %v7129_v30  ;;  %v1261_v30 = vld [vmem:[%s7332_s16 + $0xa8] sm:$0xe]  ;;  %v1393_v46 = vrot.slane %v1391_v12, 4  ;;  %v3959_v0 = vrot.slane %v3957_v35, 4  ;;  %v8346_v58 = vrot.slane %v3966_v19, 5  ;;  %v3972_v22 = vrot.slane %v3970_v42, 4 }
  0xe0   : > { %6465 = vmatprep.subr.bf16.mxu1 %v7133_v13  ;;  %v3962_v2 = vrot.slane %v3960_v8, 5  ;;  %v3921_v3 = vsel %vm7364_vm2, %v3916_v61, %v8284_v38  ;;  %v8356_v6 = vsel %vm7610_vm5, %v5429_v44, %v1391_v12  ;;  %v3981_v54 = vshrl.u32 %v5797_v17, 16  ;;  %v7201_v38 = vld [vmem:[%s7332_s16 + $0xb0] sm:$0x1]  ;;  %v1262_v19 = vld [vmem:[%s7332_s16 + $0xb4] sm:$0xe] }
  0xe1   : > { %v3984_v52 = vshll.u32 %v5797_v17, 16  ;;  %v3931_v53 = vsel %vm7364_vm2, %v3926_v25, %v3930_v36  ;;  %v8365_v51 = vsel %vm7610_vm5, %v1393_v46, %v1394_v1  ;;  %v5430_v35 = vrot.slane %v1261_v30, 9  ;;  %v8387_v30 = vld [vmem:[%s7332_s16 + $0x74] sm:$0x1]  ;;  %v7202_v25 = vld [vmem:[%s7332_s16 + $0xb8] sm:$0xf] }
  0xe2   : > { %v1401_v8 = vrot.slane %v7201_v38, 5  ;;  %v9173_v12 = vcombine.low %v8059_v49, %v8073_v4  ;;  %v3945_v42 = vsel %vm7364_vm2, %v3940_v5, %v8286_v34  ;;  %v3955_v61 = vsel %vm7364_vm2, %v3950_v18, %v3954_v10  ;;  %v7134_v4 = vld [vmem:[%s7332_s16 + $0xcc] sm:$0xff]   ;;  %9175 = vst [vmem:[#allocation7_spill] sm:$0xff] %v8387_v30  ;;  %v5803_v38 = vld [vmem:[%s7332_s16 + $0x84] sm:$0xf] }
  0xe3   : > { %6466 = vmatpush3.bf16.msra.mxu1 %v7133_v13  ;;  %v8359_v13 = vld [vmem:[%s7332_s16 + $0x70] sm:$0xf]  ;;  %v1400_v36 = vrot.slane %v1398_v28, 4  ;;  %v3976_v44 = vshll.u32 %v8338_v47, 16  ;;  %v9174_v49 = vcombine.low %v8095_v26, %v8099_v56  ;;  %v3973_v1 = vor.u32 %v3972_v22, %v8346_v58  ;;  %v8404_v22 = vld [vmem:[%s7332_s16 + $0x7c] sm:$0xf] }
  0xe4   : > { %6467 = vmatprep.subr.bf16.mxu1 %v7136_v24  ;;  %9172 = vst [vmem:[#allocation6_spill] sm:$0xff] %v8359_v13  ;;  %v3990_v34 = vshll.u32 %v8359_v13, 16  ;;  %v3994_v10 = vshrl.u32 %v8359_v13, 16  ;;  %v5431_v17 = vrot.slane %v1262_v19, 9  ;;  %v1405_v46 = vrot.slane %v7202_v25, 5  ;;  %9176 = vst [vmem:[#allocation8_spill] sm:$0xff] %v8404_v22 }
  0xe5   : > { %6644 = vmatmul.mubr.bf16.gmra.mrb[24].mxu0 %v7130_v23  ;;  %v7140_v23 = vld [vmem:[%s9141_s1 + $0xf0] sm:$0xff]   ;;  %v3983_v26 = vrot.slane %v3981_v54, 4  ;;  %v3986_v56 = vrot.slane %v3984_v52, 5  ;;  %v8395_v18 = vcombine.low %v3921_v3, %v3931_v53  ;;  %v8407_v19 = vcombine.low %v3945_v42, %v3955_v61  ;;  %v7203_v3 = vld [vmem:[%s7332_s16 + $0xbc] sm:$0x1] }
  0xe6   : > { %6436 = vmatmul.mubr.bf16.gmra.mrb[8].mxu1 %v9173_v12  ;;  %6647 = vmatprep.mubr.bf16.mxu0 %v7132_v62  ;;  %v3963_v62 = vor.u32 %v3962_v2, %v3959_v0  ;;  %v8401_v2 = vsel %vm7610_vm5, %v5430_v35, %v1398_v28  ;;  %v8411_v54 = vsel %vm7610_vm5, %v1400_v36, %v1401_v8  ;;  %v8413_v52 = vrot.slane %v3976_v44, 5  ;;  %v7142_v12 = vld [vmem:[%s9141_s1 + $0xf8] sm:$0xff]   ;;  %v8420_v28 = vld [vmem:[%s7332_s16 + $0x88] sm:$0xf] }
  0xe7   : > { %6439 = vmatprep.mubr.bf16.mxu1 %v9174_v49  ;;  %6468 = vmatpush3.bf16.msra.mxu1 %v7136_v24  ;;  %v5800_v24 = vld [vmem:[%s7332_s16 + $0x78] sm:$0xf]  ;;  %v1408_v53 = vrot.slane %v7203_v3, 5  ;;  %9177 = vst [vmem:[#allocation9_spill] sm:$0xff] %v8420_v28  ;;  %v8424_v42 = vrot.slane %v3973_v1, 4  ;;  %v8426_v61 = vrot.slane %v3990_v34, 5  ;;  %v8430_v36 = vsel %vm7610_vm5, %v5431_v17, %v1405_v46 }
  0xe8   : > { %6469 = vmatprep.subr.bf16.mxu1 %v7138_v41  ;;  %v8422_v35 = vrot.slane %v3963_v62, 4  ;;  %v3996_v8 = vrot.slane %v3994_v10, 4  ;;  %v1407_v44 = vrot.slane %v1405_v46, 4  ;;  %v3987_v49 = vor.u32 %v3986_v56, %v3983_v26  ;;  %v5806_v3 = vld [vmem:[%s7332_s16 + $0x90] sm:$0xf] }
  0xe9   : > { %v4000_v25 = vshll.u32 %v8387_v30, 16  ;;  %v4008_v0 = vshll.u32 %v5800_v24, 16  ;;  %v4014_v62 = vshll.u32 %v8404_v22, 16  ;;  %v4018_v1 = vshrl.u32 %v8404_v22, 16  ;;  %v8437_v34 = vld [vmem:[%s7332_s16 + $0x94] sm:$0xf] }
  0xea   : > { %9178 = vst [vmem:[#allocation10_spill] sm:$0xff] %v8437_v34  ;;  %v9179_v10 = vcombine.low %v8139_v27, %v8143_v29  ;;  %v4029_v17 = vshrl.u32 %v5803_v38, 16  ;;  %v4032_v46 = vshll.u32 %v5803_v38, 16  ;;  %v4042_v26 = vshrl.u32 %v8420_v28, 16  ;;  %v5809_v38 = vld [vmem:[%s7332_s16 + $0x9c] sm:$0xf] }
  0xeb   : > { %6470 = vmatpush3.bf16.msra.mxu1 %v7138_v41  ;;  %v4005_v41 = vshrl.u32 %v5800_v24, 16  ;;  %v9180_v56 = vcombine.low %v8150_v45, %v8154_v14  ;;  %v3997_v29 = vor.u32 %v3996_v8, %v8426_v61  ;;  %v4056_v24 = vshll.u32 %v5806_v3, 16  ;;  %v8459_v45 = vld [vmem:[%s7332_s16 + $0x80] sm:$0x1] }
  0xec   : > { %6471 = vmatprep.subr.bf16.mxu1 %v7140_v23  ;;  %v8456_v5 = vrot.slane %v4000_v25, 5  ;;  %9181 = vst [vmem:[#allocation11_spill] sm:$0xff] %v8459_v45  ;;  %v4062_v14 = vshll.u32 %v8437_v34, 16  ;;  %v4010_v27 = vrot.slane %v4008_v0, 5  ;;  %v4020_v8 = vrot.slane %v4018_v1, 4 }
  0xed   : > { %6648 = vmatmul.mubr.bf16.gmra.mrb[28].mxu0 %v7134_v4  ;;  %v4038_v4 = vshll.u32 %v8420_v28, 16  ;;  %v8463_v28 = vrot.slane %v4014_v62, 5  ;;  %v8469_v22 = vld [vmem:[%s7332_s16 + $0xa0] sm:$0xf]  ;;  %v4031_v25 = vrot.slane %v4029_v17, 4  ;;  %v4034_v30 = vrot.slane %v4032_v46, 5 }
  0xee   : > { %6440 = vmatmul.mubr.bf16.gmra.mrb[12].mxu1 %v9179_v10  ;;  %6667 = vmatprep.mubr.bf16.mxu0 %v8208_v59  ;;  %v4053_v59 = vshrl.u32 %v5806_v3, 16  ;;  %v8454_v10 = vrot.slane %v3987_v49, 4  ;;  %v8466_v3 = vld [vmem:[%s7332_s16 + $0x8c] sm:$0x1]  ;;  %9183 = vst [vmem:[#allocation13_spill] sm:$0xff] %v8469_v22  ;;  %v4044_v47 = vrot.slane %v4042_v26, 4  ;;  %v8486_v62 = vsel %vm7610_vm5, %v1407_v44, %v1408_v53 }
  0xef   : > { %6443 = vmatprep.mubr.bf16.mxu1 %v9180_v56  ;;  %6472 = vmatpush3.bf16.msra.mxu1 %v7140_v23  ;;  %v4066_v23 = vshrl.u32 %v8437_v34, 16  ;;  %v4007_v56 = vrot.slane %v4005_v41, 4  ;;  %9182 = vst [vmem:[#allocation12_spill] sm:$0xff] %v8466_v3  ;;  %v7139_v49 = vld [vmem:[%s9141_s1 + $0x208] sm:$0xff]   ;;  %v8474_v13 = vrot.slane %v4038_v4, 5  ;;  %v4058_v34 = vrot.slane %v4056_v24, 5 }
  0xf0   : > { %6473 = vmatprep.subr.bf16.mxu1 %v7142_v12  ;;  %v5812_v41 = vld [vmem:[%s7332_s16 + $0xa8] sm:$0xf]  ;;  %v4055_v1 = vrot.slane %v4053_v59, 4  ;;  %v8491_v17 = vld [vmem:[%s9141_s1 + $0x100] sm:$0xff]   ;;  %v8494_v46 = vrot.slane %v4062_v14, 5  ;;  %v4077_v26 = vshrl.u32 %v5809_v38, 16  ;;  %v9186_v24 = vcombine.low %v8158_v16, %v8168_v15 }
  0xf1   : > { %9185 = vst [vmem:[#allocation15_spill] sm:$0xff] %v8491_v17  ;;  %v4068_v4 = vrot.slane %v4066_v23, 4  ;;  %v4080_v0 = vshll.u32 %v5809_v38, 16  ;;  %v8497_v53 = vrot.slane %v3997_v29, 4  ;;  %v4086_v44 = vshll.u32 %v8469_v22, 16  ;;  %v7141_v16 = vld [vmem:[%s9141_s1 + $0x210] sm:$0xff]  }
  0xf2   : > { %v4090_v59 = vshrl.u32 %v8469_v22, 16  ;;  %v4011_v14 = vor.u32 %v4010_v27, %v4007_v56  ;;  %v4021_v38 = vor.u32 %v4020_v8, %v8463_v28  ;;  %v4035_v23 = vor.u32 %v4034_v30, %v4031_v25  ;;  %v8509_v29 = vld [vmem:[%s7332_s16 + $0xac] sm:$0xf]  ;;  %v8522_v25 = vld [vmem:[%s7332_s16 + $0xa4] sm:$0x1] }
  0xf3   : > { %6474 = vmatpush3.bf16.msra.mxu1 %v7142_v12  ;;  %v4024_v12 = vshll.u32 %v8459_v45, 16  ;;  %9187 = vst [vmem:[#allocation16_spill] sm:$0xff] %v8509_v29  ;;  %v4045_v15 = vor.u32 %v4044_v47, %v8474_v13  ;;  %v4101_v27 = vshrl.u32 %v5812_v41, 16  ;;  %v4104_v30 = vshll.u32 %v5812_v41, 16 }
  0xf4   : > { %6747 = vmatprep.subr.bf16.mxu1 %v8491_v17  ;;  %v9188_v17 = vcombine.low %v8214_v20, %v8235_v7  ;;  %v4059_v56 = vor.u32 %v4058_v34, %v4055_v1  ;;  %v4069_v8 = vor.u32 %v4068_v4, %v8494_v46  ;;  %v4079_v20 = vrot.slane %v4077_v26, 4 }
  0xf5   : > { %6668 = vmatmul.mubr.bf16.vlgmr.msra.gmra.mrb[0].mxu0 %v8291_v50  ;;  %v4048_v50 = vshll.u32 %v8466_v3, 16  ;;  %v4082_v7 = vrot.slane %v4080_v0, 5  ;;  %v4114_v22 = vshrl.u32 %v8509_v29, 16  ;;  %v4012_v47 = vrot.slane %v4011_v14, 4  ;;  %v7143_v0 = vld [vmem:[%s9141_s1 + $0x218] sm:$0xff]  }
  0xf6   : > { %6444 = vmatmul.mubr.bf16.gmra.mrb[16].mxu1 %v9186_v24  ;;  %6700 = vmatpush3.bf16.msra.mxu0 %v8195_v21  ;;  %v4072_v21 = vshll.u32 %v8477_v39, 16  ;;  %v4110_v24 = vshll.u32 %v8509_v29, 16  ;;  %v4022_v39 = vrot.slane %v4021_v38, 4  ;;  %v4026_v3 = vrot.slane %v4024_v12, 5 }
  0xf7   : > { %6447 = vmatprep.mubr.bf16.mxu1 %v9188_v17  ;;  %6671 = vmatprep.mubr.bf16.mxu0 %v8295_v48  ;;  %v8524_v17 = vrot.slane %v4086_v44, 5  ;;  %v4092_v48 = vrot.slane %v4090_v59, 4  ;;  %v4050_v41 = vrot.slane %v4048_v50, 5  ;;  %v4036_v34 = vrot.slane %v4035_v23, 4 }
  0xf8   : > { %6701 = vmatprep.subr.bf16.mxu0 %v7139_v49  ;;  %v4046_v1 = vrot.slane %v4045_v15, 4  ;;  %v4103_v4 = vrot.slane %v4101_v27, 4  ;;  %v4106_v45 = vrot.slane %v4104_v30, 5  ;;  %v4060_v26 = vrot.slane %v4059_v56, 4  ;;  %v8590_v27 = vld [vmem:[%s7332_s16 + $0xbc] sm:$0x1] }
  0xf9   : > { %v4074_v44 = vrot.slane %v4072_v21, 5  ;;  %v4083_v59 = vor.u32 %v4082_v7, %v4079_v20  ;;  %v4096_v29 = vshll.u32 %v8522_v25, 16  ;;  %v4093_v12 = vor.u32 %v4092_v48, %v8524_v17  ;;  %v8557_v21 = vld [vmem:[%s7332_s16 + $0xb0] sm:$0x1] }
  0xfa   : > { %6702 = vmatpush3.bf16.msra.mxu0 %v7139_v49  ;;  %v4070_v49 = vrot.slane %v4069_v8, 4  ;;  %v8534_v14 = vrot.slane %v4110_v24, 5  ;;  %v4116_v38 = vrot.slane %v4114_v22, 4  ;;  %v9189_v23 = vor.u32 %v7942_v57, %v7940_v11 }
  0xfb   : > { %6703 = vmatprep.subr.bf16.mxu0 %v7141_v16  ;;  %v9190_v15 = vcombine.low %v8247_v40, %v8272_v60  ;;  %v4003_v22 = vsel %vm7364_vm2, %v8497_v53, %v8456_v5  ;;  %v4017_v57 = vsel %vm7364_vm2, %v4012_v47, %v8463_v28  ;;  %v9191_v40 = vcombine.low %v8302_v31, %v8344_v43  ;;  %v7146_v31 = vld [vmem:[%s9141_s1 + $0x220] sm:$0xff]  }
  0xfc   : > { %v8539_v50 = vrot.slane %v9189_v23, 4  ;;  %v4027_v60 = vsel %vm7364_vm2, %v4022_v39, %v4026_v3  ;;  %v4107_v5 = vor.u32 %v4106_v45, %v4103_v4  ;;  %v4051_v28 = vsel %vm7364_vm2, %v4046_v1, %v4050_v41  ;;  %v5868_v41 = vld [vmem:[%s7332_s16 + $0x48] sm:$0xe] }
  0xfd   : > { %6672 = vmatmul.mubr.bf16.gmra.mrb[4].mxu0 %v8340_v55  ;;  %v3993_v55 = vsel %vm7364_vm2, %v8454_v10, %v8426_v61  ;;  %v5815_v61 = vld [vmem:[%s7332_s16 + $0xb4] sm:$0xf]  ;;  %v8569_v10 = vld [vmem:[%s7332_s16 + $0xb8] sm:$0xf]  ;;  %v4065_v39 = vsel %vm7364_vm2, %v4060_v26, %v8494_v46  ;;  %v8579_v43 = vrot.slane %v4083_v59, 4  ;;  %v8581_v3 = vrot.slane %v4096_v29, 5 }
  0xfe   : > { %6448 = vmatmul.mubr.bf16.gmra.mrb[20].mxu1 %v9190_v15  ;;  %6675 = vmatprep.mubr.bf16.mxu0 %v8395_v18  ;;  %v4041_v18 = vsel %vm7364_vm2, %v4036_v34, %v8474_v13  ;;  %v4075_v13 = vsel %vm7364_vm2, %v4070_v49, %v4074_v44  ;;  %v8585_v45 = vrot.slane %v4093_v12, 4  ;;  %v4117_v53 = vor.u32 %v4116_v38, %v8534_v14  ;;  %v5869_v26 = vld [vmem:[%s7332_s16 + $0x54] sm:$0xe] }
  0xff   : > { %6451 = vmatprep.mubr.bf16.mxu1 %v9191_v40  ;;  %6704 = vmatpush3.bf16.msra.mxu0 %v7141_v16  ;;  %v4120_v16 = vshll.u32 %v8557_v21, 16  ;;  %v9192_v46 = vsel %vm7364_vm2, %v8424_v42, %v8413_v52  ;;  %v9193_v29 = vsel %vm7364_vm2, %v8422_v35, %v8346_v58  ;;  %v4125_v56 = vshrl.u32 %v5815_v61, 16 }
 0x100   : > { %6705 = vmatprep.subr.bf16.mxu0 %v7143_v0  ;;  %v5846_v30 = vcombine.low %v9193_v29, %v9192_v46  ;;  %v4128_v8 = vshll.u32 %v5815_v61, 16  ;;  %v4134_v20 = vshll.u32 %v8569_v10, 16  ;;  %v5462_v7 = vcombine.low %v8401_v2, %v8411_v54  ;;  %v7149_v2 = vld [vmem:[%s9141_s1 + $0x228] sm:$0xff]   ;;  %v5818_v54 = vld [vmem:[%s7332_s16 + $0xc0] sm:$0xf]  ;;  %v9197_v29 = vld [vmem:[#allocation5_spill] sm:$0xff] }
 0x101   : > { %v5463_v48 = vcombine.low %v8430_v36, %v8486_v62  ;;  %v5847_v24 = vcombine.low %v3993_v55, %v4003_v22  ;;  %v8607_v52 = vrot.slane %v4107_v5, 4  ;;  %v5848_v42 = vcombine.low %v4017_v57, %v4027_v60 }
 0x102   : > { %v8609_v58 = vcombine.low %v4041_v18, %v4051_v28  ;;  %v8611_v35 = vcombine.low %v4065_v39, %v4075_v13  ;;  %v4089_v47 = vsel %vm7364_vm2, %v8579_v43, %v8524_v17  ;;  %v4099_v34 = vsel %vm7364_vm2, %v8585_v45, %v8581_v3  ;;  %v5871_v28 = vld [vmem:[%s7332_s16 + $0x6c] sm:$0xe] }
 0x103   : > { %6706 = vmatpush3.bf16.msra.mxu0 %v7143_v0  ;;  %v8627_v1 = vrot.slane %v4117_v53, 4  ;;  %v8629_v4 = vrot.slane %v4120_v16, 5  ;;  %v4138_v0 = vshrl.u32 %v8569_v10, 16  ;;  %v9194_v44 = vcombine.low %v8356_v6, %v8365_v51  ;;  %v7152_v6 = vld [vmem:[%s9141_s1 + $0x230] sm:$0xff]   ;;  %v8651_v51 = vld [vmem:[%s7332_s16 + $0xc4] sm:$0xf] }
 0x104   : > { %6707 = vmatprep.subr.bf16.mxu0 %v7146_v31  ;;  %v8636_v59 = vrot.slane %v4125_v56, 4  ;;  %v8640_v49 = vrot.slane %v4134_v20, 5  ;;  %v4144_v12 = vshll.u32 %v8590_v27, 16  ;;  %v4113_v38 = vsel %vm7364_vm2, %v8607_v52, %v8534_v14  ;;  %v5870_v14 = vld [vmem:[%s7332_s16 + $0x60] sm:$0xe]  ;;  %v9195_v39 = vld [vmem:[#allocation3_spill] sm:$0xff] }
 0x105   : > { %6676 = vmatmul.mubr.bf16.gmra.mrb[8].mxu0 %v8407_v19  ;;  %v8638_v19 = vrot.slane %v4128_v8, 5  ;;  %v4149_v23 = vshrl.u32 %v5818_v54, 16  ;;  %v5884_v15 = vrot.slane %v5868_v41, 9  ;;  %v4612_v55 = vrot.slane %v8227_v32, 5  ;;  %v7144_v13 = vld [vmem:[%s7332_s16 + $0xc] sm:$0xff]   ;;  %v7155_v56 = vld [vmem:[%s9141_s1 + $0x238] sm:$0xff]  }
 0x106   : > { %6452 = vmatmul.mubr.bf16.gmra.mrb[24].mxu1 %v9194_v44  ;;  %6679 = vmatprep.mubr.bf16.mxu0 %v5846_v30  ;;  %v4152_v22 = vshll.u32 %v5818_v54, 16  ;;  %v4615_v57 = vrot.slane %v8275_v63, 5  ;;  %v5885_v40 = vrot.slane %v5869_v26, 9  ;;  %v4619_v60 = vrot.slane %v8239_v33, 5  ;;  %v9196_v16 = vld [vmem:[#allocation4_spill] sm:$0xff]  ;;  %v9198_v52 = vld [vmem:[#allocation6_spill] sm:$0xff] }
 0x107   : > { %6455 = vmatprep.mubr.bf16.mxu1 %v5462_v7  ;;  %6708 = vmatpush3.bf16.msra.mxu0 %v7146_v31  ;;  %v4123_v18 = vsel %vm7364_vm2, %v8627_v1, %v8629_v4  ;;  %v8661_v5 = vrot.slane %v4138_v0, 4  ;;  %v8665_v61 = vsel %vm7610_vm5, %v5884_v15, %v4612_v55  ;;  %v4614_v32 = vrot.slane %v4612_v55, 4  ;;  %v9199_v4 = vld [vmem:[#allocation7_spill] sm:$0xff] }
 0x108   : > { %6709 = vmatprep.subr.bf16.mxu0 %v7149_v2  ;;  %v4158_v31 = vshll.u32 %v8651_v51, 16  ;;  %v8671_v63 = vsel %vm7610_vm5, %v5885_v40, %v4619_v60  ;;  %v4621_v33 = vrot.slane %v4619_v60, 4  ;;  %v4622_v3 = vrot.slane %v9195_v39, 5  ;;  %v8702_v26 = vld [vmem:[%s7332_s16 + $0xc8] sm:$0x1]  ;;  %v7145_v40 = vld [vmem:[%s7332_s16 + $0x18] sm:$0xff]  }
 0x109   : > { %v8677_v45 = vsel %vm7610_vm5, %v4614_v32, %v4615_v57  ;;  %v5886_v53 = vrot.slane %v5870_v14, 9  ;;  %v4626_v46 = vrot.slane %v9196_v16, 5  ;;  %v4629_v30 = vrot.slane %v9197_v29, 5  ;;  %v7147_v39 = vld [vmem:[%s7332_s16 + $0x24] sm:$0xff]  }
 0x10a   : > { %v5916_v8 = vcombine.low %v8665_v61, %v8677_v45  ;;  %v8688_v20 = vsel %vm7610_vm5, %v4621_v33, %v4622_v3  ;;  %v5887_v7 = vrot.slane %v5871_v28, 9  ;;  %v4636_v0 = vrot.slane %v9199_v4, 5  ;;  %v9201_v28 = vld [vmem:[#allocation11_spill] sm:$0xff]  ;;  %v5577_v61 = vld [vmem:[%s7332_s16 + $0x90] sm:$0xf] }
 0x10b   : > { %6710 = vmatpush3.bf16.msra.mxu0 %v7149_v2  ;;  %v4633_v2 = vrot.slane %v9198_v52, 5  ;;  %v5917_v54 = vcombine.low %v8671_v63, %v8688_v20  ;;  %v8695_v41 = vsel %vm7610_vm5, %v5886_v53, %v4626_v46  ;;  %v4628_v1 = vrot.slane %v4626_v46, 4  ;;  %v9202_v53 = vld [vmem:[#allocation2_spill] sm:$0xff]  ;;  %v7161_v45 = vld [vmem:[%s7332_s16 + $0xa8] sm:$0xff]  }
 0x10c   : > { %6711 = vmatprep.subr.bf16.mxu0 %v7152_v6  ;;  %v8704_v44 = vrot.slane %v4149_v23, 4  ;;  %v8717_v36 = vcombine.low %v4089_v47, %v4099_v34  ;;  %v4131_v62 = vor.u32 %v8638_v19, %v8636_v59  ;;  %v5872_v23 = vld [vmem:[%s7332_s16 + $0x78] sm:$0xe]  ;;  %v8729_v57 = vrot.slane %v4144_v12, 5  ;;  %v5821_v12 = vld [vmem:[%s7332_s16 + $0xcc] sm:$0xf] }
 0x10d   : > { %6680 = vmatmul.mubr.bf16.gmra.mrb[12].mxu0 %v5847_v24  ;;  %v8706_v24 = vrot.slane %v4152_v22, 5  ;;  %v8710_v15 = vsel %vm7610_vm5, %v5887_v7, %v4633_v2  ;;  %v4635_v55 = vrot.slane %v4633_v2, 4  ;;  %v8727_v22 = vcombine.low %v4113_v38, %v4123_v18  ;;  %v5571_v47 = vld [vmem:[%s7332_s16 + $0x78] sm:$0xf]  ;;  %v9200_v18 = vld [vmem:[#allocation8_spill] sm:$0xff] }
 0x10e   : > { %6456 = vmatmul.mubr.bf16.gmra.mrb[28].mxu1 %v5463_v48  ;;  %6683 = vmatprep.mubr.bf16.mxu0 %v5848_v42  ;;  %v4162_v48 = vshrl.u32 %v8651_v51, 16  ;;  %v8724_v42 = vsel %vm7610_vm5, %v4628_v1, %v4629_v30  ;;  %v4141_v34 = vor.u32 %v8661_v5, %v8640_v49  ;;  %v8740_v59 = vrot.slane %v4158_v31, 5  ;;  %v8754_v31 = vld [vmem:[%s7332_s16 + $0xd0] sm:$0xf]  ;;  %v9203_v1 = vld [vmem:[#allocation9_spill] sm:$0xff] }
 0x10f   : > { %6475 = vmatprep.mubr.bf16.mxu1 %v7144_v13  ;;  %6712 = vmatpush3.bf16.msra.mxu0 %v7152_v6  ;;  %v5918_v17 = vcombine.low %v8695_v41, %v8724_v42  ;;  %v8735_v43 = vsel %vm7610_vm5, %v4635_v55, %v4636_v0  ;;  %v4168_v19 = vshll.u32 %v8702_v26, 16  ;;  %v5873_v6 = vld [vmem:[%s7332_s16 + $0x84] sm:$0xe]  ;;  %v4155_v60 = vor.u32 %v8706_v24, %v8704_v44  ;;  %v9204_v24 = vld [vmem:[#allocation12_spill] sm:$0xff]  ;;  %v7225_v63 = vld [vmem:[%s7332_s16 + $0x8c] sm:$0x1] }
 0x110   : > { %6713 = vmatprep.subr.bf16.mxu0 %v7155_v56  ;;  %v5919_v38 = vcombine.low %v8710_v15, %v8735_v43  ;;  %v5888_v14 = vrot.slane %v5872_v23, 9  ;;  %v4640_v32 = vrot.slane %v9200_v18, 5  ;;  %v4643_v33 = vrot.slane %v9201_v28, 5 }
 0x111   : > { %v4164_v5 = vrot.slane %v4162_v48, 4  ;;  %v2387_v3 = vshrl.u32 %v5571_v47, 16  ;;  %v2390_v13 = vshll.u32 %v5571_v47, 16  ;;  %v2409_v16 = vsel %vm7364_vm2, %v8539_v50, %v9202_v53 }
 0x112   : > { %v4173_v46 = vshrl.u32 %v5821_v12, 16  ;;  %v8762_v29 = vsel %vm7610_vm5, %v5888_v14, %v4640_v32  ;;  %v4642_v30 = vrot.slane %v4640_v32, 4  ;;  %v5889_v7 = vrot.slane %v5873_v6, 9  ;;  %v7205_v6 = vld [vmem:[%s9141_s1 + $0x108] sm:$0xff]  }
 0x113   : > { %6714 = vmatpush3.bf16.msra.mxu0 %v7155_v56  ;;  %v4176_v52 = vshll.u32 %v5821_v12, 16  ;;  %v2389_v2 = vrot.slane %v2387_v3, 4  ;;  %v2392_v56 = vrot.slane %v2390_v13, 5  ;;  %v4647_v4 = vrot.slane %v9203_v1, 5  ;;  %v5874_v12 = vld [vmem:[%s7332_s16 + $0x90] sm:$0xe] }
 0x114   : > { %v4182_v50 = vshll.u32 %v8754_v31, 16  ;;  %v4186_v0 = vshrl.u32 %v8754_v31, 16  ;;  %v8771_v44 = vsel %vm7610_vm5, %v4642_v30, %v4643_v33  ;;  %v4650_v55 = vrot.slane %v9204_v24, 5  ;;  %v7148_v3 = vld [vmem:[%s7332_s16 + $0x30] sm:$0xff]  }
 0x115   : > { %6684 = vmatmul.mubr.bf16.gmra.mrb[16].mxu0 %v8609_v58  ;;  %v9205_v58 = vld [vmem:[#allocation15_spill] sm:$0xff]  ;;  %v4165_v48 = vor.u32 %v4164_v5, %v8740_v59  ;;  %v2393_v23 = vor.u32 %v2392_v56, %v2389_v2  ;;  %v4649_v47 = vrot.slane %v4647_v4, 4  ;;  %v4142_v14 = vrot.slane %v4141_v34, 4  ;;  %v8792_v13 = vld [vmem:[%s7332_s16 + $0xd4] sm:$0x1]  ;;  %v9206_v2 = vld [vmem:[#allocation10_spill] sm:$0xff] }
 0x116   : > { %6476 = vmatmul.mubr.bf16.vlgmr.msra.gmra.mrb[0].mxu1 %v7145_v40  ;;  %6687 = vmatprep.mubr.bf16.mxu0 %v8611_v35  ;;  %v5920_v35 = vcombine.low %v8762_v29, %v8771_v44  ;;  %v4132_v40 = vrot.slane %v4131_v62, 4  ;;  %v4170_v18 = vrot.slane %v4168_v19, 5  ;;  %v8784_v32 = vsel %vm7610_vm5, %v5889_v7, %v4647_v4  ;;  %v7150_v19 = vld [vmem:[%s7332_s16 + $0x3c] sm:$0xff]   ;;  %v7206_v1 = vld [vmem:[%s9141_s1 + $0x110] sm:$0xff]  }
 0x117   : > { %6755 = vmatpush3.bf16.msra.mxu1 %v9205_v58  ;;  %6479 = vmatprep.mubr.bf16.mxu1 %v7147_v39  ;;  %v4175_v28 = vrot.slane %v4173_v46, 4  ;;  %v4178_v33 = vrot.slane %v4176_v52, 5  ;;  %v2394_v39 = vrot.slane %v2393_v23, 4  ;;  %v8788_v5 = vsel %vm7610_vm5, %v4649_v47, %v4650_v55  ;;  %v7207_v47 = vld [vmem:[%s7332_s16 + $0x1c] sm:$0xf] }
 0x118   : > { %6748 = vmatprep.subr.bf16.mxu1 %v7205_v6  ;;  %v8794_v53 = vrot.slane %v4182_v50, 5  ;;  %v4188_v30 = vrot.slane %v4186_v0, 4  ;;  %v5921_v62 = vcombine.low %v8784_v32, %v8788_v5  ;;  %v5890_v34 = vrot.slane %v5874_v12, 9 }
 0x119   : > { %v4156_v7 = vrot.slane %v4155_v60, 4  ;;  %v4166_v46 = vrot.slane %v4165_v48, 4  ;;  %v2399_v52 = vsel %vm7364_vm2, %v2394_v39, %v7940_v11  ;;  %v4654_v56 = vrot.slane %v9206_v2, 5  ;;  %v9207_v11 = vld [vmem:[#allocation14_spill] sm:$0xff]  ;;  %v7151_v39 = vld [vmem:[%s7332_s16 + $0x48] sm:$0xff]  }
 0x11a   : > { %v4137_v4 = vsel %vm7364_vm2, %v4132_v40, %v8640_v49  ;;  %v4147_v60 = vsel %vm7364_vm2, %v4142_v14, %v8729_v57  ;;  %v8812_v50 = vcombine.low %v2399_v52, %v2409_v16  ;;  %v4657_v0 = vrot.slane %v9207_v11, 5  ;;  %v5864_v57 = vld [vmem:[%s7332_s16 + $0x18] sm:$0xe]  ;;  %v5875_v16 = vld [vmem:[%s7332_s16 + $0x9c] sm:$0xe] }
 0x11b   : > { %6756 = vmatpush3.bf16.msra.mxu1 %v7205_v6  ;;  %v4179_v24 = vor.u32 %v4178_v33, %v4175_v28  ;;  %v4192_v55 = vshll.u32 %v8792_v13, 16  ;;  %v8819_v58 = vsel %vm7610_vm5, %v5890_v34, %v4654_v56  ;;  %v4656_v48 = vrot.slane %v4654_v56, 4  ;;  %v7208_v40 = vld [vmem:[%s9141_s1 + $0x118] sm:$0xff]   ;;  %v7209_v2 = vld [vmem:[%s7332_s16 + $0x20] sm:$0x1] }
 0x11c   : > { %6749 = vmatprep.subr.bf16.mxu1 %v7206_v1  ;;  %v4189_v49 = vor.u32 %v4188_v30, %v8794_v53  ;;  %v4171_v23 = vsel %vm7364_vm2, %v4166_v46, %v4170_v18  ;;  %v4584_v12 = vrot.slane %v7207_v47, 5  ;;  %v5853_v6 = vcombine.low %v4137_v4, %v4147_v60  ;;  %v9208_v34 = vld [vmem:[#allocation13_spill] sm:$0xff]  ;;  %v5876_v11 = vld [vmem:[%s7332_s16 + $0xa8] sm:$0xe] }
 0x11d   : > { %6688 = vmatmul.mubr.bf16.gmra.mrb[20].mxu0 %v8717_v36  ;;  %v4161_v36 = vsel %vm7364_vm2, %v4156_v7, %v8740_v59  ;;  %v4180_v14 = vrot.slane %v4179_v24, 4  ;;  %v4194_v28 = vrot.slane %v4192_v55, 5  ;;  %v5880_v18 = vrot.slane %v5864_v57, 9  ;;  %v7153_v46 = vld [vmem:[%s7332_s16 + $0x54] sm:$0xff]   ;;  %v5865_v55 = vld [vmem:[%s7332_s16 + $0x24] sm:$0xe] }
 0x11e   : > { %6480 = vmatmul.mubr.bf16.gmra.mrb[4].mxu1 %v7148_v3  ;;  %6691 = vmatprep.mubr.bf16.mxu0 %v8727_v22  ;;  %v8833_v22 = vsel %vm7610_vm5, %v4656_v48, %v4657_v0  ;;  %v5891_v33 = vrot.slane %v5875_v16, 9  ;;  %v5854_v3 = vcombine.low %v4161_v36, %v4171_v23  ;;  %v4190_v30 = vrot.slane %v4189_v49, 4  ;;  %v7211_v48 = vld [vmem:[%s7332_s16 + $0x28] sm:$0xf]  ;;  %v7212_v36 = vld [vmem:[%s7332_s16 + $0x34] sm:$0xf] }
 0x11f   : > { %6483 = vmatprep.mubr.bf16.mxu1 %v7150_v19  ;;  %6757 = vmatpush3.bf16.msra.mxu1 %v7206_v1  ;;  %v5922_v59 = vcombine.low %v8819_v58, %v8833_v22  ;;  %v4661_v19 = vrot.slane %v9208_v34, 5  ;;  %v4664_v7 = vrot.slane %v8522_v25, 5  ;;  %v4586_v52 = vrot.slane %v4584_v12, 4  ;;  %v7210_v1 = vld [vmem:[%s9141_s1 + $0x120] sm:$0xff]  }
 0x120   : > { %6750 = vmatprep.subr.bf16.mxu1 %v7208_v40  ;;  %v4587_v56 = vrot.slane %v7209_v2, 5  ;;  %v4585_v25 = vsel %vm7610_vm5, %v5880_v18, %v4584_v12  ;;  %v4185_v0 = vsel %vm7364_vm2, %v4180_v14, %v8794_v53  ;;  %v4195_v24 = vsel %vm7364_vm2, %v4190_v30, %v4194_v28  ;;  %v5866_v12 = vld [vmem:[%s7332_s16 + $0x30] sm:$0xe]  ;;  %v7154_v30 = vld [vmem:[%s7332_s16 + $0x60] sm:$0xff]  }
 0x121   : > { %v8850_v4 = vsel %vm7610_vm5, %v5891_v33, %v4661_v19  ;;  %v4663_v60 = vrot.slane %v4661_v19, 4  ;;  %v4591_v49 = vrot.slane %v7211_v48, 5  ;;  %v4598_v23 = vrot.slane %v7212_v36, 5  ;;  %v7214_v33 = vld [vmem:[%s7332_s16 + $0x2c] sm:$0x1] }
 0x122   : > { %v4588_v16 = vsel %vm7610_vm5, %v4586_v52, %v4587_v56  ;;  %v5892_v47 = vrot.slane %v5876_v11, 9  ;;  %v5855_v28 = vcombine.low %v4185_v0, %v4195_v24  ;;  %v5881_v18 = vrot.slane %v5865_v55, 9  ;;  %v7156_v52 = vld [vmem:[%s7332_s16 + $0x6c] sm:$0xff]   ;;  %v5877_v11 = vld [vmem:[%s7332_s16 + $0xb4] sm:$0xe] }
 0x123   : > { %6758 = vmatpush3.bf16.msra.mxu1 %v7208_v40  ;;  %v8864_v57 = vsel %vm7610_vm5, %v4663_v60, %v4664_v7  ;;  %v9209_v40 = vld [vmem:[#allocation16_spill] sm:$0xff]  ;;  %v5912_v34 = vcombine.low %v4585_v25, %v4588_v16  ;;  %v4593_v19 = vrot.slane %v4591_v49, 4  ;;  %v5882_v2 = vrot.slane %v5866_v12, 9  ;;  %v5867_v0 = vld [vmem:[%s7332_s16 + $0x3c] sm:$0xe] }
 0x124   : > { %6751 = vmatprep.subr.bf16.mxu1 %v7210_v1  ;;  %v5923_v53 = vcombine.low %v8850_v4, %v8864_v57  ;;  %v4668_v14 = vrot.slane %v9209_v40, 5  ;;  %v4600_v56 = vrot.slane %v4598_v23, 4  ;;  %v7216_v24 = vld [vmem:[%s7332_s16 + $0x40] sm:$0xf]  ;;  %v4592_v48 = vsel %vm7610_vm5, %v5881_v18, %v4591_v49  ;;  %v7218_v18 = vld [vmem:[%s7332_s16 + $0x44] sm:$0x1] }
 0x125   : > { %6692 = vmatmul.mubr.bf16.gmra.mrb[24].mxu0 %v5853_v6  ;;  %v7213_v6 = vld [vmem:[%s9141_s1 + $0x128] sm:$0xff]   ;;  %v4605_v55 = vrot.slane %v7216_v24, 5  ;;  %v4675_v12 = vrot.slane %v8569_v10, 5  ;;  %v4599_v49 = vsel %vm7610_vm5, %v5882_v2, %v4598_v23  ;;  %v7219_v10 = vld [vmem:[%s9141_s1 + $0x138] sm:$0xff]   ;;  %v5878_v23 = vld [vmem:[%s7332_s16 + $0xc0] sm:$0xe] }
 0x126   : > { %6484 = vmatmul.mubr.bf16.gmra.mrb[8].mxu1 %v7151_v39  ;;  %6695 = vmatprep.mubr.bf16.mxu0 %v5854_v3  ;;  %v4594_v39 = vrot.slane %v7214_v33, 5  ;;  %v4671_v3 = vrot.slane %v8557_v21, 5  ;;  %v8881_v7 = vsel %vm7610_vm5, %v5892_v47, %v4668_v14  ;;  %v7217_v21 = vld [vmem:[%s9141_s1 + $0x130] sm:$0xff]   ;;  %v5893_v47 = vrot.slane %v5877_v11, 9 }
 0x127   : > { %6487 = vmatprep.mubr.bf16.mxu1 %v7153_v46  ;;  %6759 = vmatpush3.bf16.msra.mxu1 %v7210_v1  ;;  %v4670_v46 = vrot.slane %v4668_v14, 4  ;;  %v7215_v1 = vld [vmem:[%s7332_s16 + $0x38] sm:$0x1]  ;;  %v5883_v14 = vrot.slane %v5867_v0, 9  ;;  %v4608_v33 = vrot.slane %v7218_v18, 5  ;;  %v4682_v11 = vrot.slane %v8651_v51, 5 }
 0x128   : > { %6752 = vmatprep.subr.bf16.mxu1 %v7213_v6  ;;  %v4601_v60 = vrot.slane %v7215_v1, 5  ;;  %v4595_v36 = vsel %vm7610_vm5, %v4593_v19, %v4594_v39  ;;  %v4677_v39 = vrot.slane %v4675_v12, 4  ;;  %v5568_v19 = vld [vmem:[%s7332_s16 + $0x6c] sm:$0xf]  ;;  %v7159_v18 = vld [vmem:[%s7332_s16 + $0x90] sm:$0xff]   ;;  %v2430_v20 = vshll.u32 %v7225_v63, 16 }
 0x129   : > { %v8893_v25 = vsel %vm7610_vm5, %v4670_v46, %v4671_v3  ;;  %v5913_v3 = vcombine.low %v4592_v48, %v4595_v36  ;;  %v4606_v1 = vsel %vm7610_vm5, %v5883_v14, %v4605_v55  ;;  %v2363_v0 = vshrl.u32 %v5568_v19, 16  ;;  %v5879_v51 = vld [vmem:[%s7332_s16 + $0xcc] sm:$0xe] }
 0x12a   : > { %v5924_v16 = vcombine.low %v8881_v7, %v8893_v25  ;;  %v4602_v40 = vsel %vm7610_vm5, %v4600_v56, %v4601_v60  ;;  %v5894_v56 = vrot.slane %v5878_v23, 9  ;;  %v2366_v24 = vshll.u32 %v5568_v19, 16 }
 0x12b   : > { %6760 = vmatpush3.bf16.msra.mxu1 %v7213_v6  ;;  %v4678_v6 = vrot.slane %v8590_v27, 5  ;;  %v8913_v27 = vsel %vm7610_vm5, %v5893_v47, %v4675_v12  ;;  %v4685_v36 = vrot.slane %v8702_v26, 5  ;;  %v4684_v12 = vrot.slane %v4682_v11, 4 }
 0x12c   : > { %6753 = vmatprep.subr.bf16.mxu1 %v7217_v21  ;;  %v2368_v26 = vrot.slane %v2366_v24, 5  ;;  %v4692_v23 = vrot.slane %v8792_v13, 5 }
 0x12d   : > { %6696 = vmatmul.mubr.bf16.gmra.mrb[28].mxu0 %v5855_v28  ;;  %v4607_v28 = vrot.slane %v4605_v55, 4  ;;  %v8920_v46 = vsel %vm7610_vm5, %v4677_v39, %v4678_v6  ;;  %v8934_v55 = vsel %vm7610_vm5, %v5894_v56, %v4682_v11  ;;  %v4689_v39 = vrot.slane %v8754_v31, 5  ;;  %v7221_v56 = vld [vmem:[%s7332_s16 + $0x74] sm:$0x1] }
 0x12e   : > { %6488 = vmatmul.mubr.bf16.gmra.mrb[12].mxu1 %v7154_v30  ;;  %6715 = vmatprep.mubr.bf16.mxu0 %v5912_v34  ;;  %v7157_v30 = vld [vmem:[%s7332_s16 + $0x78] sm:$0xff]   ;;  %v5914_v34 = vcombine.low %v4599_v49, %v4602_v40  ;;  %v5925_v2 = vcombine.low %v8913_v27, %v8920_v46  ;;  %v8939_v49 = vsel %vm7610_vm5, %v4684_v12, %v4685_v36  ;;  %v2365_v40 = vrot.slane %v2363_v0, 4  ;;  %v7222_v0 = vld [vmem:[%s7332_s16 + $0x88] sm:$0xf] }
 0x12f   : > { %6491 = vmatprep.mubr.bf16.mxu1 %v7156_v52  ;;  %6761 = vmatpush3.bf16.msra.mxu1 %v7217_v21  ;;  %v7158_v52 = vld [vmem:[%s7332_s16 + $0x84] sm:$0xff]   ;;  %v4609_v60 = vsel %vm7610_vm5, %v4607_v28, %v4608_v33  ;;  %v7220_v21 = vld [vmem:[%s7332_s16 + $0x70] sm:$0xf]  ;;  %v5926_v28 = vcombine.low %v8934_v55, %v8939_v49  ;;  %v4691_v19 = vrot.slane %v4689_v39, 4  ;;  %v2420_v24 = vshll.u32 %v7222_v0, 16 }
 0x130   : > { %6754 = vmatprep.subr.bf16.mxu1 %v7219_v10  ;;  %v2372_v48 = vshll.u32 %v7220_v21, 16  ;;  %v2376_v47 = vshrl.u32 %v7220_v21, 16  ;;  %v5915_v6 = vcombine.low %v4606_v1, %v4609_v60  ;;  %v2382_v1 = vshll.u32 %v7221_v56, 16 }
 0x131   : > { %v8961_v11 = vsel %vm7610_vm5, %v4691_v19, %v4692_v23  ;;  %v2424_v21 = vshrl.u32 %v7222_v0, 16  ;;  %v7224_v19 = vld [vmem:[%s7332_s16 + $0xa0] sm:$0xf] }
 0x132   : > { %v8941_v14 = vrot.slane %v2372_v48, 5  ;;  %v2378_v33 = vrot.slane %v2376_v47, 4  ;;  %v2472_v56 = vshrl.u32 %v7224_v19, 16 }
 0x133   : > { %6762 = vmatpush3.bf16.msra.mxu1 %v7219_v10  ;;  %v5895_v10 = vrot.slane %v5879_v51, 9 }
 0x134   : > { %v2379_v31 = vor.u32 %v2378_v33, %v8941_v14  ;;  %v2438_v33 = vshll.u32 %v5577_v61, 16 }
 0x135   : > { %6716 = vmatmul.mubr.bf16.vlgmr.msra.gmra.mrb[0].mxu0 %v5913_v3  ;;  %v7160_v3 = vld [vmem:[%s7332_s16 + $0x9c] sm:$0xff]  }
 0x136   : > { %6492 = vmatmul.mubr.bf16.gmra.mrb[16].mxu1 %v7157_v30  ;;  %6719 = vmatprep.mubr.bf16.mxu0 %v5914_v34  ;;  %v5574_v30 = vld [vmem:[%s7332_s16 + $0x84] sm:$0xf]  ;;  %v8952_v34 = vsel %vm7610_vm5, %v5895_v10, %v4689_v39  ;;  %v2380_v47 = vrot.slane %v2379_v31, 4  ;;  %v7223_v10 = vld [vmem:[%s7332_s16 + $0x94] sm:$0xf]  ;;  %v2440_v0 = vrot.slane %v2438_v33, 5 }
 0x137   : > { %6495 = vmatprep.mubr.bf16.mxu1 %v7158_v52  ;;  %v2369_v52 = vor.u32 %v2368_v26, %v2365_v40  ;;  %v2411_v13 = vshrl.u32 %v5574_v30, 16  ;;  %v2414_v60 = vshll.u32 %v5574_v30, 16  ;;  %v5927_v48 = vcombine.low %v8952_v34, %v8961_v11 }
 0x138   : > { %v8970_v40 = vrot.slane %v2420_v24, 5  ;;  %v2426_v26 = vrot.slane %v2424_v21, 4  ;;  %v2444_v39 = vshll.u32 %v7223_v10, 16  ;;  %v2448_v23 = vshrl.u32 %v7223_v10, 16  ;;  %v7227_v10 = vld [vmem:[%s7332_s16 + $0xa4] sm:$0x1] }
 0x139   : > { %v2370_v36 = vrot.slane %v2369_v52, 4  ;;  %v2413_v12 = vrot.slane %v2411_v13, 4  ;;  %v2416_v51 = vrot.slane %v2414_v60, 5  ;;  %v2468_v52 = vshll.u32 %v7224_v19, 16  ;;  %v7228_v19 = vld [vmem:[%s7332_s16 + $0xac] sm:$0xf] }
 0x13a   : > { %v2427_v13 = vor.u32 %v2426_v26, %v8970_v40  ;;  %v8987_v41 = vrot.slane %v2444_v39, 5  ;;  %v2450_v42 = vrot.slane %v2448_v23, 4  ;;  %v2474_v21 = vrot.slane %v2472_v56, 4  ;;  %v5586_v23 = vld [vmem:[%s7332_s16 + $0xb4] sm:$0xf] }
 0x13b   : > { %v2478_v39 = vshll.u32 %v7227_v10, 16  ;;  %v2496_v15 = vshrl.u32 %v7228_v19, 16  ;;  %v2510_v63 = vshll.u32 %v5586_v23, 16 }
 0x13c   : > { %v2451_v26 = vor.u32 %v2450_v42, %v8987_v41 }
 0x13d   : > { %6720 = vmatmul.mubr.bf16.gmra.mrb[4].mxu0 %v5915_v6  ;;  %v5580_v6 = vld [vmem:[%s7332_s16 + $0x9c] sm:$0xf] }
 0x13e   : > { %6496 = vmatmul.mubr.bf16.gmra.mrb[20].mxu1 %v7159_v18  ;;  %6723 = vmatprep.mubr.bf16.mxu0 %v5916_v8  ;;  %v2384_v8 = vrot.slane %v2382_v1, 5  ;;  %v2435_v18 = vshrl.u32 %v5577_v61, 16  ;;  %v2462_v30 = vshll.u32 %v5580_v6, 16  ;;  %v2375_v1 = vsel %vm7364_vm2, %v2370_v36, %v8941_v14  ;;  %v7163_v61 = vld [vmem:[%s7332_s16 + $0xc0] sm:$0xff]  }
 0x13f   : > { %6499 = vmatprep.mubr.bf16.mxu1 %v7160_v3  ;;  %v2459_v3 = vshrl.u32 %v5580_v6, 16  ;;  %v8989_v14 = vrot.slane %v2468_v52, 5  ;;  %v2492_v52 = vshll.u32 %v7228_v19, 16 }
 0x140   : > { %v2385_v31 = vsel %vm7364_vm2, %v2380_v47, %v2384_v8  ;;  %v2437_v60 = vrot.slane %v2435_v18, 4  ;;  %v2464_v24 = vrot.slane %v2462_v30, 5  ;;  %v2432_v8 = vrot.slane %v2430_v20, 5  ;;  %v7229_v20 = vld [vmem:[%s7332_s16 + $0xb8] sm:$0xf] }
 0x141   : > { %v2428_v47 = vrot.slane %v2427_v13, 4  ;;  %v2475_v33 = vor.u32 %v2474_v21, %v8989_v14  ;;  %v2516_v29 = vshll.u32 %v7229_v20, 16  ;;  %v2520_v44 = vshrl.u32 %v7229_v20, 16 }
 0x143   : > { %v2476_v13 = vrot.slane %v2475_v33, 4 }
 0x145   : > { %6724 = vmatmul.mubr.bf16.gmra.mrb[8].mxu0 %v5917_v54  ;;  %v2417_v54 = vor.u32 %v2416_v51, %v2413_v12  ;;  %v2441_v12 = vor.u32 %v2440_v0, %v2437_v60  ;;  %v7226_v51 = vld [vmem:[%s7332_s16 + $0x98] sm:$0x1]  ;;  %v2480_v60 = vrot.slane %v2478_v39, 5 }
 0x146   : > { %6500 = vmatmul.mubr.bf16.gmra.mrb[24].mxu1 %v7161_v45  ;;  %6727 = vmatprep.mubr.bf16.mxu0 %v5918_v17  ;;  %v2461_v17 = vrot.slane %v2459_v3, 4  ;;  %v5616_v45 = vcombine.low %v2375_v1, %v2385_v31  ;;  %v2454_v6 = vshll.u32 %v7226_v51, 16  ;;  %v2507_v31 = vshrl.u32 %v5586_v23, 16 }
 0x147   : > { %6503 = vmatprep.mubr.bf16.mxu1 %v7162_v9  ;;  %v2418_v36 = vrot.slane %v2417_v54, 4  ;;  %v5583_v9 = vld [vmem:[%s7332_s16 + $0xa8] sm:$0xf]  ;;  %v2442_v56 = vrot.slane %v2441_v12, 4  ;;  %v2481_v32 = vsel %vm7364_vm2, %v2476_v13, %v2480_v60 }
 0x148   : > { %v2465_v18 = vor.u32 %v2464_v24, %v2461_v17  ;;  %v2483_v3 = vshrl.u32 %v5583_v9, 16  ;;  %v2486_v30 = vshll.u32 %v5583_v9, 16  ;;  %v2456_v1 = vrot.slane %v2454_v6, 5 }
 0x149   : > { %v2423_v43 = vsel %vm7364_vm2, %v2418_v36, %v8970_v40  ;;  %v2494_v17 = vrot.slane %v2492_v52, 5  ;;  %v2498_v24 = vrot.slane %v2496_v15, 4  ;;  %v2509_v21 = vrot.slane %v2507_v31, 4  ;;  %v5589_v36 = vld [vmem:[%s7332_s16 + $0xc0] sm:$0xf] }
 0x14a   : > { %v2466_v54 = vrot.slane %v2465_v18, 4  ;;  %v2485_v0 = vrot.slane %v2483_v3, 4  ;;  %v2488_v42 = vrot.slane %v2486_v30, 5  ;;  %v2531_v9 = vshrl.u32 %v5589_v36, 16  ;;  %v7231_v18 = vld [vmem:[%s7332_s16 + $0xc4] sm:$0xf] }
 0x14b   : > { %v2540_v33 = vshll.u32 %v7231_v18, 16 }
 0x14c   : > { %v2471_v51 = vsel %vm7364_vm2, %v2466_v54, %v8989_v14  ;;  %v2489_v5 = vor.u32 %v2488_v42, %v2485_v0  ;;  %v2544_v14 = vshrl.u32 %v7231_v18, 16  ;;  %v2533_v19 = vrot.slane %v2531_v9, 4 }
 0x14d   : > { %6728 = vmatmul.mubr.bf16.gmra.mrb[12].mxu0 %v5919_v38  ;;  %v2433_v38 = vsel %vm7364_vm2, %v2428_v47, %v2432_v8  ;;  %v2522_v8 = vrot.slane %v2520_v44, 4  ;;  %v2447_v47 = vsel %vm7364_vm2, %v2442_v56, %v8987_v41  ;;  %v7230_v41 = vld [vmem:[%s7332_s16 + $0xb0] sm:$0x1]  ;;  %v5620_v58 = vcombine.low %v2471_v51, %v2481_v32  ;;  %v7233_v44 = vld [vmem:[%s7332_s16 + $0xc8] sm:$0x1] }
 0x14e   : > { %6504 = vmatmul.mubr.bf16.gmra.mrb[28].mxu1 %v7163_v61  ;;  %6731 = vmatprep.mubr.bf16.mxu0 %v5920_v35  ;;  %v2452_v35 = vrot.slane %v2451_v26, 4  ;;  %v5618_v40 = vcombine.low %v2423_v43, %v2433_v38  ;;  %v2512_v61 = vrot.slane %v2510_v63, 5  ;;  %v2502_v6 = vshll.u32 %v7230_v41, 16 }
 0x14f   : > { %6539 = vmatprep.mubr.bf16.mxu1 %v5616_v45  ;;  %v2518_v45 = vrot.slane %v2516_v29, 5  ;;  %v2534_v26 = vshll.u32 %v5589_v36, 16  ;;  %v2490_v22 = vrot.slane %v2489_v5, 4  ;;  %v2542_v15 = vrot.slane %v2540_v33, 5 }
 0x150   : > { %v2457_v12 = vsel %vm7364_vm2, %v2452_v35, %v2456_v1  ;;  %v2513_v10 = vor.u32 %v2512_v61, %v2509_v21  ;;  %v2504_v30 = vrot.slane %v2502_v6, 5  ;;  %v2546_v43 = vrot.slane %v2544_v14, 4 }
 0x151   : > { %v2523_v39 = vor.u32 %v2522_v8, %v2518_v45  ;;  %v5619_v3 = vcombine.low %v2447_v47, %v2457_v12  ;;  %v2536_v52 = vrot.slane %v2534_v26, 5  ;;  %v2495_v31 = vsel %vm7364_vm2, %v2490_v22, %v2494_v17  ;;  %v9071_v8 = vld [vmem:[%s9142_s2] ss:$0 sm:$0xff] }
 0x152   : > { %v2514_v38 = vrot.slane %v2513_v10, 4  ;;  %v2547_v29 = vor.u32 %v2546_v43, %v2542_v15  ;;  %v2550_v35 = vshll.u32 %v7233_v44, 16 }
 0x153   : > { %v2524_v56 = vrot.slane %v2523_v39, 4  ;;  %v2537_v20 = vor.u32 %v2536_v52, %v2533_v19 }
 0x154   : > { %v2519_v4 = vsel %vm7364_vm2, %v2514_v38, %v2518_v45  ;;  %v2552_v54 = vrot.slane %v2550_v35, 5 }
 0x155   : > { %6732 = vmatmul.mubr.bf16.gmra.mrb[16].mxu0 %v5921_v62  ;;  %v2499_v62 = vor.u32 %v2498_v24, %v2494_v17  ;;  %v2538_v25 = vrot.slane %v2537_v20, 4 }
 0x156   : > { %6540 = vmatmul.mubr.bf16.vlgmr.msra.gmra.mrb[16].mxu1 %v8812_v50  ;;  %6735 = vmatprep.mubr.bf16.mxu0 %v5922_v59  ;;  %v7232_v50 = vld [vmem:[%s7332_s16 + $0xbc] sm:$0x1] }
 0x157   : > { %6543 = vmatprep.mubr.bf16.mxu1 %v5618_v40  ;;  %v2526_v23 = vshll.u32 %v7232_v50, 16  ;;  %v2500_v59 = vrot.slane %v2499_v62, 4  ;;  %v2543_v13 = vsel %vm7364_vm2, %v2538_v25, %v2542_v15 }
 0x159   : > { %v2528_v1 = vrot.slane %v2526_v23, 5  ;;  %v2505_v63 = vsel %vm7364_vm2, %v2500_v59, %v2504_v30 }
 0x15b   : > { %v2529_v57 = vsel %vm7364_vm2, %v2524_v56, %v2528_v1 }
 0x15c   : > { %v5622_v7 = vcombine.low %v2519_v4, %v2529_v57 }
 0x15d   : > { %6736 = vmatmul.mubr.bf16.gmra.mrb[20].mxu0 %v5923_v53  ;;  %v5621_v53 = vcombine.low %v2495_v31, %v2505_v63 }
 0x15e   : > { %6544 = vmatmul.mubr.bf16.gmra.mrb[20].mxu1 %v5619_v3  ;;  %6739 = vmatprep.mubr.bf16.mxu0 %v5924_v16  ;;  %v2548_v16 = vrot.slane %v2547_v29, 4 }
 0x15f   : > { %6547 = vmatprep.mubr.bf16.mxu1 %v5620_v58 }
 0x160   : > { %v2553_v60 = vsel %vm7364_vm2, %v2548_v16, %v2552_v54 }
 0x161   : > { %v5623_v0 = vcombine.low %v2543_v13, %v2553_v60 }
 0x165   : > { %6740 = vmatmul.mubr.bf16.gmra.mrb[24].mxu0 %v5925_v2 }
 0x166   : > { %6548 = vmatmul.mubr.bf16.gmra.mrb[24].mxu1 %v5621_v53  ;;  %6743 = vmatprep.mubr.bf16.mxu0 %v5926_v28 }
 0x167   : > { %6551 = vmatprep.mubr.bf16.mxu1 %v5622_v7 }
 0x16d   : > { %6744 = vmatmul.mubr.bf16.gmra.mrb[28].mxu0 %v5927_v48 }
 0x16e   : > { %6552 = vmatmul.mubr.bf16.gmra.mrb[28].mxu1 %v5623_v0 }
 0x1e9   : > { %v6477_v27 = vpop.f32.mrb[0].mxu1 }
 0x1ea   : > { %v1963_v46 = vpop.f32.mrb[1].mxu1 }
 0x1eb   : > { %v6478_v2 = vpop.f32.mrb[2].mxu1 }
 0x1ec   : > { %v1966_v42 = vpop.f32.mrb[3].mxu1 }
 0x1f1   : > { %v6481_v17 = vpop.f32.mrb[4].mxu1 }
 0x1f2   : > { %v1979_v55 = vpop.f32.mrb[5].mxu1 }
 0x1f3   : > { %v6482_v49 = vpop.f32.mrb[6].mxu1 }
 0x1f4   : > { %v1982_v28 = vpop.f32.mrb[7].mxu1 }
 0x1f9   : > { %v6485_v24 = vpop.f32.mrb[8].mxu1 }
 0x1fa   : > { %v1995_v40 = vpop.f32.mrb[9].mxu1 }
 0x1fb   : > { %v6486_v21 = vpop.f32.mrb[10].mxu1 }
 0x1fc   : > { %v1998_v61 = vpop.f32.mrb[11].mxu1 }
 0x201   : > { %v9060_v37 = vpop.f32.mrb[12].mxu1 }
 0x202   : > { %v9062_v45 = vpop.f32.mrb[13].mxu1 }
 0x203   : > { %v9064_v34 = vpop.f32.mrb[14].mxu1 }
 0x204   : > { %v9066_v11 = vpop.f32.mrb[15].mxu1 }
 0x208   : > { %v6717_v48 = vpop.f32.mrb[0].mxu0 }
 0x209   : > { %v6763_v36 = vadd.f32 %v6717_v48, %v6477_v27  ;;  %v4857_v47 = vpop.f32.mrb[1].mxu0 }
 0x20a   : > { %v6764_v12 = vadd.f32 %v4857_v47, %v1963_v46  ;;  %v6718_v51 = vpop.f32.mrb[2].mxu0 }
 0x20b   : > { %v5025_v32 = vadd.f32 %v6763_v36, %v9071_v8  ;;  %v6765_v5 = vadd.f32 %v6718_v51, %v6478_v2  ;;  %v4860_v62 = vpop.f32.mrb[3].mxu0 }
 0x20c   : > { %v5023_v41 = vadd.f32 %v6764_v12, %v9071_v8  ;;  %v6766_v6 = vadd.f32 %v4860_v62, %v1966_v42 }
 0x20d   : > { %v5026_v9 = vadd.f32 %v6765_v5, %v9071_v8  ;;  %v5057_v18 = vmax.f32 %v5025_v32, 0.0 }
 0x20e   : > { %v5024_v26 = vadd.f32 %v6766_v6, %v9071_v8  ;;  %v5055_v14 = vmax.f32 %v5023_v41, 0.0 }
 0x20f   : > { %v5058_v33 = vmax.f32 %v5026_v9, 0.0 }
 0x210   : > { %v5056_v10 = vmax.f32 %v5024_v26, 0.0  ;;  %v6721_v39 = vpop.f32.mrb[4].mxu0 }
 0x211   : > { %v6012_v50 = vpack.c.bf16 %v5058_v33, %v5057_v18  ;;  %v6767_v23 = vadd.f32 %v6721_v39, %v6481_v17  ;;  %v4873_v3 = vpop.f32.mrb[5].mxu0 }
 0x212   : > { %v6007_v58 = vpack.c.bf16 %v5056_v10, %v5055_v14  ;;  %v6768_v22 = vadd.f32 %v4873_v3, %v1979_v55  ;;  %v6722_v59 = vpop.f32.mrb[6].mxu0 }
 0x213   : > { %6084 = vst [vmem:[%s9081_s29 + $0x8] sm:$0xff] %v6012_v50   ;;  %v5029_v30 = vadd.f32 %v6767_v23, %v9071_v8  ;;  %v6769_v19 = vadd.f32 %v6722_v59, %v6482_v49  ;;  %v4876_v52 = vpop.f32.mrb[7].mxu0 }
 0x214   : > { %6008 = vst [vmem:[%s9081_s29] sm:$0xff] %v6007_v58   ;;  %v5027_v15 = vadd.f32 %v6768_v22, %v9071_v8  ;;  %v6770_v43 = vadd.f32 %v4876_v52, %v1982_v28 }
 0x215   : > { %v5030_v38 = vadd.f32 %v6769_v19, %v9071_v8  ;;  %v5061_v1 = vmax.f32 %v5029_v30, 0.0 }
 0x216   : > { %v5028_v56 = vadd.f32 %v6770_v43, %v9071_v8  ;;  %v5059_v63 = vmax.f32 %v5027_v15, 0.0 }
 0x217   : > { %v5062_v31 = vmax.f32 %v5030_v38, 0.0 }
 0x218   : > { %v5060_v20 = vmax.f32 %v5028_v56, 0.0  ;;  %v6725_v29 = vpop.f32.mrb[8].mxu0 }
 0x219   : > { %v6022_v44 = vpack.c.bf16 %v5062_v31, %v5061_v1  ;;  %v6771_v35 = vadd.f32 %v6725_v29, %v6485_v24  ;;  %v4889_v4 = vpop.f32.mrb[9].mxu0 }
 0x21a   : > { %v6017_v57 = vpack.c.bf16 %v5060_v20, %v5059_v63  ;;  %v6772_v53 = vadd.f32 %v4889_v4, %v1995_v40  ;;  %v6726_v7 = vpop.f32.mrb[10].mxu0 }
 0x21b   : > { %6086 = vst [vmem:[%s9081_s29 + $0x18] sm:$0xff] %v6022_v44   ;;  %v5033_v25 = vadd.f32 %v6771_v35, %v9071_v8  ;;  %v6773_v16 = vadd.f32 %v6726_v7, %v6486_v21  ;;  %v4892_v54 = vpop.f32.mrb[11].mxu0 }
 0x21c   : > { %6085 = vst [vmem:[%s9081_s29 + $0x10] sm:$0xff] %v6017_v57   ;;  %v5031_v13 = vadd.f32 %v6772_v53, %v9071_v8  ;;  %v6774_v60 = vadd.f32 %v4892_v54, %v1998_v61 }
 0x21d   : > { %v5034_v0 = vadd.f32 %v6773_v16, %v9071_v8  ;;  %v5065_v46 = vmax.f32 %v5033_v25, 0.0 }
 0x21e   : > { %v5032_v27 = vadd.f32 %v6774_v60, %v9071_v8  ;;  %v5063_v42 = vmax.f32 %v5031_v13, 0.0 }
 0x21f   : > { %v5066_v2 = vmax.f32 %v5034_v0, 0.0 }
 0x220   : > { %v5064_v17 = vmax.f32 %v5032_v27, 0.0  ;;  %v6729_v55 = vpop.f32.mrb[12].mxu0 }
 0x221   : > { %v6032_v49 = vpack.c.bf16 %v5066_v2, %v5065_v46  ;;  %v6775_v28 = vadd.f32 %v6729_v55, %v9060_v37  ;;  %v4905_v24 = vpop.f32.mrb[13].mxu0 }
 0x222   : > { %v6027_v40 = vpack.c.bf16 %v5064_v17, %v5063_v42  ;;  %v6776_v21 = vadd.f32 %v4905_v24, %v9062_v45  ;;  %v6730_v48 = vpop.f32.mrb[14].mxu0 }
 0x223   : > { %6088 = vst [vmem:[%s9081_s29 + $0x28] sm:$0xff] %v6032_v49   ;;  %v5037_v61 = vadd.f32 %v6775_v28, %v9071_v8  ;;  %v6777_v36 = vadd.f32 %v6730_v48, %v9064_v34  ;;  %v4908_v47 = vpop.f32.mrb[15].mxu0 }
 0x224   : > { %6087 = vst [vmem:[%s9081_s29 + $0x20] sm:$0xff] %v6027_v40   ;;  %v5035_v12 = vadd.f32 %v6776_v21, %v9071_v8  ;;  %v6778_v51 = vadd.f32 %v4908_v47, %v9066_v11 }
 0x225   : > { %v5038_v32 = vadd.f32 %v6777_v36, %v9071_v8  ;;  %v5069_v5 = vmax.f32 %v5037_v61, 0.0 }
 0x226   : > { %v5036_v37 = vadd.f32 %v6778_v51, %v9071_v8  ;;  %v5067_v62 = vmax.f32 %v5035_v12, 0.0 }
 0x227   : > { %v5070_v45 = vmax.f32 %v5038_v32, 0.0 }
 0x228   : > { %v5068_v41 = vmax.f32 %v5036_v37, 0.0  ;;  %v6733_v6 = vpop.f32.mrb[16].mxu0 }
 0x229   : > { %v6042_v9 = vpack.c.bf16 %v5070_v45, %v5069_v5  ;;  %v6541_v26 = vpop.f32.mrb[16].mxu1  ;;  %v4921_v34 = vpop.f32.mrb[17].mxu0 }
 0x22a   : > { %v6037_v18 = vpack.c.bf16 %v5068_v41, %v5067_v62  ;;  %v6779_v33 = vadd.f32 %v6733_v6, %v6541_v26  ;;  %v2781_v14 = vpop.f32.mrb[17].mxu1  ;;  %v6734_v10 = vpop.f32.mrb[18].mxu0 }
 0x22b   : > { %6090 = vst [vmem:[%s9081_s29 + $0x38] sm:$0xff] %v6042_v9   ;;  %v6780_v39 = vadd.f32 %v4921_v34, %v2781_v14  ;;  %v6542_v11 = vpop.f32.mrb[18].mxu1  ;;  %v4924_v50 = vpop.f32.mrb[19].mxu0 }
 0x22c   : > { %6089 = vst [vmem:[%s9081_s29 + $0x30] sm:$0xff] %v6037_v18   ;;  %v5041_v23 = vadd.f32 %v6779_v33, %v9071_v8  ;;  %v6781_v3 = vadd.f32 %v6734_v10, %v6542_v11  ;;  %v2784_v58 = vpop.f32.mrb[19].mxu1 }
 0x22d   : > { %v5039_v22 = vadd.f32 %v6780_v39, %v9071_v8  ;;  %v6782_v59 = vadd.f32 %v4924_v50, %v2784_v58 }
 0x22e   : > { %v5042_v30 = vadd.f32 %v6781_v3, %v9071_v8  ;;  %v5073_v52 = vmax.f32 %v5041_v23, 0.0 }
 0x22f   : > { %v5040_v19 = vadd.f32 %v6782_v59, %v9071_v8  ;;  %v5071_v38 = vmax.f32 %v5039_v22, 0.0 }
 0x230   : > { %v5074_v15 = vmax.f32 %v5042_v30, 0.0  ;;  %v6737_v43 = vpop.f32.mrb[20].mxu0 }
 0x231   : > { %v5072_v56 = vmax.f32 %v5040_v19, 0.0  ;;  %v6545_v1 = vpop.f32.mrb[20].mxu1  ;;  %v4937_v31 = vpop.f32.mrb[21].mxu0 }
 0x232   : > { %v6052_v63 = vpack.c.bf16 %v5074_v15, %v5073_v52  ;;  %v6783_v20 = vadd.f32 %v6737_v43, %v6545_v1  ;;  %v2797_v29 = vpop.f32.mrb[21].mxu1  ;;  %v6738_v44 = vpop.f32.mrb[22].mxu0 }
 0x233   : > { %v6047_v35 = vpack.c.bf16 %v5072_v56, %v5071_v38  ;;  %v6784_v4 = vadd.f32 %v4937_v31, %v2797_v29  ;;  %v6546_v57 = vpop.f32.mrb[22].mxu1  ;;  %v4940_v53 = vpop.f32.mrb[23].mxu0 }
 0x234   : > { %6092 = vst [vmem:[%s9081_s29 + $0x48] sm:$0xff] %v6052_v63   ;;  %v5045_v7 = vadd.f32 %v6783_v20, %v9071_v8  ;;  %v6785_v25 = vadd.f32 %v6738_v44, %v6546_v57  ;;  %v2800_v16 = vpop.f32.mrb[23].mxu1 }
 0x235   : > { %6091 = vst [vmem:[%s9081_s29 + $0x40] sm:$0xff] %v6047_v35   ;;  %v5043_v54 = vadd.f32 %v6784_v4, %v9071_v8  ;;  %v6786_v13 = vadd.f32 %v4940_v53, %v2800_v16 }
 0x236   : > { %v5046_v60 = vadd.f32 %v6785_v25, %v9071_v8  ;;  %v5077_v27 = vmax.f32 %v5045_v7, 0.0 }
 0x237   : > { %v5044_v0 = vadd.f32 %v6786_v13, %v9071_v8  ;;  %v5075_v42 = vmax.f32 %v5043_v54, 0.0 }
 0x238   : > { %v5078_v46 = vmax.f32 %v5046_v60, 0.0  ;;  %v6741_v2 = vpop.f32.mrb[24].mxu0 }
 0x239   : > { %v5076_v17 = vmax.f32 %v5044_v0, 0.0  ;;  %v6549_v55 = vpop.f32.mrb[24].mxu1  ;;  %v4953_v49 = vpop.f32.mrb[25].mxu0 }
 0x23a   : > { %v6062_v28 = vpack.c.bf16 %v5078_v46, %v5077_v27  ;;  %v6787_v24 = vadd.f32 %v6741_v2, %v6549_v55  ;;  %v2813_v40 = vpop.f32.mrb[25].mxu1  ;;  %v6742_v21 = vpop.f32.mrb[26].mxu0 }
 0x23b   : > { %v6057_v48 = vpack.c.bf16 %v5076_v17, %v5075_v42  ;;  %v6788_v61 = vadd.f32 %v4953_v49, %v2813_v40  ;;  %v6550_v36 = vpop.f32.mrb[26].mxu1  ;;  %v4956_v47 = vpop.f32.mrb[27].mxu0 }
 0x23c   : > { %6094 = vst [vmem:[%s9081_s29 + $0x58] sm:$0xff] %v6062_v28   ;;  %v5049_v12 = vadd.f32 %v6787_v24, %v9071_v8  ;;  %v6789_v51 = vadd.f32 %v6742_v21, %v6550_v36  ;;  %v2816_v32 = vpop.f32.mrb[27].mxu1 }
 0x23d   : > { %6093 = vst [vmem:[%s9081_s29 + $0x50] sm:$0xff] %v6057_v48   ;;  %v5047_v37 = vadd.f32 %v6788_v61, %v9071_v8  ;;  %v6790_v5 = vadd.f32 %v4956_v47, %v2816_v32 }
 0x23e   : > { %v5050_v45 = vadd.f32 %v6789_v51, %v9071_v8  ;;  %v5081_v41 = vmax.f32 %v5049_v12, 0.0 }
 0x23f   : > { %v5048_v62 = vadd.f32 %v6790_v5, %v9071_v8  ;;  %v5079_v26 = vmax.f32 %v5047_v37, 0.0 }
 0x240   : > { %v5082_v6 = vmax.f32 %v5050_v45, 0.0  ;;  %v6745_v9 = vpop.f32.mrb[28].mxu0 }
 0x241   : > { %v5080_v34 = vmax.f32 %v5048_v62, 0.0  ;;  %v6553_v18 = vpop.f32.mrb[28].mxu1  ;;  %v4969_v33 = vpop.f32.mrb[29].mxu0 }
 0x242   : > { %v6072_v14 = vpack.c.bf16 %v5082_v6, %v5081_v41  ;;  %v6791_v10 = vadd.f32 %v6745_v9, %v6553_v18  ;;  %v2829_v39 = vpop.f32.mrb[29].mxu1  ;;  %v6746_v11 = vpop.f32.mrb[30].mxu0 }
 0x243   : > { %v6067_v50 = vpack.c.bf16 %v5080_v34, %v5079_v26  ;;  %v6792_v23 = vadd.f32 %v4969_v33, %v2829_v39  ;;  %v6554_v3 = vpop.f32.mrb[30].mxu1  ;;  %v4972_v58 = vpop.f32.mrb[31].mxu0 }
 0x244   : > { %6096 = vst [vmem:[%s9081_s29 + $0x68] sm:$0xff] %v6072_v14   ;;  %v5053_v22 = vadd.f32 %v6791_v10, %v9071_v8  ;;  %v6793_v59 = vadd.f32 %v6746_v11, %v6554_v3  ;;  %v2832_v30 = vpop.f32.mrb[31].mxu1 }
 0x245   : > { %6095 = vst [vmem:[%s9081_s29 + $0x60] sm:$0xff] %v6067_v50   ;;  %v5051_v19 = vadd.f32 %v6792_v23, %v9071_v8  ;;  %v6794_v52 = vadd.f32 %v4972_v58, %v2832_v30 }
 0x246   : > { %v5054_v15 = vadd.f32 %v6793_v59, %v9071_v8  ;;  %v5085_v38 = vmax.f32 %v5053_v22, 0.0 }
 0x247   : > { %v5052_v43 = vadd.f32 %v6794_v52, %v9071_v8  ;;  %v5083_v1 = vmax.f32 %v5051_v19, 0.0 }
 0x248   : > { %v5086_v56 = vmax.f32 %v5054_v15, 0.0 }
 0x249   : > { %v5084_v31 = vmax.f32 %v5052_v43, 0.0 }
 0x24a   : > { %v6082_v63 = vpack.c.bf16 %v5086_v56, %v5085_v38 }
 0x24b   : > { %v6077_v20 = vpack.c.bf16 %v5084_v31, %v5083_v1 }
 0x24c   : > { %6098 = vst [vmem:[%s9081_s29 + $0x78] sm:$0xff] %v6082_v63  }
 0x24d   : > { %6097 = vst [vmem:[%s9081_s29 + $0x70] sm:$0xff] %v6077_v20  }
 0x24e PF: > { %s13_s14 = sadd.s32 1, %s7256_s14   ;;  %s9210_s12 = smov %s7252_s13 }
 0x24f   : > { %p10_p5 = scmp.ge.s32.totalorder %s13_s14, 4   ;;  %s9211_s13 = smov %s9213_s15 }
 0x251   :  { %12 = sbr.rel (!%p10_p5) target bundleno = 2 (0x2), region = 73 }

</bundles_post_ra>
